<compile_context>
chip_gen: v6e
topology: v6e:2x2x1
jax: 0.10.0
libtpu: 0.0.40
codegen_flags: <defaults>
</compile_context>

<pallas_src>
import functools

import jax
import jax.numpy as jnp
from jax import lax
from jax.experimental import pallas as pl
from jax.experimental.pallas import tpu as pltpu


def _round_up(x, m):
    return ((x + m - 1) // m) * m


def _vmem_limit_bytes():
    """Per-generation scoped VMEM limit (~3/4 of physical), with a safe fallback."""
    try:
        phys = pltpu.get_tpu_info().vmem_capacity_bytes
        return int(max(32 * 1024 * 1024, min(phys * 3 // 4, 96 * 1024 * 1024)))
    except Exception:
        return 64 * 1024 * 1024


# ----------------------------------------------------------------------------
# One-time (init-time) parameter preparation — NOT inside the jitted forward.
# ----------------------------------------------------------------------------
def prepare_audio_mlp_params(raw):
    """Fuse gate/up weights and pre-cast matmul weights to bf16 once.

    raw: dict with
        ln_g, ln_b            : (D,)
        gate_w, up_w          : (D, I)   (y = x @ W + b layout)
        gate_b, up_b          : (I,)
        down_w                : (I, D)
        down_b                : (D,)
    """
    D, I = raw["gate_w"].shape
    return {
        "ln_g": raw["ln_g"].reshape(1, D).astype(jnp.float32),
        "ln_b": raw["ln_b"].reshape(1, D).astype(jnp.float32),
        # Fused [gate | up] weight, matches the real gate_up_proj layout.
        "w_gate_up": jnp.concatenate([raw["gate_w"], raw["up_w"]],
                                     axis=1).astype(jnp.bfloat16),
        # Biases stay f32 (tiny, added to the f32 accumulator).
        "b_gate_up": jnp.concatenate([raw["gate_b"], raw["up_b"]],
                                     axis=0).reshape(1, 2 * I).astype(jnp.float32),
        "w_down": raw["down_w"].astype(jnp.bfloat16),
        "b_down": raw["down_b"].reshape(1, D).astype(jnp.float32),
    }


# ----------------------------------------------------------------------------
# Fused kernel: LayerNorm -> fused gate_up matmul -> MulAndSilu -> down matmul
# ----------------------------------------------------------------------------
def _audio_mlp_kernel(x_ref, ln_g_ref, ln_b_ref,
                      w_gu_ref, b_gu_ref,
                      wd_ref, bd_ref, o_ref, *, eps, inter):
    # ---- LayerNorm, f32 stats in a single reduction pass ----
    x = x_ref[...].astype(jnp.float32)                     # (tm, D)
    mean = jnp.mean(x, axis=-1, keepdims=True)
    mean_sq = jnp.mean(x * x, axis=-1, keepdims=True)
    var = jnp.maximum(mean_sq - mean * mean, 0.0)
    h = (x - mean) * lax.rsqrt(var + eps) * ln_g_ref[...] + ln_b_ref[...]

    # ---- Fused gate_up projection (one wide MXU matmul, f32 accumulation) ----
    hb = h.astype(jnp.bfloat16)
    gu = jnp.dot(hb, w_gu_ref[...],
                 preferred_element_type=jnp.float32) + b_gu_ref[...]
    g = gu[:, :inter]           # lane-aligned slice (inter is a multiple of 128)
    u = gu[:, inter:]

    # ---- MulAndSilu: gate * silu(up) ----
    a = g * (u * jax.nn.sigmoid(u))

    # ---- down_proj ----
    y = jnp.dot(a.astype(jnp.bfloat16), wd_ref[...],
                preferred_element_type=jnp.float32) + bd_ref[...]
    o_ref[...] = y.astype(o_ref.dtype)


# ----------------------------------------------------------------------------
# Wrapper
# ----------------------------------------------------------------------------
def phi4mm_audio_mlp(hidden_states, params, *, eps=1e-5, tm=256,
                     single_buffer_weights=True):
    """Fused Phi4MultimodalAudioMLP forward.

    hidden_states: (..., D), any float dtype (kept as-is for HBM I/O).
    params: output of prepare_audio_mlp_params().
    """
    orig_shape = hidden_states.shape
    D = orig_shape[-1]
    x2d = hidden_states.reshape(-1, D)          # native dtype, no convert
    M = x2d.shape[0]
    two_i = params["w_gate_up"].shape[1]
    I = two_i // 2

    # Big row tile; shrink only if the whole problem is smaller than one tile.
    tm_eff = min(tm, _round_up(M, 8))
    grid_m = pl.cdiv(M, tm_eff)
    # Small-M: ensure the "parallel" axis has >= 2 steps so both v7x
    # TensorCores get work (no-op on single-core v5e/v6e).
    if grid_m == 1 and M > 8:
        tm_eff = _round_up(pl.cdiv(M, 2), 8)
        grid_m = pl.cdiv(M, tm_eff)

    # Grid-invariant operands: request single buffering (weights are DMA'd
    # once and stay resident; double-buffering them only wastes VMEM).
    const_kwargs = {}
    if single_buffer_weights:
        const_kwargs["pipeline_mode"] = pl.Buffered(1)

    def const_spec(shape):
        return pl.BlockSpec(shape, lambda i: (0, 0), **const_kwargs)

    out = pl.pallas_call(
        functools.partial(_audio_mlp_kernel, eps=eps, inter=I),
        out_shape=jax.ShapeDtypeStruct((M, D), hidden_states.dtype),
        grid=(grid_m,),
        in_specs=[
            pl.BlockSpec((tm_eff, D), lambda i: (i, 0)),   # x rows
            const_spec((1, D)),                            # ln gamma
            const_spec((1, D)),                            # ln beta
            const_spec((D, two_i)),                        # fused [gate|up] weight
            const_spec((1, two_i)),                        # fused [gate|up] bias
            const_spec((I, D)),                            # down weight
            const_spec((1, D)),                            # down bias
        ],
        out_specs=pl.BlockSpec((tm_eff, D), lambda i: (i, 0)),
        compiler_params=pltpu.CompilerParams(
            dimension_semantics=("parallel",),
            vmem_limit_bytes=_vmem_limit_bytes(),
        ),
    )(
        x2d,
        params["ln_g"], params["ln_b"],
        params["w_gate_up"], params["b_gate_up"],
        params["w_down"], params["b_down"],
    )
    return out.reshape(orig_shape)


# ----------------------------------------------------------------------------
# Pure-JAX reference (f32 everywhere) for a sanity check
# ----------------------------------------------------------------------------
def _reference_mlp(x, raw, eps=1e-5):
    D = x.shape[-1]
    h = x.reshape(-1, D).astype(jnp.float32)
    mean = jnp.mean(h, axis=-1, keepdims=True)
    var = jnp.mean((h - mean) ** 2, axis=-1, keepdims=True)
    h = (h - mean) * lax.rsqrt(var + eps) * raw["ln_g"] + raw["ln_b"]
    g = h @ raw["gate_w"] + raw["gate_b"]
    u = h @ raw["up_w"] + raw["up_b"]
    a = g * (u * jax.nn.sigmoid(u))          # MulAndSilu
    y = a @ raw["down_w"] + raw["down_b"]
    return y.reshape(x.shape)


# ----------------------------------------------------------------------------
if __name__ == "__main__":
    key = jax.random.PRNGKey(0)

    # Small but lane-dense shapes consistent with the module:
    #   hidden_size D = 128, intermediate_size I = 256, tokens = 2 * 128 = 256
    D, I = 128, 256
    B, S = 2, 128

    keys = iter(jax.random.split(key, 16))

    def rnd(shape, scale=0.02):
        return (scale * jax.random.normal(next(keys), shape)).astype(jnp.float32)

    raw_params = {
        "ln_g": jnp.ones((D,), jnp.float32),
        "ln_b": rnd((D,)),
        "gate_w": rnd((D, I)), "gate_b": rnd((I,)),
        "up_w": rnd((D, I)), "up_b": rnd((I,)),
        "down_w": rnd((I, D)), "down_b": rnd((D,)),
    }
    hidden_states = jax.random.normal(next(keys), (B, S, D), dtype=jnp.float32)

    # One-time parameter prep (bf16 weight cast + gate/up fusion) outside jit.
    params = prepare_audio_mlp_params(raw_params)

    fwd = jax.jit(lambda x, p: phi4mm_audio_mlp(x, p))
    try:
        out = jax.block_until_ready(fwd(hidden_states, params))
    except Exception:
        # Fallback for jax builds where pallas_call BlockSpecs reject
        # pipeline_mode=pl.Buffered(1); semantics are identical.
        fwd = jax.jit(lambda x, p: phi4mm_audio_mlp(x, p,
                                                    single_buffer_weights=False))
        out = jax.block_until_ready(fwd(hidden_states, params))

    expected = _reference_mlp(hidden_states, raw_params)

    assert out.shape == (B, S, D), out.shape
    assert bool(jnp.all(jnp.isfinite(out)))
    max_err = float(jnp.max(jnp.abs(out - expected)))
    assert max_err < 3e-2, f"max abs err {max_err}"

    # Also exercise the native-bf16 I/O path (no wrapper-side dtype converts).
    out_bf16 = jax.block_until_ready(fwd(hidden_states.astype(jnp.bfloat16), params))
    assert out_bf16.dtype == jnp.bfloat16
    assert bool(jnp.all(jnp.isfinite(out_bf16.astype(jnp.float32))))

    print("KERNEL_OK")
</pallas_src>

<mosaic_0001>
module attributes {stable_mosaic.version = 11 : i64} {
  func.func @_audio_mlp_kernel(%arg0: i32, %arg1: memref<128x128xf32, #tpu.memory_space<vmem>>, %arg2: memref<1x128xf32, #tpu.memory_space<vmem>>, %arg3: memref<1x128xf32, #tpu.memory_space<vmem>>, %arg4: memref<128x512xbf16, #tpu.memory_space<vmem>>, %arg5: memref<1x512xf32, #tpu.memory_space<vmem>>, %arg6: memref<256x128xbf16, #tpu.memory_space<vmem>>, %arg7: memref<1x128xf32, #tpu.memory_space<vmem>>, %arg8: memref<128x128xf32, #tpu.memory_space<vmem>>) attributes {dimension_semantics = [#tpu.dimension_semantics<parallel>], iteration_bounds = array<i64: 2>, scalar_prefetch = 0 : i64, scratch_operands = 0 : i64, tpu.core_type = #tpu.core_type<tc>, window_params = [{transform_indices = @transform_0, window_bounds = array<i64: 128, 128>}, {pipeline_mode = #tpu.pipeline_mode<synchronous>, transform_indices = @transform_1, window_bounds = array<i64: 1, 128>}, {pipeline_mode = #tpu.pipeline_mode<synchronous>, transform_indices = @transform_2, window_bounds = array<i64: 1, 128>}, {pipeline_mode = #tpu.pipeline_mode<synchronous>, transform_indices = @transform_3, window_bounds = array<i64: 128, 512>}, {pipeline_mode = #tpu.pipeline_mode<synchronous>, transform_indices = @transform_4, window_bounds = array<i64: 1, 512>}, {pipeline_mode = #tpu.pipeline_mode<synchronous>, transform_indices = @transform_5, window_bounds = array<i64: 256, 128>}, {pipeline_mode = #tpu.pipeline_mode<synchronous>, transform_indices = @transform_6, window_bounds = array<i64: 1, 128>}, {transform_indices = @transform_7, window_bounds = array<i64: 128, 128>}]} {
    %c0 = arith.constant 0 : index
    %c0_0 = arith.constant 0 : index
    %0 = vector.load %arg1[%c0, %c0_0] : memref<128x128xf32, #tpu.memory_space<vmem>>, vector<128x128xf32>
    %cst = arith.constant dense<0.000000e+00> : vector<128xf32>
    %1 = vector.multi_reduction <add>, %0, %cst [1] : vector<128x128xf32> to vector<128xf32>
    %2 = vector.shape_cast %1 : vector<128xf32> to vector<128x1xf32>
    %cst_1 = arith.constant 1.280000e+02 : f32
    %3 = vector.broadcast %cst_1 : f32 to vector<128x1xf32>
    %4 = arith.divf %2, %3 : vector<128x1xf32>
    %5 = arith.mulf %0, %0 : vector<128x128xf32>
    %cst_2 = arith.constant dense<0.000000e+00> : vector<128xf32>
    %6 = vector.multi_reduction <add>, %5, %cst_2 [1] : vector<128x128xf32> to vector<128xf32>
    %7 = vector.shape_cast %6 : vector<128xf32> to vector<128x1xf32>
    %cst_3 = arith.constant 1.280000e+02 : f32
    %8 = vector.broadcast %cst_3 : f32 to vector<128x1xf32>
    %9 = arith.divf %7, %8 : vector<128x1xf32>
    %10 = arith.mulf %4, %4 : vector<128x1xf32>
    %11 = arith.subf %9, %10 : vector<128x1xf32>
    %cst_4 = arith.constant 0.000000e+00 : f32
    %12 = vector.broadcast %cst_4 : f32 to vector<128x1xf32>
    %13 = arith.maximumf %11, %12 : vector<128x1xf32>
    %14 = vector.broadcast %4 : vector<128x1xf32> to vector<128x128xf32>
    %15 = arith.subf %0, %14 : vector<128x128xf32>
    %cst_5 = arith.constant 9.99999974E-6 : f32
    %16 = vector.broadcast %cst_5 : f32 to vector<128x1xf32>
    %17 = arith.addf %13, %16 : vector<128x1xf32>
    %18 = math.rsqrt %17 : vector<128x1xf32>
    %19 = vector.broadcast %18 : vector<128x1xf32> to vector<128x128xf32>
    %20 = arith.mulf %15, %19 : vector<128x128xf32>
    %c0_6 = arith.constant 0 : index
    %c0_7 = arith.constant 0 : index
    %21 = vector.load %arg2[%c0_6, %c0_7] : memref<1x128xf32, #tpu.memory_space<vmem>>, vector<1x128xf32>
    %22 = vector.broadcast %21 : vector<1x128xf32> to vector<128x128xf32>
    %23 = arith.mulf %20, %22 : vector<128x128xf32>
    %c0_8 = arith.constant 0 : index
    %c0_9 = arith.constant 0 : index
    %24 = vector.load %arg3[%c0_8, %c0_9] : memref<1x128xf32, #tpu.memory_space<vmem>>, vector<1x128xf32>
    %25 = vector.broadcast %24 : vector<1x128xf32> to vector<128x128xf32>
    %26 = arith.addf %23, %25 : vector<128x128xf32>
    %27 = arith.truncf %26 : vector<128x128xf32> to vector<128x128xbf16>
    %c0_10 = arith.constant 0 : index
    %c0_11 = arith.constant 0 : index
    %28 = vector.load %arg4[%c0_10, %c0_11] : memref<128x512xbf16, #tpu.memory_space<vmem>>, vector<128x512xbf16>
    %cst_12 = arith.constant dense<0.000000e+00> : vector<128x512xf32>
    %29 = tpu.matmul %27, %28, %cst_12 {dimension_numbers = #tpu.dot_dimension_numbers<[1], [0], [0], [1], [0, 0, 1, 1], [], []>} : vector<128x128xbf16>, vector<128x512xbf16>, vector<128x512xf32> -> vector<128x512xf32>
    %c0_13 = arith.constant 0 : index
    %c0_14 = arith.constant 0 : index
    %30 = vector.load %arg5[%c0_13, %c0_14] : memref<1x512xf32, #tpu.memory_space<vmem>>, vector<1x512xf32>
    %31 = vector.broadcast %30 : vector<1x512xf32> to vector<128x512xf32>
    %32 = arith.addf %29, %31 : vector<128x512xf32>
    %33 = vector.extract_strided_slice %32 {offsets = [0, 0], sizes = [128, 256], strides = [1, 1]} : vector<128x512xf32> to vector<128x256xf32>
    %34 = vector.extract_strided_slice %32 {offsets = [0, 256], sizes = [128, 256], strides = [1, 1]} : vector<128x512xf32> to vector<128x256xf32>
    %35 = arith.negf %34 : vector<128x256xf32>
    %36 = math.exp %35 : vector<128x256xf32>
    %cst_15 = arith.constant 1.000000e+00 : f32
    %37 = vector.broadcast %cst_15 : f32 to vector<128x256xf32>
    %38 = arith.addf %37, %36 : vector<128x256xf32>
    %39 = arith.divf %37, %38 : vector<128x256xf32>
    %40 = arith.mulf %34, %39 : vector<128x256xf32>
    %41 = arith.mulf %33, %40 : vector<128x256xf32>
    %42 = arith.truncf %41 : vector<128x256xf32> to vector<128x256xbf16>
    %c0_16 = arith.constant 0 : index
    %c0_17 = arith.constant 0 : index
    %43 = vector.load %arg6[%c0_16, %c0_17] : memref<256x128xbf16, #tpu.memory_space<vmem>>, vector<256x128xbf16>
    %cst_18 = arith.constant dense<0.000000e+00> : vector<128x128xf32>
    %44 = tpu.matmul %42, %43, %cst_18 {dimension_numbers = #tpu.dot_dimension_numbers<[1], [0], [0], [1], [0, 0, 1, 1], [], []>} : vector<128x256xbf16>, vector<256x128xbf16>, vector<128x128xf32> -> vector<128x128xf32>
    %c0_19 = arith.constant 0 : index
    %c0_20 = arith.constant 0 : index
    %45 = vector.load %arg7[%c0_19, %c0_20] : memref<1x128xf32, #tpu.memory_space<vmem>>, vector<1x128xf32>
    %46 = vector.broadcast %45 : vector<1x128xf32> to vector<128x128xf32>
    %47 = arith.addf %44, %46 : vector<128x128xf32>
    %c0_21 = arith.constant 0 : index
    %c0_22 = arith.constant 0 : index
    %48 = vector.load %arg8[%c0_21, %c0_22] : memref<128x128xf32, #tpu.memory_space<vmem>>, vector<128x128xf32>
    tpu.vector_store %arg8[%c0_21, %c0_22], %47 {strides = array<i32>} : memref<128x128xf32, #tpu.memory_space<vmem>>, vector<128x128xf32>,
    return
  }
  func.func @transform_0(%arg0: i32) -> (i32, i32) {
    %c0_i32 = arith.constant 0 : i32
    %c0_i32_0 = arith.constant 0 : i32
    return %arg0, %c0_i32 : i32, i32
  }
  func.func @transform_1(%arg0: i32) -> (i32, i32) {
    %c0_i32 = arith.constant 0 : i32
    %c0_i32_0 = arith.constant 0 : i32
    %c0_i32_1 = arith.constant 0 : i32
    return %c0_i32, %c0_i32_0 : i32, i32
  }
  func.func @transform_2(%arg0: i32) -> (i32, i32) {
    %c0_i32 = arith.constant 0 : i32
    %c0_i32_0 = arith.constant 0 : i32
    %c0_i32_1 = arith.constant 0 : i32
    return %c0_i32, %c0_i32_0 : i32, i32
  }
  func.func @transform_3(%arg0: i32) -> (i32, i32) {
    %c0_i32 = arith.constant 0 : i32
    %c0_i32_0 = arith.constant 0 : i32
    %c0_i32_1 = arith.constant 0 : i32
    return %c0_i32, %c0_i32_0 : i32, i32
  }
  func.func @transform_4(%arg0: i32) -> (i32, i32) {
    %c0_i32 = arith.constant 0 : i32
    %c0_i32_0 = arith.constant 0 : i32
    %c0_i32_1 = arith.constant 0 : i32
    return %c0_i32, %c0_i32_0 : i32, i32
  }
  func.func @transform_5(%arg0: i32) -> (i32, i32) {
    %c0_i32 = arith.constant 0 : i32
    %c0_i32_0 = arith.constant 0 : i32
    %c0_i32_1 = arith.constant 0 : i32
    return %c0_i32, %c0_i32_0 : i32, i32
  }
  func.func @transform_6(%arg0: i32) -> (i32, i32) {
    %c0_i32 = arith.constant 0 : i32
    %c0_i32_0 = arith.constant 0 : i32
    %c0_i32_1 = arith.constant 0 : i32
    return %c0_i32, %c0_i32_0 : i32, i32
  }
  func.func @transform_7(%arg0: i32) -> (i32, i32) {
    %c0_i32 = arith.constant 0 : i32
    %c0_i32_0 = arith.constant 0 : i32
    return %arg0, %c0_i32 : i32, i32
  }
}

module attributes {stable_mosaic.version = 11 : i64} {
  func.func @_audio_mlp_kernel(%arg0: i32, %arg1: memref<128x128xf32, #tpu.memory_space<vmem>>, %arg2: memref<1x128xf32, #tpu.memory_space<vmem>>, %arg3: memref<1x128xf32, #tpu.memory_space<vmem>>, %arg4: memref<128x512xbf16, #tpu.memory_space<vmem>>, %arg5: memref<1x512xf32, #tpu.memory_space<vmem>>, %arg6: memref<256x128xbf16, #tpu.memory_space<vmem>>, %arg7: memref<1x128xf32, #tpu.memory_space<vmem>>, %arg8: memref<128x128xf32, #tpu.memory_space<vmem>>) attributes {dimension_semantics = [#tpu.dimension_semantics<parallel>], iteration_bounds = array<i64: 2>, scalar_prefetch = 0 : i64, scratch_operands = 0 : i64, tpu.core_type = #tpu.core_type<tc>, window_params = [{transform_indices = @transform_0, window_bounds = array<i64: 128, 128>}, {pipeline_mode = #tpu.pipeline_mode<synchronous>, transform_indices = @transform_1, window_bounds = array<i64: 1, 128>}, {pipeline_mode = #tpu.pipeline_mode<synchronous>, transform_indices = @transform_2, window_bounds = array<i64: 1, 128>}, {pipeline_mode = #tpu.pipeline_mode<synchronous>, transform_indices = @transform_3, window_bounds = array<i64: 128, 512>}, {pipeline_mode = #tpu.pipeline_mode<synchronous>, transform_indices = @transform_4, window_bounds = array<i64: 1, 512>}, {pipeline_mode = #tpu.pipeline_mode<synchronous>, transform_indices = @transform_5, window_bounds = array<i64: 256, 128>}, {pipeline_mode = #tpu.pipeline_mode<synchronous>, transform_indices = @transform_6, window_bounds = array<i64: 1, 128>}, {transform_indices = @transform_7, window_bounds = array<i64: 128, 128>}]} {
    %c0 = arith.constant 0 : index
    %c0_0 = arith.constant 0 : index
    %0 = vector.load %arg1[%c0, %c0_0] : memref<128x128xf32, #tpu.memory_space<vmem>>, vector<128x128xf32>
    %cst = arith.constant dense<0.000000e+00> : vector<128xf32>
    %1 = vector.multi_reduction <add>, %0, %cst [1] : vector<128x128xf32> to vector<128xf32>
    %2 = vector.shape_cast %1 : vector<128xf32> to vector<128x1xf32>
    %cst_1 = arith.constant 1.280000e+02 : f32
    %3 = vector.broadcast %cst_1 : f32 to vector<128x1xf32>
    %4 = arith.divf %2, %3 : vector<128x1xf32>
    %5 = arith.mulf %0, %0 : vector<128x128xf32>
    %cst_2 = arith.constant dense<0.000000e+00> : vector<128xf32>
    %6 = vector.multi_reduction <add>, %5, %cst_2 [1] : vector<128x128xf32> to vector<128xf32>
    %7 = vector.shape_cast %6 : vector<128xf32> to vector<128x1xf32>
    %cst_3 = arith.constant 1.280000e+02 : f32
    %8 = vector.broadcast %cst_3 : f32 to vector<128x1xf32>
    %9 = arith.divf %7, %8 : vector<128x1xf32>
    %10 = arith.mulf %4, %4 : vector<128x1xf32>
    %11 = arith.subf %9, %10 : vector<128x1xf32>
    %cst_4 = arith.constant 0.000000e+00 : f32
    %12 = vector.broadcast %cst_4 : f32 to vector<128x1xf32>
    %13 = arith.maximumf %11, %12 : vector<128x1xf32>
    %14 = vector.broadcast %4 : vector<128x1xf32> to vector<128x128xf32>
    %15 = arith.subf %0, %14 : vector<128x128xf32>
    %cst_5 = arith.constant 9.99999974E-6 : f32
    %16 = vector.broadcast %cst_5 : f32 to vector<128x1xf32>
    %17 = arith.addf %13, %16 : vector<128x1xf32>
    %18 = math.rsqrt %17 : vector<128x1xf32>
    %19 = vector.broadcast %18 : vector<128x1xf32> to vector<128x128xf32>
    %20 = arith.mulf %15, %19 : vector<128x128xf32>
    %c0_6 = arith.constant 0 : index
    %c0_7 = arith.constant 0 : index
    %21 = vector.load %arg2[%c0_6, %c0_7] : memref<1x128xf32, #tpu.memory_space<vmem>>, vector<1x128xf32>
    %22 = vector.broadcast %21 : vector<1x128xf32> to vector<128x128xf32>
    %23 = arith.mulf %20, %22 : vector<128x128xf32>
    %c0_8 = arith.constant 0 : index
    %c0_9 = arith.constant 0 : index
    %24 = vector.load %arg3[%c0_8, %c0_9] : memref<1x128xf32, #tpu.memory_space<vmem>>, vector<1x128xf32>
    %25 = vector.broadcast %24 : vector<1x128xf32> to vector<128x128xf32>
    %26 = arith.addf %23, %25 : vector<128x128xf32>
    %27 = arith.truncf %26 : vector<128x128xf32> to vector<128x128xbf16>
    %c0_10 = arith.constant 0 : index
    %c0_11 = arith.constant 0 : index
    %28 = vector.load %arg4[%c0_10, %c0_11] : memref<128x512xbf16, #tpu.memory_space<vmem>>, vector<128x512xbf16>
    %cst_12 = arith.constant dense<0.000000e+00> : vector<128x512xf32>
    %29 = tpu.matmul %27, %28, %cst_12 {dimension_numbers = #tpu.dot_dimension_numbers<[1], [0], [0], [1], [0, 0, 1, 1], [], []>} : vector<128x128xbf16>, vector<128x512xbf16>, vector<128x512xf32> -> vector<128x512xf32>
    %c0_13 = arith.constant 0 : index
    %c0_14 = arith.constant 0 : index
    %30 = vector.load %arg5[%c0_13, %c0_14] : memref<1x512xf32, #tpu.memory_space<vmem>>, vector<1x512xf32>
    %31 = vector.broadcast %30 : vector<1x512xf32> to vector<128x512xf32>
    %32 = arith.addf %29, %31 : vector<128x512xf32>
    %33 = vector.extract_strided_slice %32 {offsets = [0, 0], sizes = [128, 256], strides = [1, 1]} : vector<128x512xf32> to vector<128x256xf32>
    %34 = vector.extract_strided_slice %32 {offsets = [0, 256], sizes = [128, 256], strides = [1, 1]} : vector<128x512xf32> to vector<128x256xf32>
    %35 = arith.negf %34 : vector<128x256xf32>
    %36 = math.exp %35 : vector<128x256xf32>
    %cst_15 = arith.constant 1.000000e+00 : f32
    %37 = vector.broadcast %cst_15 : f32 to vector<128x256xf32>
    %38 = arith.addf %37, %36 : vector<128x256xf32>
    %39 = arith.divf %37, %38 : vector<128x256xf32>
    %40 = arith.mulf %34, %39 : vector<128x256xf32>
    %41 = arith.mulf %33, %40 : vector<128x256xf32>
    %42 = arith.truncf %41 : vector<128x256xf32> to vector<128x256xbf16>
    %c0_16 = arith.constant 0 : index
    %c0_17 = arith.constant 0 : index
    %43 = vector.load %arg6[%c0_16, %c0_17] : memref<256x128xbf16, #tpu.memory_space<vmem>>, vector<256x128xbf16>
    %cst_18 = arith.constant dense<0.000000e+00> : vector<128x128xf32>
    %44 = tpu.matmul %42, %43, %cst_18 {dimension_numbers = #tpu.dot_dimension_numbers<[1], [0], [0], [1], [0, 0, 1, 1], [], []>} : vector<128x256xbf16>, vector<256x128xbf16>, vector<128x128xf32> -> vector<128x128xf32>
    %c0_19 = arith.constant 0 : index
    %c0_20 = arith.constant 0 : index
    %45 = vector.load %arg7[%c0_19, %c0_20] : memref<1x128xf32, #tpu.memory_space<vmem>>, vector<1x128xf32>
    %46 = vector.broadcast %45 : vector<1x128xf32> to vector<128x128xf32>
    %47 = arith.addf %44, %46 : vector<128x128xf32>
    %c0_21 = arith.constant 0 : index
    %c0_22 = arith.constant 0 : index
    %48 = vector.load %arg8[%c0_21, %c0_22] : memref<128x128xf32, #tpu.memory_space<vmem>>, vector<128x128xf32>
    tpu.vector_store %arg8[%c0_21, %c0_22], %47 {strides = array<i32>} : memref<128x128xf32, #tpu.memory_space<vmem>>, vector<128x128xf32>,
    return
  }
  func.func @transform_0(%arg0: i32) -> (i32, i32) {
    %c0_i32 = arith.constant 0 : i32
    %c0_i32_0 = arith.constant 0 : i32
    return %arg0, %c0_i32 : i32, i32
  }
  func.func @transform_1(%arg0: i32) -> (i32, i32) {
    %c0_i32 = arith.constant 0 : i32
    %c0_i32_0 = arith.constant 0 : i32
    %c0_i32_1 = arith.constant 0 : i32
    return %c0_i32, %c0_i32_0 : i32, i32
  }
  func.func @transform_2(%arg0: i32) -> (i32, i32) {
    %c0_i32 = arith.constant 0 : i32
    %c0_i32_0 = arith.constant 0 : i32
    %c0_i32_1 = arith.constant 0 : i32
    return %c0_i32, %c0_i32_0 : i32, i32
  }
  func.func @transform_3(%arg0: i32) -> (i32, i32) {
    %c0_i32 = arith.constant 0 : i32
    %c0_i32_0 = arith.constant 0 : i32
    %c0_i32_1 = arith.constant 0 : i32
    return %c0_i32, %c0_i32_0 : i32, i32
  }
  func.func @transform_4(%arg0: i32) -> (i32, i32) {
    %c0_i32 = arith.constant 0 : i32
    %c0_i32_0 = arith.constant 0 : i32
    %c0_i32_1 = arith.constant 0 : i32
    return %c0_i32, %c0_i32_0 : i32, i32
  }
  func.func @transform_5(%arg0: i32) -> (i32, i32) {
    %c0_i32 = arith.constant 0 : i32
    %c0_i32_0 = arith.constant 0 : i32
    %c0_i32_1 = arith.constant 0 : i32
    return %c0_i32, %c0_i32_0 : i32, i32
  }
  func.func @transform_6(%arg0: i32) -> (i32, i32) {
    %c0_i32 = arith.constant 0 : i32
    %c0_i32_0 = arith.constant 0 : i32
    %c0_i32_1 = arith.constant 0 : i32
    return %c0_i32, %c0_i32_0 : i32, i32
  }
  func.func @transform_7(%arg0: i32) -> (i32, i32) {
    %c0_i32 = arith.constant 0 : i32
    %c0_i32_0 = arith.constant 0 : i32
    return %arg0, %c0_i32 : i32, i32
  }
}

</mosaic_0001>

<bundles_post_ra>
// kernel: _lambda_.1
= control target key start
LH: loop header
LB: loop body
LE: loop exit
PB: predicated region body
PF: predicated region fallthrough
CT: control target
= control target key end

     0   :  { %s3246_s0 = inlined_call_operand.hbm [shape: f32[256,128], index: 0, kind: input, shape index: {}]   ;;  %s3247_s1 = inlined_call_operand.vmem [shape: f32[1,128], index: 1, kind: input, shape index: {}]   ;;  %s3248_s2 = inlined_call_operand.vmem [shape: f32[1,128], index: 2, kind: input, shape index: {}]   ;;  %s3249_s3 = inlined_call_operand.hbm [shape: bf16[128,512], index: 3, kind: input, shape index: {}]   ;;  %s3250_s4 = inlined_call_operand.vmem [shape: f32[1,512], index: 4, kind: input, shape index: {}]   ;;  %s3251_s5 = inlined_call_operand.hbm [shape: bf16[256,128], index: 5, kind: input, shape index: {}]   ;;  %s3252_s6 = inlined_call_operand.hbm [shape: f32[1,128], index: 6, kind: input, shape index: {}]   ;;  %s3253_s7 = inlined_call_operand.hbm [shape: f32[256,128], index: 7, kind: output, shape index: {}]  }
   0x1   :  { %3258 = sst [smem:[#allocation21_spill]] %s3249_s3 }
   0x2   :  { %12 = vsyncpa [#allocation3], 0 }
   0x3   :  { %14 = vsyncpa [#allocation3 + $0x1], 0 }
   0x4   :  { %15 = vsyncpa [#allocation6], 0 }
   0x5   :  { %16 = vsyncpa [#allocation9], 0 }
   0x6   :  { %17 = vsyncpa [#allocation4], 0 }
   0x7   :  { %19 = vsyncpa [#allocation4 + $0x1], 0  ;;  %s2442_s24 = smov 0   ;;  %s2444_s25 = smov 0  }
   0x8   :  { %s2446_s26 = smov 0   ;;  %s2448_s27 = smov 0  }
   0x9 LB: > { %s2463_s28 = sadd.s32 4294967295, %s2386_s27   ;;  %s1713_s29 = sadd.s32 4294967294, %s2386_s27   ;;  %s2386_s27 = sphi %s2448_s27, %s3291_s27   ;;  %s2382_s26 = sphi %s2446_s26, %s3290_s26   ;;  %s2378_s25 = sphi %s2444_s25, %s3289_s25   ;;  %s2374_s24 = sphi %s2442_s24, %s3288_s24  }
   0xa   : > { %p45_p0 = scmp.ne.s32.totalorder %s2378_s25, %s2374_s24  ;;  %p3254_p1 = scmp.eq.s32.totalorder %s2463_s28, 0 }
   0xb   : > { %p201_p3 = scmp.eq.s32.totalorder %s1713_s29, 1  ;;  %p1714_p5 = scmp.ge.s32.totalorder %s2386_s27, 1 }
   0xc   : > { %p2472_p4 = por %p3254_p1, %p45_p0  ;;  %p208_p7 = scmp.lt.s32.totalorder %s2386_s27, 3 }
   0xd   : > { %p2477_p6 = por %p201_p3, %p45_p0  ;;  %s2388_s10 = smov [#allocation5]  }
   0xe   : > { %s3259_s30 = scalar_select %p2472_p4, 1, 0 }
   0xf   : > { %s3260_s8 = scalar_select %p2477_p6, 1, 0 }
  0x10   : > { %p2482_p8 = pnand %p1714_p5, %p208_p7  ;;  %s226_s11 = sshll.u32 %s2388_s10, 4  ;;  %s227_s11 = int_to_ptr.vmem [resolvable:$true] %s226_s11 }
  0x11   : > { %s2389_s13 = smov [#allocation7]   ;;  %s2219_s15 = scalar_lea.vmem %s227_s11, 4096 }
  0x12   : > { %s3261_s9 = scalar_select %p2482_p8, 1, 0 }
  0x13   : > { %p1914_p9 = pneg %p2482_p8  ;;  %s242_s14 = sshll.u32 %s2389_s13, 4  ;;  %s243_s14 = int_to_ptr.vmem [resolvable:$true] %s242_s14 }
  0x14   : > { %p2220_p13 = scmp.ne.s32.totalorder %s227_s11, %s2219_s15  ;;  %p2227_p5 = scmp.lt.s32.totalorder %s227_s11, %s227_s11 }
  0x15   : > { %p2491_p11 = pnand %p1914_p9, %p3254_p1  ;;  %p2228_p7 = scmp.lt.s32.totalorder %s2219_s15, %s2219_s15 }
  0x17   : > { %p2210_p12 = pneg %p2491_p11  ;;  %p2229_p10 = por %p2228_p7, %p2227_p5 }
  0x19   : > { %p2222_p0 = pnand %p2220_p13, %p2210_p12 }
  0x1b   : > { %p2223_p3 = pneg %p2222_p0 }
  0x1d   : > { %p2230_p9 = pnand %p2229_p10, %p2223_p3 }
  0x1f   : > { %2233 = shalt.err (!%p2230_p9)
}
  0x20   : > { %s2390_s16 = smov 256   ;;  %s2391_s17 = smov 16  }
  0x21   : > { %s3263_s3 = sld [smem:[#allocation21_spill]]  ;;  %s2245_s20 = scalar_lea.vmem %s243_s14, 2048 }
  0x22   : > { %p2246_p1 = scmp.ne.s32.totalorder %s243_s14, %s2245_s20  ;;  %p2253_p2 = scmp.lt.s32.totalorder %s243_s14, %s243_s14 }
  0x23   : > { %p2254_p6 = scmp.lt.s32.totalorder %s2245_s20, %s2245_s20 }
  0x24   : > { %p2248_p13 = pnand %p2246_p1, %p2210_p12 }
  0x25   : > { %p2255_p5 = por %p2254_p6, %p2253_p2 }
  0x26   : > { %p2249_p0 = pneg %p2248_p13 }
  0x27   : > { %1917 = dma.hbm_to_vmem [thread:$0]  (!%p2491_p11), %s3263_s3, 4096, %s227_s11, [#allocation6], %s2390_s16, %s2390_s16, %s2391_s17  }
  0x28   : > { %p2256_p10 = pnand %p2255_p5, %p2249_p0 }
  0x2a   : > { %2259 = shalt.err (!%p2256_p10)
}
  0x2b   : > { %s2392_s21 = smov 64   ;;  %s2393_s22 = smov 4  }
  0x2c   : > { %1920 = dma.hbm_to_vmem [thread:$0]  (!%p2491_p11), %s3251_s5, 2048, %s243_s14, [#allocation6], %s2392_s21, %s2392_s21, %s2393_s22  }
  0x2d   : > { %s2394_s10 = smov [#allocation8]   ;;  %s2514_s13 = sadd.s32 1, %s2386_s27  }
  0x2e   : > { %s256_s11 = sshll.u32 %s2394_s10, 4  ;;  %s257_s11 = int_to_ptr.vmem [resolvable:$true] %s256_s11 }
  0x2f   : > { %s2271_s15 = scalar_lea.vmem %s257_s11, 16  ;;  %s2278_s16 = scalar_lea.vmem %s257_s11, 32 }
  0x30   : > { %p2272_p1 = scmp.ne.s32.totalorder %s257_s11, %s2271_s15  ;;  %p2279_p3 = scmp.lt.s32.totalorder %s257_s11, %s257_s11 }
  0x31   : > { %p2280_p7 = scmp.lt.s32.totalorder %s2278_s16, %s2271_s15 }
  0x32   : > { %p2274_p2 = pnand %p2272_p1, %p2210_p12 }
  0x33   : > { %p2281_p9 = por %p2280_p7, %p2279_p3 }
  0x34   : > { %p2275_p6 = pneg %p2274_p2 }
  0x36   : > { %p2282_p13 = pnand %p2281_p9, %p2275_p6 }
  0x38   : > { %2285 = shalt.err (!%p2282_p13)
}
  0x39   : > { %1923 = dma.hbm_to_vmem [thread:$0]  (!%p2491_p11), %s3252_s6, 16, %s257_s11, [#allocation9]  }
  0x3a   : > { %s29_s18 = ssub.s32 %s2386_s27, %s2514_s13  ;;  %s32_s19 = sadd.s32 1, %s2382_s26 }
  0x3b   : > { %p30_p12 = scmp.eq.s32.totalorder %s29_s18, 0  ;;  %p39_p0 = scmp.ne.s32.totalorder %s2382_s26, %s2378_s25 }
  0x3c   : > { %p40_p5 = scmp.eq.s32.totalorder %s2386_s27, 0  ;;  %p1935_p10 = scmp.lt.s32.totalorder %s2386_s27, 2 }
  0x3d   : > { %s2532_s12 = scalar_select %p30_p12, %s2382_s26, %s32_s19  }
  0x3e   : > { %p41_p1 = por %p40_p5, %p39_p0  ;;  %p3264_p2 = scmp.eq.s32.totalorder %s2463_s28, 1 }
  0x3f   : > { %s267_s21 = sand.u32 1, %s2382_s26   ;;  %s1816_s22 = sshll.u32 %s2386_s27, 11 }
  0x40   : > { %p2536_p6 = por %p3264_p2, %p39_p0  ;;  %s1719_s23 = sshll.u32 %s267_s21, 7 }
  0x41   : > { %s2545_s11 = scalar_lea.hbm %s3246_s0, %s1816_s22  ;;  %s271_s15 = scalar_lea.vmem [#allocation2], %s1719_s23 }
  0x42   : > { %s3265_s20 = scalar_select %p2536_p6, 1, 0 }
  0x43   : > { %s278_s16 = sshll.u32 %s271_s15, 4  ;;  %p2547_p11 = pnand %p1935_p10, %p41_p1  ;;  %s2551_s16 = int_to_ptr.vmem [resolvable:$true] %s278_s16 }
  0x44   : > { %s2553_s17 = scalar_lea.sflag [#allocation3], %s267_s21  ;;  %s2286_s18 = scalar_lea.hbm %s2545_s11, 2048 }
  0x45   : > { %p2287_p3 = scmp.ne.s32.totalorder %s2545_s11, %s2286_s18  ;;  %p2288_p7 = pneg %p2547_p11 }
  0x46   : > { %s2291_s23 = scalar_lea.hbm %s3246_s0, 4096  ;;  %p2292_p12 = scmp.lt.s32.totalorder %s2545_s11, %s3246_s0 }
  0x47   : > { %p2289_p9 = pnand %p2288_p7, %p2287_p3  ;;  %p2293_p0 = scmp.lt.s32.totalorder %s2291_s23, %s2286_s18 }
  0x49   : > { %p2290_p13 = pneg %p2289_p9  ;;  %p2294_p5 = por %p2293_p0, %p2292_p12 }
  0x4b   : > { %p2295_p10 = pnand %p2294_p5, %p2290_p13 }
  0x4d   : > { %2298 = shalt.err (!%p2295_p10)
}
  0x4e   : > { %s2299_s21 = scalar_lea.vmem %s2551_s16, 2048  ;;  %s2395_s15 = smov [#allocation2]  }
  0x4f   : > { %p2300_p1 = scmp.ne.s32.totalorder %s2551_s16, %s2299_s21  ;;  %s2304_s3 = sshll.u32 %s2395_s15, 4  ;;  %s2305_s3 = int_to_ptr.vmem [resolvable:$false] %s2304_s3 }
  0x50   : > { %s2306_s19 = scalar_lea.vmem %s2305_s3, 4096  ;;  %p2307_p9 = scmp.lt.s32.totalorder %s2551_s16, %s2305_s3 }
  0x51   : > { %p2302_p2 = pnand %p2300_p1, %p2288_p7  ;;  %p2308_p6 = scmp.lt.s32.totalorder %s2306_s19, %s2299_s21 }
  0x53   : > { %p2303_p3 = pneg %p2302_p2  ;;  %p2309_p4 = por %p2308_p6, %p2307_p9 }
  0x55   : > { %p2310_p8 = pnand %p2309_p4, %p2303_p3 }
  0x57   : > { %2313 = shalt.err (!%p2310_p8)
}
  0x58   : > { %s2396_s18 = smov 128   ;;  %s2397_s22 = smov 8  }
  0x59   : > { %1927 = dma.hbm_to_vmem [thread:$0]  (!%p2547_p11), %s2545_s11, 2048, %s2551_s16, %s2553_s17, %s2396_s18, %s2396_s18, %s2397_s22  }
  0x5a   : > { %p3267_p7 = scmp.ne.s32.totalorder %s3261_s9, 0 }
  0x5c   : > { %290 = sbr.rel (%p3267_p7) target bundleno = 832 (0x340), region = 48 }
  0x61   : > { %s2577_s23 = sand.u32 1, %s2378_s25   ;;  %p3268_p4 = scmp.ne.s32.totalorder %s3259_s30, 0 }
  0x62   : > { %s1723_s3 = sshll.u32 %s2577_s23, 7  ;;  %s293_s29 = scalar_lea.sflag [#allocation3], %s2577_s23 }
  0x63   : > { %s2583_s10 = scalar_lea.vmem [#allocation2], %s1723_s3 }
  0x64   : > { %2357 = dma.done.wait (%p3268_p4), %s293_s29, 2048  }
  0x65   : > { %2359 = vsyncadd (%p3268_p4), %s293_s29, 4294965248  ;;  %p3269_p8 = scmp.eq.s32.totalorder %s2463_s28, 0 }
  0x67   : > { %2361 = dma.done.wait (%p3269_p8), [#allocation6], 6144   ;;  %p3270_p6 = pmov %p3269_p8 }
  0x69   : > { %2363 = vsyncadd (%p3270_p6), [#allocation6], 4294961152  ;;  %p3271_p11 = pmov %p3270_p6 }
  0x6a   : > { %p3272_p13 = pmov %p3270_p6 }
  0x6b   : > { %2365 = dma.done.wait (%p3271_p11), [#allocation9], 16  }
  0x6c   : > { %2367 = vsyncadd (%p3272_p13), [#allocation9], 4294967280  ;;  %v2598_v0 = vld [vmem:[%s2583_s10 + $0x40] sm:$0xff]  ;;  %v2601_v1 = vld [vmem:[%s2583_s10 + $0x48] sm:$0xff]  ;;  %v2398_v42 = vmov 0   ;;  %s3163_s21 = scalar_lea.vmem [#allocation10], %s1723_s3 }
  0x6d   : > { %374 = vadd.xlane.f32.xlu0 %v2598_v0  ;;  %v415_v2 = vmul.f32 %v2598_v0, %v2598_v0  ;;  %v416_v3 = vmul.f32 %v2601_v1, %v2601_v1  ;;  %v2610_v4 = vld [vmem:[%s2583_s10 + $0x50] sm:$0xff]  ;;  %v2613_v5 = vld [vmem:[%s2583_s10 + $0x58] sm:$0xff]  ;;  %v2622_v8 = vld [vmem:[%s2583_s10 + $0x60] sm:$0xff]  ;;  %923 = vmatprep.mubr.bf16.mxu1 %v2398_v42  ;;  %s1817_s15 = sshll.u32 %s2463_s28, 11  ;;  %s1611_s19 = sshll.u32 %s3163_s21, 4  ;;  %s3201_s19 = int_to_ptr.vmem [resolvable:$true] %s1611_s19 }
  0x6e   : > { %v417_v6 = vmul.f32 %v2610_v4, %v2610_v4  ;;  %v418_v7 = vmul.f32 %v2613_v5, %v2613_v5  ;;  %v1984_v9 = vld [vmem:[#allocation5 + $0xe4] ss:$16 sps:$4 sm:$0xff]   ;;  %v2625_v10 = vld [vmem:[%s2583_s10 + $0x68] sm:$0xff]  ;;  %v1986_v11 = vld [vmem:[#allocation5 + $0xe0] ss:$16 sps:$4 sm:$0xff]   ;;  %v419_v12 = vmul.f32 %v2622_v8, %v2622_v8  ;;  %883 = vmatprep.mubr.bf16.mxu0 %v2398_v42  ;;  %s3199_s3 = scalar_lea.hbm %s3253_s7, %s1817_s15  ;;  %s1598_s29 = scalar_lea.sflag [#allocation4], %s2577_s23 }
  0x6f   : > { %439 = vadd.xlane.f32.xlu1 %v415_v2  ;;  %1882 = vmatprep.subr.bf16.mxu1 %v1984_v9  ;;  %v1987_v13 = vld [vmem:[#allocation5 + $0xc4] ss:$16 sps:$4 sm:$0xff]   ;;  %v1989_v14 = vld [vmem:[#allocation5 + $0xc0] ss:$16 sps:$4 sm:$0xff]   ;;  %v420_v15 = vmul.f32 %v2625_v10, %v2625_v10  ;;  %v2637_v17 = vld [vmem:[%s2583_s10 + $0x78] sm:$0xff]  ;;  %p3285_p0 = scmp.ne.s32.totalorder %s3265_s20, 0 }
  0x70   : > { %1890 = vmatpush1.bf16.msra.mxu1 %v1986_v11  ;;  %851 = vmatprep.subr.bf16.mxu0 %v1984_v9  ;;  %v2634_v16 = vld [vmem:[%s2583_s10 + $0x70] sm:$0xff]  ;;  %v422_v22 = vmul.f32 %v2637_v17, %v2637_v17  ;;  %v2646_v24 = vld [vmem:[%s2583_s10] sm:$0xff]  ;;  %v2649_v27 = vld [vmem:[%s2583_s10 + $0x8] sm:$0xff]  ;;  %s2399_s28 = smov [#allocation10]  }
  0x71   : > { %376 = vadd.xlane.f32.xlu0 %v2601_v1  ;;  %852 = vmatpush1.bf16.msra.mxu0 %v1986_v11  ;;  %v1990_v18 = vld [vmem:[#allocation5 + $0xa4] ss:$16 sps:$4 sm:$0xff]   ;;  %v1992_v19 = vld [vmem:[#allocation5 + $0xa0] ss:$16 sps:$4 sm:$0xff]   ;;  %v421_v20 = vmul.f32 %v2634_v16, %v2634_v16  ;;  %v407_v28 = vmul.f32 %v2646_v24, %v2646_v24  ;;  %v408_v30 = vmul.f32 %v2649_v27, %v2649_v27  ;;  %v2661_v35 = vld [vmem:[%s2583_s10 + $0x18] sm:$0xff]  ;;  %s2318_s30 = sshll.u32 %s2399_s28, 4  ;;  %s2319_s30 = int_to_ptr.vmem [resolvable:$false] %s2318_s30 }
  0x72   : > { %1883 = vmatprep.subr.bf16.mxu1 %v1987_v13  ;;  %853 = vmatprep.subr.bf16.mxu0 %v1987_v13  ;;  %v1993_v21 = vld [vmem:[#allocation5 + $0x84] ss:$16 sps:$4 sm:$0xff]   ;;  %v1995_v23 = vld [vmem:[#allocation5 + $0x80] ss:$16 sps:$4 sm:$0xff]   ;;  %v410_v38 = vmul.f32 %v2661_v35, %v2661_v35  ;;  %v2010_v41 = vld [vmem:[#allocation5 + $0xec] ss:$16 sps:$4 sm:$0xff]   ;;  %p2321_p1 = scmp.lt.s32.totalorder %s3201_s19, %s2319_s30 }
  0x73   : > { %441 = vadd.xlane.f32.xlu1 %v416_v3  ;;  %v1996_v25 = vld [vmem:[#allocation5 + $0x64] ss:$16 sps:$4 sm:$0xff]   ;;  %v1998_v26 = vld [vmem:[#allocation5 + $0x60] ss:$16 sps:$4 sm:$0xff]   ;;  %v2674_v43 = vld [vmem:[%s2583_s10 + $0x28] sm:$0xff]  ;;  %s2320_s9 = scalar_lea.vmem %s2319_s30, 4096 }
  0x74   : > { %1891 = vmatpush1.bf16.msra.mxu1 %v1989_v14  ;;  %v1999_v29 = vld [vmem:[#allocation5 + $0x44] ss:$16 sps:$4 sm:$0xff]   ;;  %v2001_v31 = vld [vmem:[#allocation5 + $0x40] ss:$16 sps:$4 sm:$0xff]   ;;  %v412_v45 = vmul.f32 %v2674_v43, %v2674_v43  ;;  %v2687_v47 = vld [vmem:[%s2583_s10 + $0x38] sm:$0xff] }
  0x75   : > { %378 = vadd.xlane.f32.xlu0 %v2610_v4  ;;  %854 = vmatpush1.bf16.msra.mxu0 %v1989_v14  ;;  %v2658_v32 = vld [vmem:[%s2583_s10 + $0x10] sm:$0xff]  ;;  %v2670_v40 = vld [vmem:[%s2583_s10 + $0x20] sm:$0xff]  ;;  %v414_v49 = vmul.f32 %v2687_v47, %v2687_v47 }
  0x76   : > { %1884 = vmatprep.subr.bf16.mxu1 %v1990_v18  ;;  %855 = vmatprep.subr.bf16.mxu0 %v1990_v18  ;;  %v2002_v33 = vld [vmem:[#allocation5 + $0x24] ss:$16 sps:$4 sm:$0xff]   ;;  %v2004_v34 = vld [vmem:[#allocation5 + $0x20] ss:$16 sps:$4 sm:$0xff]   ;;  %v409_v36 = vmul.f32 %v2658_v32, %v2658_v32  ;;  %v411_v44 = vmul.f32 %v2670_v40, %v2670_v40 }
  0x77   : > { %380 = vadd.xlane.f32.xlu1 %v2613_v5  ;;  %v2005_v37 = vld [vmem:[#allocation5 + $0x4] ss:$16 sps:$4 sm:$0xff]   ;;  %v2007_v39 = vld [vmem:[#allocation5] ss:$16 sps:$4 sm:$0xff]  }
  0x78   : > { %1892 = vmatpush1.bf16.msra.mxu1 %v1992_v19  ;;  %v2684_v46 = vld [vmem:[%s2583_s10 + $0x30] sm:$0xff]  ;;  %s2314_s10 = scalar_lea.vmem %s3201_s19, 2048 }
  0x79   : > { %443 = vadd.xlane.f32.xlu0 %v417_v6  ;;  %856 = vmatpush1.bf16.msra.mxu0 %v1992_v19  ;;  %v413_v48 = vmul.f32 %v2684_v46, %v2684_v46  ;;  %p2315_p12 = scmp.ne.s32.totalorder %s3201_s19, %s2314_s10  ;;  %p2322_p2 = scmp.lt.s32.totalorder %s2320_s9, %s2314_s10 }
  0x7a   : > { %1885 = vmatprep.subr.bf16.mxu1 %v1993_v21  ;;  %857 = vmatprep.subr.bf16.mxu0 %v1993_v21 }
  0x7b   : > { %445 = vadd.xlane.f32.xlu1 %v418_v7  ;;  %p2316_p5 = pnand %p2315_p12, %p3285_p0  ;;  %p2323_p3 = por %p2322_p2, %p2321_p1 }
  0x7c   : > { %1893 = vmatpush1.bf16.msra.mxu1 %v1995_v23 }
  0x7d   : > { %382 = vadd.xlane.f32.xlu0 %v2622_v8  ;;  %858 = vmatpush1.bf16.msra.mxu0 %v1995_v23  ;;  %p2317_p10 = pneg %p2316_p5 }
  0x7e   : > { %1886 = vmatprep.subr.bf16.mxu1 %v1996_v25  ;;  %859 = vmatprep.subr.bf16.mxu0 %v1996_v25 }
  0x7f   : > { %384 = vadd.xlane.f32.xlu1 %v2625_v10  ;;  %p2324_p9 = pnand %p2323_p3, %p2317_p10 }
  0x80   : > { %1894 = vmatpush1.bf16.msra.mxu1 %v1998_v26 }
  0x81   : > { %447 = vadd.xlane.f32.xlu0 %v419_v12  ;;  %860 = vmatpush1.bf16.msra.mxu0 %v1998_v26 }
  0x82   : > { %1887 = vmatprep.subr.bf16.mxu1 %v1999_v29  ;;  %861 = vmatprep.subr.bf16.mxu0 %v1999_v29 }
  0x83   : > { %449 = vadd.xlane.f32.xlu1 %v420_v15 }
  0x84   : > { %1895 = vmatpush1.bf16.msra.mxu1 %v2001_v31 }
  0x85   : > { %386 = vadd.xlane.f32.xlu0 %v2634_v16  ;;  %862 = vmatpush1.bf16.msra.mxu0 %v2001_v31 }
  0x86   : > { %1888 = vmatprep.subr.bf16.mxu1 %v2002_v33  ;;  %863 = vmatprep.subr.bf16.mxu0 %v2002_v33 }
  0x87   : > { %388 = vadd.xlane.f32.xlu1 %v2637_v17 }
  0x88   : > { %1896 = vmatpush1.bf16.msra.mxu1 %v2004_v34 }
  0x89   : > { %451 = vadd.xlane.f32.xlu0 %v421_v20  ;;  %864 = vmatpush1.bf16.msra.mxu0 %v2004_v34 }
  0x8a   : > { %1889 = vmatprep.subr.bf16.mxu1 %v2005_v37  ;;  %865 = vmatprep.subr.bf16.mxu0 %v2005_v37 }
  0x8b   : > { %453 = vadd.xlane.f32.xlu1 %v422_v22 }
  0x8c   : > { %1897 = vmatpush1.bf16.msra.mxu1 %v2007_v39 }
  0x8d   : > { %358 = vadd.xlane.f32.xlu0 %v2646_v24  ;;  %866 = vmatpush1.bf16.msra.mxu0 %v2007_v39 }
  0x8e   : > { %964 = vmatprep.subr.bf16.mxu1 %v2010_v41 }
  0x8f   : > { %360 = vadd.xlane.f32.xlu1 %v2649_v27 }
  0x91   : > { %423 = vadd.xlane.f32.xlu0 %v407_v28 }
  0x93   : > { %425 = vadd.xlane.f32.xlu1 %v408_v30 }
  0x95   : > { %362 = vadd.xlane.f32.xlu0 %v2658_v32 }
  0x97   : > { %364 = vadd.xlane.f32.xlu1 %v2661_v35 }
  0x99   : > { %427 = vadd.xlane.f32.xlu0 %v409_v36 }
  0x9b   : > { %429 = vadd.xlane.f32.xlu1 %v410_v38 }
  0x9d   : > { %366 = vadd.xlane.f32.xlu0 %v2670_v40 }
  0x9f   : > { %368 = vadd.xlane.f32.xlu1 %v2674_v43 }
  0xa1   : > { %431 = vadd.xlane.f32.xlu0 %v411_v44 }
  0xa3   : > { %433 = vadd.xlane.f32.xlu1 %v412_v45 }
  0xa5   : > { %370 = vadd.xlane.f32.xlu0 %v2684_v46 }
  0xa7   : > { %372 = vadd.xlane.f32.xlu1 %v2687_v47 }
  0xa9   : > { %435 = vadd.xlane.f32.xlu0 %v413_v48 }
  0xab   : > { %437 = vadd.xlane.f32.xlu1 %v414_v49 }
  0xf6   : > { %v375_v50 = vpop.xlane.xlu0 %374 }
  0xf7   : > { %v399_v51 = vmul.f32 0.0078125, %v375_v50 }
  0xf8   : > { %v440_v52 = vpop.xlane.xlu1 %439 }
  0xf9   : > { %v479_v53 = vmul.f32 %v399_v51, %v399_v51  ;;  %v463_v54 = vmul.f32 0.0078125, %v440_v52  ;;  %v527_v45 = vsub.f32 %v2598_v0, %v399_v51 }
  0xfa   : > { %v377_v55 = vpop.xlane.xlu0 %376 }
  0xfb   : > { %v495_v56 = vsub.f32 %v463_v54, %v479_v53  ;;  %v400_v57 = vmul.f32 0.0078125, %v377_v55 }
  0xfc   : > { %v442_v58 = vpop.xlane.xlu1 %441 }
  0xfd   : > { %v511_v59 = vmax.f32 %v495_v56, 0.0  ;;  %v480_v60 = vmul.f32 %v400_v57, %v400_v57  ;;  %v464_v61 = vmul.f32 0.0078125, %v442_v58  ;;  %v528_v55 = vsub.f32 %v2601_v1, %v400_v57 }
  0xfe   : > { %v379_v62 = vpop.xlane.xlu0 %378 }
  0xff   : > { %v543_v63 = vadd.f32 1e-05, %v511_v59  ;;  %v496_v2 = vsub.f32 %v464_v61, %v480_v60  ;;  %v2695_v3 = vmul.f32 0.0078125, %v379_v62  ;;  %v2720_v60 = vld [vmem:[%s3247_s1] ss:$0 sm:$0xff] }
 0x100   : > { %v381_v6 = vpop.xlane.xlu1 %380 }
 0x101   : > { %2048 = vrsqrt.f32 %v543_v63  ;;  %v512_v7 = vmax.f32 %v496_v2, 0.0  ;;  %v481_v9 = vmul.f32 %v2695_v3, %v2695_v3  ;;  %v2699_v11 = vmul.f32 0.0078125, %v381_v6 }
 0x102   : > { %v444_v12 = vpop.xlane.xlu0 %443 }
 0x103   : > { %v544_v13 = vadd.f32 1e-05, %v512_v7  ;;  %v465_v14 = vmul.f32 0.0078125, %v444_v12  ;;  %v482_v18 = vmul.f32 %v2699_v11, %v2699_v11 }
 0x104   : > { %v446_v15 = vpop.xlane.xlu1 %445 }
 0x105   : > { %2050 = vrsqrt.f32 %v544_v13  ;;  %v497_v19 = vsub.f32 %v465_v14, %v481_v9  ;;  %v466_v20 = vmul.f32 0.0078125, %v446_v15  ;;  %v2731_v13 = vld [vmem:[%s3248_s2] ss:$0 sm:$0xff] }
 0x106   : > { %v383_v21 = vpop.xlane.xlu0 %382 }
 0x107   : > { %v513_v22 = vmax.f32 %v497_v19, 0.0  ;;  %v498_v23 = vsub.f32 %v466_v20, %v482_v18  ;;  %v2703_v25 = vmul.f32 0.0078125, %v383_v21 }
 0x108   : > { %v385_v26 = vpop.xlane.xlu1 %384 }
 0x109   : > { %v545_v28 = vadd.f32 1e-05, %v513_v22  ;;  %v514_v29 = vmax.f32 %v498_v23, 0.0  ;;  %v483_v30 = vmul.f32 %v2703_v25, %v2703_v25  ;;  %v2707_v31 = vmul.f32 0.0078125, %v385_v26 }
 0x10a   : > { %v448_v33 = vpop.xlane.xlu0 %447  ;;  %v529_v22 = vsub.f32 %v2610_v4, %v2695_v3 }
 0x10b   : > { %2052 = vrsqrt.f32 %v545_v28  ;;  %v546_v34 = vadd.f32 1e-05, %v514_v29  ;;  %v467_v36 = vmul.f32 0.0078125, %v448_v33  ;;  %v484_v38 = vmul.f32 %v2707_v31, %v2707_v31 }
 0x10c   : > { %v450_v37 = vpop.xlane.xlu1 %449  ;;  %v530_v28 = vsub.f32 %v2613_v5, %v2699_v11 }
 0x10d   : > { %2054 = vrsqrt.f32 %v546_v34  ;;  %v499_v39 = vsub.f32 %v467_v36, %v483_v30  ;;  %v468_v41 = vmul.f32 0.0078125, %v450_v37  ;;  %v2008_v34 = vld [vmem:[#allocation5 + $0xe8] ss:$16 sps:$4 sm:$0xff]  }
 0x10e   : > { %v2049_v44 = vpop.eup %2048  ;;  %v387_v48 = vpop.xlane.xlu0 %386 }
 0x10f   : > { %v515_v49 = vmax.f32 %v499_v39, 0.0  ;;  %v500_v50 = vsub.f32 %v468_v41, %v484_v38  ;;  %v2712_v52 = vmul.f32 0.0078125, %v387_v48  ;;  %v575_v54 = vmul.f32 %v2049_v44, %v527_v45  ;;  %v2013_v41 = vld [vmem:[#allocation5 + $0xcc] ss:$16 sps:$4 sm:$0xff]  }
 0x110   : > { %v389_v53 = vpop.xlane.xlu1 %388 }
 0x111   : > { %v547_v56 = vadd.f32 1e-05, %v515_v49  ;;  %v516_v58 = vmax.f32 %v500_v50, 0.0  ;;  %v485_v59 = vmul.f32 %v2712_v52, %v2712_v52  ;;  %v2722_v51 = vmul.f32 0.0078125, %v389_v53  ;;  %v2011_v53 = vld [vmem:[#allocation5 + $0xc8] ss:$16 sps:$4 sm:$0xff]  }
 0x112   : > { %v2051_v0 = vpop.eup %2050  ;;  %v452_v61 = vpop.xlane.xlu0 %451  ;;  %v598_v6 = vmul.f32 %v2720_v60, %v575_v54 }
 0x113   : > { %2056 = vrsqrt.f32 %v547_v56  ;;  %v548_v62 = vadd.f32 1e-05, %v516_v58  ;;  %v469_v63 = vmul.f32 0.0078125, %v452_v61  ;;  %v576_v2 = vmul.f32 %v2051_v0, %v528_v55  ;;  %v2016_v56 = vld [vmem:[#allocation5 + $0xac] ss:$16 sps:$4 sm:$0xff]  }
 0x114   : > { %v486_v1 = vmul.f32 %v2722_v51, %v2722_v51  ;;  %v454_v57 = vpop.xlane.xlu1 %453  ;;  %v621_v26 = vadd.f32 %v2731_v13, %v598_v6 }
 0x115   : > { %2058 = vrsqrt.f32 %v548_v62  ;;  %v501_v7 = vsub.f32 %v469_v63, %v485_v59  ;;  %v470_v9 = vmul.f32 0.0078125, %v454_v57  ;;  %v599_v12 = vmul.f32 %v2720_v60, %v576_v2 }
 0x116   : > { %v359_v14 = vpop.xlane.xlu0 %358  ;;  %v531_v63 = vsub.f32 %v2622_v8, %v2703_v25  ;;  %v532_v57 = vsub.f32 %v2625_v10, %v2707_v31  ;;  %v2019_v8 = vld [vmem:[#allocation5 + $0x8c] ss:$16 sps:$4 sm:$0xff]  }
 0x117   : > { %v517_v15 = vmax.f32 %v501_v7, 0.0  ;;  %v502_v18 = vsub.f32 %v470_v9, %v486_v1  ;;  %v2733_v19 = vmul.f32 0.0078125, %v359_v14  ;;  %v622_v20 = vadd.f32 %v2731_v13, %v599_v12  ;;  %v2014_v12 = vld [vmem:[#allocation5 + $0xa8] ss:$16 sps:$4 sm:$0xff]  }
 0x118   : > { %v2053_v21 = vpop.eup %2052  ;;  %v361_v23 = vpop.xlane.xlu1 %360 }
 0x119   : > { %v549_v29 = vadd.f32 1e-05, %v517_v15  ;;  %v518_v30 = vmax.f32 %v502_v18, 0.0  ;;  %v471_v33 = vmul.f32 %v2733_v19, %v2733_v19  ;;  %v2743_v37 = vmul.f32 0.0078125, %v361_v23 }
 0x11a   : > { %v2055_v36 = vpop.eup %2054  ;;  %v424_v38 = vpop.xlane.xlu0 %423  ;;  %v2745_v39 = vpack.c.bf16 %v622_v20, %v621_v26  ;;  %v577_v4 = vmul.f32 %v2053_v21, %v529_v22 }
 0x11b   : > { %2060 = vrsqrt.f32 %v549_v29  ;;  %v550_v3 = vadd.f32 1e-05, %v518_v30  ;;  %v455_v44 = vmul.f32 0.0078125, %v424_v38  ;;  %v578_v45 = vmul.f32 %v2055_v36, %v530_v28  ;;  %v2017_v30 = vld [vmem:[#allocation5 + $0x88] ss:$16 sps:$4 sm:$0xff]  }
 0x11c   : > { %v472_v5 = vmul.f32 %v2743_v37, %v2743_v37  ;;  %924 = vmatmul.mubr.bf16.vlgmr.msra.gmra.mxu1 %v2745_v39  ;;  %v426_v11 = vpop.xlane.xlu1 %425  ;;  %v600_v48 = vmul.f32 %v2720_v60, %v577_v4  ;;  %v2022_v36 = vld [vmem:[#allocation5 + $0x6c] ss:$16 sps:$4 sm:$0xff]  }
 0x11d   : > { %2062 = vrsqrt.f32 %v550_v3  ;;  %v487_v49 = vsub.f32 %v455_v44, %v471_v33  ;;  %965 = vmatpush1.bf16.msra.mxu1 %v2008_v34  ;;  %v456_v50 = vmul.f32 0.0078125, %v426_v11  ;;  %933 = vmatprep.mubr.bf16.mxu1 %v2398_v42  ;;  %v601_v54 = vmul.f32 %v2720_v60, %v578_v45 }
 0x11e   : > { %966 = vmatprep.subr.bf16.mxu1 %v2013_v41  ;;  %v363_v55 = vpop.xlane.xlu0 %362  ;;  %v623_v1 = vadd.f32 %v2731_v13, %v600_v48  ;;  %v533_v45 = vsub.f32 %v2634_v16, %v2712_v52  ;;  %v534_v48 = vsub.f32 %v2637_v17, %v2722_v51  ;;  %v2025_v16 = vld [vmem:[#allocation5 + $0x4c] ss:$16 sps:$4 sm:$0xff]  }
 0x11f   : > { %v503_v58 = vmax.f32 %v487_v49, 0.0  ;;  %v488_v59 = vsub.f32 %v456_v50, %v472_v5  ;;  %v2753_v0 = vmul.f32 0.0078125, %v363_v55  ;;  %v624_v61 = vadd.f32 %v2731_v13, %v601_v54  ;;  %v2020_v54 = vld [vmem:[#allocation5 + $0x68] ss:$16 sps:$4 sm:$0xff]  }
 0x120   : > { %v2057_v62 = vpop.eup %2056  ;;  %v365_v2 = vpop.xlane.xlu1 %364 }
 0x121   : > { %v535_v6 = vadd.f32 1e-05, %v503_v58  ;;  %v504_v7 = vmax.f32 %v488_v59, 0.0  ;;  %v473_v9 = vmul.f32 %v2753_v0, %v2753_v0  ;;  %967 = vmatpush1.bf16.msra.mxu1 %v2011_v53  ;;  %v2763_v15 = vmul.f32 0.0078125, %v365_v2 }
 0x122   : > { %v2059_v14 = vpop.eup %2058  ;;  %968 = vmatprep.subr.bf16.mxu1 %v2016_v56  ;;  %v428_v18 = vpop.xlane.xlu0 %427  ;;  %v2765_v20 = vpack.c.bf16 %v624_v61, %v623_v1  ;;  %v579_v25 = vmul.f32 %v2057_v62, %v531_v63 }
 0x123   : > { %2064 = vrsqrt.f32 %v535_v6  ;;  %v536_v21 = vadd.f32 1e-05, %v504_v7  ;;  %v457_v22 = vmul.f32 0.0078125, %v428_v18  ;;  %v580_v10 = vmul.f32 %v2059_v14, %v532_v57  ;;  %v2023_v6 = vld [vmem:[#allocation5 + $0x48] ss:$16 sps:$4 sm:$0xff]  }
 0x124   : > { %v474_v31 = vmul.f32 %v2763_v15, %v2763_v15  ;;  %934 = vmatmul.mubr.bf16.gmra.mxu1 %v2765_v20  ;;  %v430_v23 = vpop.xlane.xlu1 %429  ;;  %v602_v26 = vmul.f32 %v2720_v60, %v579_v25 }
 0x125   : > { %2066 = vrsqrt.f32 %v536_v21  ;;  %v489_v28 = vsub.f32 %v457_v22, %v473_v9  ;;  %969 = vmatpush1.bf16.msra.mxu1 %v2014_v12  ;;  %v458_v29 = vmul.f32 0.0078125, %v430_v23  ;;  %943 = vmatprep.mubr.bf16.mxu1 %v2398_v42  ;;  %v603_v33 = vmul.f32 %v2720_v60, %v580_v10  ;;  %v2028_v12 = vld [vmem:[#allocation5 + $0x2c] ss:$16 sps:$4 sm:$0xff]  }
 0x126   : > { %970 = vmatprep.subr.bf16.mxu1 %v2019_v8  ;;  %v367_v34 = vpop.xlane.xlu0 %366  ;;  %v625_v11 = vadd.f32 %v2731_v13, %v602_v26  ;;  %v519_v22 = vsub.f32 %v2646_v24, %v2733_v19  ;;  %v520_v23 = vsub.f32 %v2649_v27, %v2743_v37  ;;  %v2031_v24 = vld [vmem:[#allocation5 + $0xc] ss:$16 sps:$4 sm:$0xff]  }
 0x127   : > { %v505_v38 = vmax.f32 %v489_v28, 0.0  ;;  %v490_v41 = vsub.f32 %v458_v29, %v474_v31  ;;  %v2773_v4 = vmul.f32 0.0078125, %v367_v34  ;;  %v626_v3 = vadd.f32 %v2731_v13, %v603_v33 }
 0x128   : > { %v2061_v44 = vpop.eup %2060  ;;  %v369_v5 = vpop.xlane.xlu1 %368 }
 0x129   : > { %v537_v49 = vadd.f32 1e-05, %v505_v38  ;;  %v506_v50 = vmax.f32 %v490_v41, 0.0  ;;  %v475_v53 = vmul.f32 %v2773_v4, %v2773_v4  ;;  %971 = vmatpush1.bf16.msra.mxu1 %v2017_v30  ;;  %v2783_v56 = vmul.f32 0.0078125, %v369_v5  ;;  %v2026_v30 = vld [vmem:[#allocation5 + $0x28] ss:$16 sps:$4 sm:$0xff]  }
 0x12a   : > { %v2063_v55 = vpop.eup %2062  ;;  %972 = vmatprep.subr.bf16.mxu1 %v2022_v36  ;;  %v432_v58 = vpop.xlane.xlu0 %431  ;;  %v2785_v59 = vpack.c.bf16 %v626_v3, %v625_v11  ;;  %v581_v52 = vmul.f32 %v2061_v44, %v533_v45 }
 0x12b   : > { %2068 = vrsqrt.f32 %v537_v49  ;;  %v538_v61 = vadd.f32 1e-05, %v506_v50  ;;  %v459_v62 = vmul.f32 0.0078125, %v432_v58  ;;  %v582_v17 = vmul.f32 %v2063_v55, %v534_v48  ;;  %v2029_v48 = vld [vmem:[#allocation5 + $0x8] ss:$16 sps:$4 sm:$0xff]  }
 0x12c   : > { %v476_v51 = vmul.f32 %v2783_v56, %v2783_v56  ;;  %944 = vmatmul.mubr.bf16.gmra.mxu1 %v2785_v59  ;;  %v434_v63 = vpop.xlane.xlu1 %433  ;;  %v604_v2 = vmul.f32 %v2720_v60, %v581_v52  ;;  %v521_v50 = vsub.f32 %v2658_v32, %v2753_v0  ;;  %v522_v52 = vsub.f32 %v2661_v35, %v2763_v15 }
 0x12d   : > { %2070 = vrsqrt.f32 %v538_v61  ;;  %v491_v1 = vsub.f32 %v459_v62, %v475_v53  ;;  %973 = vmatpush1.bf16.msra.mxu1 %v2020_v54  ;;  %v460_v57 = vmul.f32 0.0078125, %v434_v63  ;;  %953 = vmatprep.mubr.bf16.mxu1 %v2398_v42  ;;  %v605_v7 = vmul.f32 %v2720_v60, %v582_v17 }
 0x12e   : > { %974 = vmatprep.subr.bf16.mxu1 %v2025_v16  ;;  %v371_v9 = vpop.xlane.xlu0 %370  ;;  %v627_v31 = vadd.f32 %v2731_v13, %v604_v2  ;;  %v523_v15 = vsub.f32 %v2670_v40, %v2773_v4 }
 0x12f   : > { %v507_v14 = vmax.f32 %v491_v1, 0.0  ;;  %v492_v18 = vsub.f32 %v460_v57, %v476_v51  ;;  %v2793_v8 = vmul.f32 0.0078125, %v371_v9  ;;  %v628_v25 = vadd.f32 %v2731_v13, %v605_v7 }
 0x130   : > { %v2065_v21 = vpop.eup %2064  ;;  %v373_v10 = vpop.xlane.xlu1 %372  ;;  %v524_v7 = vsub.f32 %v2674_v43, %v2783_v56 }
 0x131   : > { %v539_v26 = vadd.f32 1e-05, %v507_v14  ;;  %v508_v28 = vmax.f32 %v492_v18, 0.0  ;;  %v477_v29 = vmul.f32 %v2793_v8, %v2793_v8  ;;  %975 = vmatpush1.bf16.msra.mxu1 %v2023_v6  ;;  %v2803_v34 = vmul.f32 0.0078125, %v373_v10 }
 0x132   : > { %v2067_v33 = vpop.eup %2066  ;;  %976 = vmatprep.subr.bf16.mxu1 %v2028_v12  ;;  %v436_v36 = vpop.xlane.xlu0 %435  ;;  %v2805_v38 = vpack.c.bf16 %v628_v25, %v627_v31  ;;  %v567_v19 = vmul.f32 %v2065_v21, %v519_v22  ;;  %v525_v4 = vsub.f32 %v2684_v46, %v2793_v8 }
 0x133   : > { %2072 = vrsqrt.f32 %v539_v26  ;;  %v540_v41 = vadd.f32 1e-05, %v508_v28  ;;  %v461_v3 = vmul.f32 0.0078125, %v436_v36  ;;  %v568_v27 = vmul.f32 %v2067_v33, %v520_v23  ;;  %v2035_v33 = vld [vmem:[#allocation7 + $0x30] sm:$0xff]   ;;  %v2039_v36 = vld [vmem:[#allocation7 + $0x20] sm:$0xff]  }
 0x134   : > { %v478_v37 = vmul.f32 %v2803_v34, %v2803_v34  ;;  %954 = vmatmul.mubr.bf16.gmra.mxu1 %v2805_v38  ;;  %v438_v44 = vpop.xlane.xlu1 %437  ;;  %v590_v45 = vmul.f32 %v2720_v60, %v567_v19  ;;  %v526_v22 = vsub.f32 %v2687_v47, %v2803_v34  ;;  %v2032_v47 = vld [vmem:[#allocation7 + $0x78] sm:$0xff]   ;;  %v2037_v34 = vld [vmem:[#allocation7 + $0x28] sm:$0xff]  }
 0x135   : > { %2074 = vrsqrt.f32 %v540_v41  ;;  %v493_v5 = vsub.f32 %v461_v3, %v477_v29  ;;  %977 = vmatpush1.bf16.msra.mxu1 %v2026_v30  ;;  %v462_v11 = vmul.f32 0.0078125, %v438_v44  ;;  %996 = vmatprep.mubr.bf16.mxu1 %v2398_v42  ;;  %v591_v49 = vmul.f32 %v2720_v60, %v568_v27  ;;  %v2044_v19 = vld [vmem:[#allocation7 + $0x48] sm:$0xff]   ;;  %v2046_v3 = vld [vmem:[#allocation7 + $0x40] sm:$0xff]  }
 0x136   : > { %978 = vmatprep.subr.bf16.mxu1 %v2031_v24  ;;  %v613_v55 = vadd.f32 %v2731_v13, %v590_v45  ;;  %1818 = vmatprep.subr.bf16.mxu0 %v2032_v47  ;;  %v2043_v24 = vld [vmem:[#allocation7 + $0x10] sm:$0xff]   ;;  %v2045_v41 = vld [vmem:[#allocation7 + $0x8] sm:$0xff]   ;;  %v2047_v27 = vld [vmem:[#allocation7] sm:$0xff]  }
 0x137   : > { %v509_v53 = vmax.f32 %v493_v5, 0.0  ;;  %v494_v54 = vsub.f32 %v462_v11, %v478_v37  ;;  %v614_v58 = vadd.f32 %v2731_v13, %v591_v49 }
 0x138   : > { %v2069_v16 = vpop.eup %2068 }
 0x139   : > { %v541_v61 = vadd.f32 1e-05, %v509_v53  ;;  %v510_v62 = vmax.f32 %v494_v54, 0.0  ;;  %979 = vmatpush1.bf16.msra.mxu1 %v2029_v48  ;;  %v629_v17 = vpack.c.bf16 %v614_v58, %v613_v55  ;;  %v569_v51 = vmul.f32 %v2069_v16, %v521_v50 }
 0x13a   : > { %v2071_v63 = vpop.eup %2070  ;;  %v671_v55 = vlaneseq }
 0x13b   : > { %2076 = vrsqrt.f32 %v541_v61  ;;  %v542_v2 = vadd.f32 1e-05, %v510_v62  ;;  %884 = vmatmul.mubr.bf16.vlgmr.msra.gmra.mxu0 %v629_v17  ;;  %v570_v32 = vmul.f32 %v2071_v63, %v522_v52  ;;  %v592_v0 = vmul.f32 %v2720_v60, %v569_v51  ;;  %v2888_v63 = vld [vmem:[%s3250_s4] sm:$0xf] }
 0x13c   : > { %997 = vmatmul.mubr.bf16.vlgmr.msra.gmra.mxu1 %v629_v17  ;;  %893 = vmatprep.mubr.bf16.mxu0 %v2398_v42  ;;  %v2877_v52 = vshrl.u32 %v671_v55, 7 }
 0x13d   : > { %2078 = vrsqrt.f32 %v542_v2  ;;  %1006 = vmatprep.mubr.bf16.mxu1 %v2398_v42  ;;  %v593_v35 = vmul.f32 %v2720_v60, %v570_v32  ;;  %v615_v1 = vadd.f32 %v2731_v13, %v592_v0 }
 0x13e   : > { %v681_v62 = vsub.s32 2, %v2877_v52  ;;  %v685_v51 = vsub.s32 3, %v2877_v52 }
 0x13f   : > { %v616_v57 = vadd.f32 %v2731_v13, %v593_v35 }
 0x140   : > { %v2073_v6 = vpop.eup %2072  ;;  %v2893_v32 = vrot.slane %v2888_v63, %v681_v62  ;;  %v2898_v35 = vrot.slane %v2888_v63, %v685_v51 }
 0x141   : > { %v630_v9 = vpack.c.bf16 %v616_v57, %v615_v1  ;;  %v571_v12 = vmul.f32 %v2073_v6, %v523_v15 }
 0x142   : > { %v2075_v14 = vpop.eup %2074 }
 0x143   : > { %894 = vmatmul.mubr.bf16.gmra.mxu0 %v630_v9  ;;  %v572_v18 = vmul.f32 %v2075_v14, %v524_v7  ;;  %v594_v25 = vmul.f32 %v2720_v60, %v571_v12 }
 0x144   : > { %1007 = vmatmul.mubr.bf16.gmra.mxu1 %v630_v9  ;;  %903 = vmatprep.mubr.bf16.mxu0 %v2398_v42 }
 0x145   : > { %1016 = vmatprep.mubr.bf16.mxu1 %v2398_v42  ;;  %v595_v40 = vmul.f32 %v2720_v60, %v572_v18  ;;  %v617_v21 = vadd.f32 %v2731_v13, %v594_v25 }
 0x147   : > { %v618_v43 = vadd.f32 %v2731_v13, %v595_v40 }
 0x148   : > { %v2077_v56 = vpop.eup %2076 }
 0x149   : > { %v631_v10 = vpack.c.bf16 %v618_v43, %v617_v21  ;;  %v573_v31 = vmul.f32 %v2077_v56, %v525_v4 }
 0x14a   : > { %v2079_v23 = vpop.eup %2078 }
 0x14b   : > { %904 = vmatmul.mubr.bf16.gmra.mxu0 %v631_v10  ;;  %v574_v26 = vmul.f32 %v2079_v23, %v526_v22  ;;  %v596_v28 = vmul.f32 %v2720_v60, %v573_v31 }
 0x14c   : > { %1017 = vmatmul.mubr.bf16.gmra.mxu1 %v631_v10  ;;  %913 = vmatprep.mubr.bf16.mxu0 %v2398_v42 }
 0x14d   : > { %1026 = vmatprep.mubr.bf16.mxu1 %v2398_v42  ;;  %v597_v46 = vmul.f32 %v2720_v60, %v574_v26  ;;  %v619_v8 = vadd.f32 %v2731_v13, %v596_v28  ;;  %v2033_v60 = vld [vmem:[#allocation7 + $0x38] sm:$0xff]  }
 0x14e   : > { %1819 = vmatpush3.bf16.msra.mxu0 %v2033_v60 }
 0x14f   : > { %v620_v29 = vadd.f32 %v2731_v13, %v597_v46  ;;  %v2034_v13 = vld [vmem:[#allocation7 + $0x70] sm:$0xff]  }
 0x150   : > { %1820 = vmatprep.subr.bf16.mxu0 %v2034_v13 }
 0x151   : > { %v632_v30 = vpack.c.bf16 %v620_v29, %v619_v8 }
 0x152   : > { %1821 = vmatpush3.bf16.msra.mxu0 %v2035_v33 }
 0x153   : > { %914 = vmatmul.mubr.bf16.gmra.mxu0 %v632_v30 }
 0x154   : > { %1027 = vmatmul.mubr.bf16.gmra.mxu1 %v632_v30 }
 0x155   : > { %1036 = vmatprep.mubr.bf16.mxu1 %v2398_v42 }
 0x15c   : > { %1037 = vmatmul.mubr.bf16.gmra.mxu1 %v2745_v39  ;;  %v2036_v39 = vld [vmem:[#allocation7 + $0x68] sm:$0xff]  }
 0x15d   : > { %1046 = vmatprep.mubr.bf16.mxu1 %v2398_v42  ;;  %1822 = vmatprep.subr.bf16.mxu0 %v2036_v39 }
 0x15e   : > { %1823 = vmatpush3.bf16.msra.mxu0 %v2037_v34 }
 0x164   : > { %1047 = vmatmul.mubr.bf16.gmra.mxu1 %v2765_v20  ;;  %v2038_v20 = vld [vmem:[#allocation7 + $0x60] sm:$0xff]  }
 0x165   : > { %1056 = vmatprep.mubr.bf16.mxu1 %v2398_v42  ;;  %1824 = vmatprep.subr.bf16.mxu0 %v2038_v20 }
 0x166   : > { %1825 = vmatpush3.bf16.msra.mxu0 %v2039_v36 }
 0x16c   : > { %1057 = vmatmul.mubr.bf16.gmra.mxu1 %v2785_v59  ;;  %v2040_v59 = vld [vmem:[#allocation7 + $0x58] sm:$0xff]  }
 0x16d   : > { %1066 = vmatprep.mubr.bf16.mxu1 %v2398_v42  ;;  %v2041_v42 = vld [vmem:[#allocation7 + $0x18] sm:$0xff]   ;;  %1826 = vmatprep.subr.bf16.mxu0 %v2040_v59 }
 0x16e   : > { %1827 = vmatpush3.bf16.msra.mxu0 %v2041_v42 }
 0x174   : > { %1067 = vmatmul.mubr.bf16.gmra.mxu1 %v2805_v38  ;;  %v2042_v38 = vld [vmem:[#allocation7 + $0x50] sm:$0xff]  }
 0x175   : > { %1828 = vmatprep.subr.bf16.mxu0 %v2042_v38 }
 0x176   : > { %1829 = vmatpush3.bf16.msra.mxu0 %v2043_v24 }
 0x177   : > { %1830 = vmatprep.subr.bf16.mxu0 %v2044_v19 }
 0x17a   : > { %1831 = vmatpush3.bf16.msra.mxu0 %v2045_v41 }
 0x17b   : > { %1832 = vmatprep.subr.bf16.mxu0 %v2046_v3 }
 0x17e   : > { %1833 = vmatpush3.bf16.msra.mxu0 %v2047_v27 }
 0x1dc   : > { %v2853_v37 = vpop.f32.mrf.mxu1 }
 0x1de   : > { %v2855_v44 = vpop.f32.mrf.mxu1 }
 0x1e0   : > { %v2857_v45 = vpop.f32.mrf.mxu1 }
 0x1e2   : > { %v2859_v5 = vpop.f32.mrf.mxu1 }
 0x1e4   : > { %v2861_v11 = vpop.f32.mrf.mxu1 }
 0x1e6   : > { %v2863_v48 = vpop.f32.mrf.mxu1 }
 0x1e8   : > { %v2865_v49 = vpop.f32.mrf.mxu1 }
 0x1ea   : > { %v2867_v50 = vpop.f32.mrf.mxu1 }
 0x1ec   : > { %v2869_v53 = vpop.f32.mrf.mxu1 }
 0x1ee   : > { %v2871_v54 = vpop.f32.mrf.mxu1 }
 0x1ef   : > { %3273 = vst [vmem:[#allocation15_spill] sm:$0xff] %v2871_v54 }
 0x1f0   : > { %v2873_v58 = vpop.f32.mrf.mxu1 }
 0x1f2   : > { %v2875_v16 = vpop.f32.mrf.mxu1 }
 0x1f3   : > { %3274 = vst [vmem:[#allocation16_spill] sm:$0xff] %v2875_v16 }
 0x1f4   : > { %v2879_v61 = vpop.f32.mrf.mxu1 }
 0x1f5   : > { %3275 = vst [vmem:[#allocation17_spill] sm:$0xff] %v2879_v61 }
 0x1f6   : > { %v2882_v17 = vpop.f32.mrf.mxu1 }
 0x1f7   : > { %3276 = vst [vmem:[#allocation18_spill] sm:$0xff] %v2882_v17 }
 0x1f8   : > { %v2890_v2 = vpop.f32.mrf.mxu1 }
 0x1f9   : > { %3277 = vst [vmem:[#allocation19_spill] sm:$0xff] %v2890_v2 }
 0x1fa   : > { %v2895_v0 = vpop.f32.mrf.mxu1 }
 0x1fb   : > { %3278 = vst [vmem:[#allocation20_spill] sm:$0xff] %v2895_v0  ;;  %v2903_v6 = vpop.f32.mrf.mxu0 }
 0x1fc   : > { %v998_v15 = vpop.f32.mrf.mxu1 }
 0x1fd   : > { %v2901_v1 = vadd.f32 %v998_v15, %v2893_v32  ;;  %v2913_v40 = vpop.f32.mrf.mxu0 }
 0x1fe   : > { %v1000_v57 = vpop.f32.mrf.mxu1 }
 0x1ff   : > { %v1762_v7 = vmul.f32 -1.442695, %v2901_v1  ;;  %v2907_v9 = vadd.f32 %v1000_v57, %v2898_v35  ;;  %v2923_v31 = vpop.f32.mrf.mxu0 }
 0x200   : > { %v1002_v12 = vpop.f32.mrf.mxu1 }
 0x201   : > { %2080 = vpow2.f32 %v1762_v7  ;;  %v1763_v14 = vmul.f32 -1.442695, %v2907_v9  ;;  %v2911_v18 = vadd.f32 %v1002_v12, %v2893_v32  ;;  %v2933_v30 = vpop.f32.mrf.mxu0 }
 0x202   : > { %v1004_v25 = vpop.f32.mrf.mxu1 }
 0x203   : > { %2082 = vpow2.f32 %v1763_v14  ;;  %v1764_v4 = vmul.f32 -1.442695, %v2911_v18  ;;  %v2917_v21 = vadd.f32 %v1004_v25, %v2898_v35  ;;  %v2943_v59 = vpop.f32.mrf.mxu0 }
 0x204   : > { %v1008_v43 = vpop.f32.mrf.mxu1 }
 0x205   : > { %2084 = vpow2.f32 %v1764_v4  ;;  %v1765_v56 = vmul.f32 -1.442695, %v2917_v21  ;;  %v2921_v22 = vadd.f32 %v1008_v43, %v2893_v32  ;;  %v2953_v15 = vpop.f32.mrf.mxu0 }
 0x206   : > { %v1010_v10 = vpop.f32.mrf.mxu1 }
 0x207   : > { %2086 = vpow2.f32 %v1765_v56  ;;  %v1766_v23 = vmul.f32 -1.442695, %v2921_v22  ;;  %v2927_v26 = vadd.f32 %v1010_v10, %v2898_v35 }
 0x208   : > { %v1012_v28 = vpop.f32.mrf.mxu1 }
 0x209   : > { %2088 = vpow2.f32 %v1766_v23  ;;  %v1767_v46 = vmul.f32 -1.442695, %v2927_v26  ;;  %v2931_v8 = vadd.f32 %v1012_v28, %v2893_v32  ;;  %v2963_v28 = vpop.f32.mrf.mxu0 }
 0x20a   : > { %v1014_v29 = vpop.f32.mrf.mxu1 }
 0x20b   : > { %2090 = vpow2.f32 %v1767_v46  ;;  %v1768_v47 = vmul.f32 -1.442695, %v2931_v8  ;;  %v2937_v60 = vadd.f32 %v1014_v29, %v2898_v35 }
 0x20c   : > { %v1018_v13 = vpop.f32.mrf.mxu1 }
 0x20d   : > { %2092 = vpow2.f32 %v1768_v47  ;;  %v1769_v33 = vmul.f32 -1.442695, %v2937_v60  ;;  %v2941_v39 = vadd.f32 %v1018_v13, %v2893_v32 }
 0x20e   : > { %v2081_v34 = vpop.eup %2080  ;;  %v1020_v20 = vpop.f32.mrf.mxu1 }
 0x20f   : > { %v1173_v36 = vadd.f32 1.0, %v2081_v34  ;;  %2094 = vpow2.f32 %v1769_v33  ;;  %v1770_v42 = vmul.f32 -1.442695, %v2941_v39  ;;  %v2947_v38 = vadd.f32 %v1020_v20, %v2898_v35 }
 0x210   : > { %v2083_v24 = vpop.eup %2082  ;;  %v1022_v19 = vpop.f32.mrf.mxu1 }
 0x211   : > { %2096 = vrcp.f32 %v1173_v36  ;;  %v1174_v41 = vadd.f32 1.0, %v2083_v24  ;;  %v1771_v3 = vmul.f32 -1.442695, %v2947_v38  ;;  %v2951_v27 = vadd.f32 %v1022_v19, %v2893_v32 }
 0x212   : > { %v2085_v55 = vpop.eup %2084  ;;  %2098 = vpow2.f32 %v1770_v42  ;;  %v1024_v62 = vpop.f32.mrf.mxu1  ;;  %v673_v42 = vsub.s32 0, %v2877_v52  ;;  %v677_v24 = vsub.s32 1, %v2877_v52 }
 0x213   : > { %2100 = vrcp.f32 %v1174_v41  ;;  %v1175_v51 = vadd.f32 1.0, %v2085_v55  ;;  %v1772_v57 = vmul.f32 -1.442695, %v2951_v27  ;;  %v2957_v7 = vadd.f32 %v1024_v62, %v2898_v35 }
 0x214   : > { %v2087_v12 = vpop.eup %2086  ;;  %2102 = vpow2.f32 %v1771_v3  ;;  %v1028_v14 = vpop.f32.mrf.mxu1 }
 0x215   : > { %2104 = vrcp.f32 %v1175_v51  ;;  %v1176_v25 = vadd.f32 1.0, %v2087_v12  ;;  %v1773_v4 = vmul.f32 -1.442695, %v2957_v7  ;;  %v2961_v43 = vadd.f32 %v1028_v14, %v2893_v32  ;;  %v901_v3 = vpop.f32.mrf.mxu0 }
 0x216   : > { %v2089_v56 = vpop.eup %2088  ;;  %2106 = vpow2.f32 %v1772_v57  ;;  %v1030_v10 = vpop.f32.mrf.mxu1 }
 0x217   : > { %2108 = vrcp.f32 %v1176_v25  ;;  %v1177_v23 = vadd.f32 1.0, %v2089_v56  ;;  %v1774_v46 = vmul.f32 -1.442695, %v2961_v43  ;;  %v2967_v29 = vadd.f32 %v1030_v10, %v2898_v35 }
 0x218   : > { %v2091_v47 = vpop.eup %2090  ;;  %2110 = vpow2.f32 %v1773_v4  ;;  %v1032_v13 = vpop.f32.mrf.mxu1  ;;  %v2984_v4 = vrot.slane %v2888_v63, %v673_v42  ;;  %v2987_v56 = vrot.slane %v2888_v63, %v677_v24 }
 0x219   : > { %2112 = vrcp.f32 %v1177_v23  ;;  %v1178_v33 = vadd.f32 1.0, %v2091_v47  ;;  %v1775_v34 = vmul.f32 -1.442695, %v2967_v29  ;;  %v2971_v20 = vadd.f32 %v1032_v13, %v2893_v32 }
 0x21a   : > { %v2093_v36 = vpop.eup %2092  ;;  %2114 = vpow2.f32 %v1774_v46  ;;  %v1034_v19 = vpop.f32.mrf.mxu1 }
 0x21b   : > { %2116 = vrcp.f32 %v1178_v33  ;;  %v1179_v41 = vadd.f32 1.0, %v2093_v36  ;;  %v1776_v55 = vmul.f32 -1.442695, %v2971_v20  ;;  %v2977_v62 = vadd.f32 %v1034_v19, %v2898_v35  ;;  %v2989_v46 = vpop.f32.mrf.mxu0 }
 0x21c   : > { %v2095_v51 = vpop.eup %2094  ;;  %2118 = vpow2.f32 %v1775_v34  ;;  %v1038_v57 = vpop.f32.mrf.mxu1  ;;  %v886_v34 = vadd.f32 %v2903_v6, %v2984_v4  ;;  %v888_v36 = vadd.f32 %v2913_v40, %v2987_v56  ;;  %v890_v19 = vadd.f32 %v2923_v31, %v2984_v4 }
 0x21d   : > { %2120 = vrcp.f32 %v1179_v41  ;;  %v1180_v12 = vadd.f32 1.0, %v2095_v51  ;;  %v1777_v14 = vmul.f32 -1.442695, %v2977_v62  ;;  %v2981_v25 = vadd.f32 %v1038_v57, %v2893_v32 }
 0x21e   : > { %v2097_v52 = vpop.eup %2096  ;;  %2122 = vpow2.f32 %v1776_v55  ;;  %v1040_v10 = vpop.f32.mrf.mxu1  ;;  %v892_v41 = vadd.f32 %v2933_v30, %v2987_v56  ;;  %v3006_v6 = vadd.f32 %v2943_v59, %v2984_v4  ;;  %v898_v59 = vadd.f32 %v2953_v15, %v2987_v56 }
 0x21f   : > { %v2099_v23 = vpop.eup %2098  ;;  %2124 = vrcp.f32 %v1180_v12  ;;  %v1778_v47 = vmul.f32 -1.442695, %v2981_v25  ;;  %v2993_v13 = vadd.f32 %v1040_v10, %v2898_v35  ;;  %v3013_v30 = vpop.f32.mrf.mxu0  ;;  %v902_v15 = vadd.f32 %v901_v3, %v2987_v56 }
 0x220   : > { %v2101_v33 = vpop.eup %2100  ;;  %v1181_v63 = vadd.f32 1.0, %v2099_v23  ;;  %2126 = vpow2.f32 %v1777_v14  ;;  %v1042_v42 = vpop.f32.mrf.mxu1 }
 0x221   : > { %v2103_v24 = vpop.eup %2102  ;;  %2128 = vpow2.f32 %v1778_v47  ;;  %v1779_v55 = vmul.f32 -1.442695, %v2993_v13  ;;  %v3009_v57 = vadd.f32 %v1042_v42, %v2893_v32  ;;  %v1270_v31 = vmul.f32 %v2101_v33, %v2907_v9 }
 0x222   : > { %v2105_v51 = vpop.eup %2104  ;;  %2130 = vrcp.f32 %v1181_v63  ;;  %v1182_v40 = vadd.f32 1.0, %v2103_v24  ;;  %v1044_v12 = vpop.f32.mrf.mxu1  ;;  %v1269_v9 = vmul.f32 %v2097_v52, %v2901_v1 }
 0x223   : > { %v2107_v14 = vpop.eup %2106  ;;  %v1271_v10 = vmul.f32 %v2105_v51, %v2911_v18  ;;  %2132 = vpow2.f32 %v1779_v55  ;;  %v3016_v23 = vadd.f32 %v1044_v12, %v2898_v35  ;;  %v1780_v42 = vmul.f32 -1.442695, %v3009_v57  ;;  %v909_v52 = vpop.f32.mrf.mxu0 }
 0x224   : > { %v2109_v47 = vpop.eup %2108  ;;  %2134 = vrcp.f32 %v1182_v40  ;;  %v1183_v63 = vadd.f32 1.0, %v2107_v14  ;;  %v1048_v24 = vpop.f32.mrf.mxu1  ;;  %v900_v12 = vadd.f32 %v2963_v28, %v2984_v4  ;;  %v1302_v2 = vmul.f32 %v1270_v31, %v888_v36 }
 0x225   : > { %v2111_v0 = vpop.eup %2110  ;;  %v1272_v18 = vmul.f32 %v2109_v47, %v2917_v21  ;;  %v1781_v33 = vmul.f32 -1.442695, %v3016_v23  ;;  %v3025_v55 = vadd.f32 %v1048_v24, %v2893_v32  ;;  %v1303_v61 = vmul.f32 %v1271_v10, %v890_v19 }
 0x226   : > { %v2113_v51 = vpop.eup %2112  ;;  %2136 = vrcp.f32 %v1183_v63  ;;  %v1184_v40 = vadd.f32 1.0, %v2111_v0  ;;  %v1050_v14 = vpop.f32.mrf.mxu1  ;;  %v1301_v3 = vmul.f32 %v1269_v9, %v886_v34 }
 0x227   : > { %v2115_v17 = vpop.eup %2114  ;;  %v1304_v1 = vmul.f32 %v1272_v18, %v892_v41  ;;  %2138 = vpow2.f32 %v1780_v42  ;;  %v1782_v24 = vmul.f32 -1.442695, %v3025_v55  ;;  %v3032_v16 = vadd.f32 %v1050_v14, %v2898_v35 }
 0x228   : > { %v2117_v21 = vpop.eup %2116  ;;  %2140 = vrcp.f32 %v1184_v40  ;;  %v1185_v47 = vadd.f32 1.0, %v2115_v17  ;;  %v1052_v28 = vpop.f32.mrf.mxu1  ;;  %v1333_v42 = vpack.c.bf16 %v1303_v61, %v1301_v3  ;;  %v1273_v9 = vmul.f32 %v2113_v51, %v2921_v22 }
 0x229   : > { %v2119_v54 = vpop.eup %2118  ;;  %v1274_v0 = vmul.f32 %v2117_v21, %v2927_v26  ;;  %2142 = vpow2.f32 %v1781_v33  ;;  %v3036_v36 = vadd.f32 %v1052_v28, %v2893_v32  ;;  %v1783_v31 = vmul.f32 -1.442695, %v3032_v16  ;;  %v3040_v40 = vpop.f32.mrf.mxu0 }
 0x22a   : > { %v2121_v19 = vpop.eup %2120  ;;  %2144 = vrcp.f32 %v1185_v47  ;;  %v1186_v41 = vadd.f32 1.0, %v2119_v54  ;;  %v1054_v17 = vpop.f32.mrf.mxu1  ;;  %v1334_v10 = vpack.c.bf16 %v1304_v1, %v1302_v2 }
 0x22b   : > { %v2123_v63 = vpop.eup %2122  ;;  %v1275_v18 = vmul.f32 %v2121_v19, %v2931_v8  ;;  %2146 = vpow2.f32 %v1782_v24  ;;  %v1784_v26 = vmul.f32 -1.442695, %v3036_v36  ;;  %v3045_v54 = vadd.f32 %v1054_v17, %v2898_v35 }
 0x22c   : > { %v2125_v34 = vpop.eup %2124  ;;  %2148 = vrcp.f32 %v1186_v41  ;;  %v1187_v33 = vadd.f32 1.0, %v2123_v63  ;;  %1516 = vmatprep.mubr.bf16.mxu0 %v1334_v10  ;;  %v1058_v14 = vpop.f32.mrf.mxu1  ;;  %v3050_v8 = vadd.f32 %v2989_v46, %v2984_v4  ;;  %v1306_v51 = vmul.f32 %v1274_v0, %v898_v59 }
 0x22d   : > { %v2127_v2 = vpop.eup %2126  ;;  %v1276_v61 = vmul.f32 %v2125_v34, %v2937_v60  ;;  %2150 = vpow2.f32 %v1783_v31  ;;  %v3053_v1 = vadd.f32 %v1058_v14, %v2893_v32  ;;  %1517 = vmatmul.mubr.bf16.vlgmr.msra.gmra.mxu0 %v1333_v42  ;;  %v1785_v47 = vmul.f32 -1.442695, %v3045_v54  ;;  %v3056_v60 = vpop.f32.mrf.mxu0 }
 0x22e   : > { %v2129_v22 = vpop.eup %2128  ;;  %2152 = vrcp.f32 %v1187_v33  ;;  %v1188_v21 = vadd.f32 1.0, %v2127_v2  ;;  %v1060_v24 = vpop.f32.mrf.mxu1  ;;  %v1307_v3 = vmul.f32 %v1275_v18, %v900_v12  ;;  %v1305_v31 = vmul.f32 %v1273_v9, %v3006_v6 }
 0x22f   : > { %v2131_v28 = vpop.eup %2130  ;;  %v1308_v19 = vmul.f32 %v1276_v61, %v902_v15  ;;  %v1189_v41 = vadd.f32 1.0, %v2129_v22  ;;  %2154 = vpow2.f32 %v1784_v26  ;;  %v1786_v17 = vmul.f32 -1.442695, %v3053_v1  ;;  %v3070_v9 = vpop.f32.mrf.mxu0 }
 0x230   : > { %v2133_v46 = vpop.eup %2132  ;;  %2156 = vrcp.f32 %v1188_v21  ;;  %v3061_v59 = vadd.f32 %v1060_v24, %v2898_v35  ;;  %v1062_v0 = vpop.f32.mrf.mxu1  ;;  %v908_v42 = vadd.f32 %v3013_v30, %v2987_v56  ;;  %v910_v18 = vadd.f32 %v909_v52, %v2984_v4 }
 0x231   : > { %v2135_v10 = vpop.eup %2134  ;;  %2158 = vrcp.f32 %v1189_v41  ;;  %v1190_v63 = vadd.f32 1.0, %v2133_v46  ;;  %v3064_v12 = vadd.f32 %v1062_v0, %v2893_v32  ;;  %v1336_v15 = vpack.c.bf16 %v1308_v19, %v1306_v51  ;;  %v919_v46 = vpop.f32.mrf.mxu0 }
 0x232   : > { %2160 = vpow2.f32 %v1785_v47  ;;  %v1787_v6 = vmul.f32 -1.442695, %v3061_v59  ;;  %v1064_v26 = vpop.f32.mrf.mxu1  ;;  %v1335_v2 = vpack.c.bf16 %v1307_v3, %v1305_v31  ;;  %v1277_v30 = vmul.f32 %v2131_v28, %v2941_v39 }
 0x233   : > { %v2137_v34 = vpop.eup %2136  ;;  %2162 = vrcp.f32 %v1190_v63  ;;  %v1788_v33 = vmul.f32 -1.442695, %v3064_v12  ;;  %v3074_v14 = vadd.f32 %v1064_v26, %v2898_v35  ;;  %1524 = vmatprep.mubr.bf16.mxu0 %v1336_v15  ;;  %v1278_v52 = vmul.f32 %v2135_v10, %v2947_v38 }
 0x234   : > { %v2139_v61 = vpop.eup %2138  ;;  %v1279_v22 = vmul.f32 %v2137_v34, %v2951_v27  ;;  %2164 = vpow2.f32 %v1786_v17  ;;  %v1068_v51 = vpop.f32.mrf.mxu1  ;;  %v912_v39 = vadd.f32 %v3040_v40, %v2987_v56  ;;  %v1309_v63 = vmul.f32 %v1277_v30, %v3050_v8 }
 0x235   : > { %v2141_v21 = vpop.eup %2140  ;;  %v1191_v47 = vadd.f32 1.0, %v2139_v61  ;;  %2166 = vpow2.f32 %v1787_v6  ;;  %v1789_v24 = vmul.f32 -1.442695, %v3074_v14  ;;  %v3081_v19 = vadd.f32 %v1068_v51, %v2893_v32  ;;  %1525 = vmatmul.mubr.bf16.gmra.mxu0 %v1335_v2 }
 0x236   : > { %v2143_v41 = vpop.eup %2142  ;;  %v1311_v3 = vmul.f32 %v1279_v22, %v910_v18  ;;  %v1280_v38 = vmul.f32 %v2141_v21, %v2957_v7  ;;  %2168 = vpow2.f32 %v1788_v33  ;;  %v1070_v27 = vpop.f32.mrf.mxu1  ;;  %v1310_v15 = vmul.f32 %v1278_v52, %v908_v42 }
 0x237   : > { %v2145_v28 = vpop.eup %2144  ;;  %2170 = vrcp.f32 %v1191_v47  ;;  %v1192_v31 = vadd.f32 1.0, %v2143_v41  ;;  %v1790_v17 = vmul.f32 -1.442695, %v3081_v19  ;;  %v3088_v0 = vadd.f32 %v1070_v27, %v2898_v35  ;;  %v921_v21 = vpop.f32.mrf.mxu0 }
 0x238   : > { %v2147_v10 = vpop.eup %2146  ;;  %v1312_v18 = vmul.f32 %v1280_v38, %v912_v39  ;;  %2172 = vpow2.f32 %v1789_v24  ;;  %v1072_v40 = vpop.f32.mrf.mxu1  ;;  %v1337_v22 = vpack.c.bf16 %v1311_v3, %v1309_v63  ;;  %v1281_v3 = vmul.f32 %v2145_v28, %v2961_v43 }
 0x239   : > { %v2149_v6 = vpop.eup %2148  ;;  %2174 = vrcp.f32 %v1192_v31  ;;  %v1193_v7 = vadd.f32 1.0, %v2147_v10  ;;  %v1791_v26 = vmul.f32 -1.442695, %v3088_v0  ;;  %v3093_v34 = vadd.f32 %v1072_v40, %v2893_v32 }
 0x23a   : > { %v2151_v33 = vpop.eup %2150  ;;  %2176 = vpow2.f32 %v1790_v17  ;;  %v1074_v2 = vpop.f32.mrf.mxu1  ;;  %v1338_v61 = vpack.c.bf16 %v1312_v18, %v1310_v15  ;;  %v1282_v47 = vmul.f32 %v2149_v6, %v2967_v29  ;;  %v920_v32 = vadd.f32 %v919_v46, %v2984_v4 }
 0x23b   : > { %v2153_v51 = vpop.eup %2152  ;;  %2178 = vrcp.f32 %v1193_v7  ;;  %v1194_v8 = vadd.f32 1.0, %v2151_v33  ;;  %v1792_v42 = vmul.f32 -1.442695, %v3093_v34  ;;  %v3097_v30 = vadd.f32 %v1074_v2, %v2898_v35 }
 0x23c   : > { %v2155_v52 = vpop.eup %2154  ;;  %v1283_v24 = vmul.f32 %v2153_v51, %v2971_v20  ;;  %2180 = vpow2.f32 %v1791_v26  ;;  %1532 = vmatprep.mubr.bf16.mxu0 %v1338_v61  ;;  %v918_v35 = vadd.f32 %v3070_v9, %v2987_v56  ;;  %v922_v29 = vadd.f32 %v921_v21, %v2987_v56 }
 0x23d   : > { %v2157_v41 = vpop.eup %2156  ;;  %2182 = vrcp.f32 %v1194_v8  ;;  %v1195_v39 = vadd.f32 1.0, %v2155_v52  ;;  %v1793_v38 = vmul.f32 -1.442695, %v3097_v30  ;;  %1533 = vmatmul.mubr.bf16.gmra.mxu0 %v1337_v22  ;;  %v916_v31 = vadd.f32 %v3056_v60, %v2984_v4 }
 0x23e   : > { %v2159_v27 = vpop.eup %2158  ;;  %v1284_v46 = vmul.f32 %v2157_v41, %v2977_v62  ;;  %2184 = vpow2.f32 %v1792_v42  ;;  %v1315_v17 = vmul.f32 %v1283_v24, %v920_v32  ;;  %v1314_v28 = vmul.f32 %v1282_v47, %v918_v35 }
 0x23f   : > { %v2161_v20 = vpop.eup %2160  ;;  %2186 = vrcp.f32 %v1195_v39  ;;  %v1313_v18 = vmul.f32 %v1281_v3, %v916_v31  ;;  %v1285_v62 = vmul.f32 %v2159_v27, %v2981_v25  ;;  %v926_v60 = vadd.f32 %v2853_v37, %v2984_v4 }
 0x240   : > { %v2163_v43 = vpop.eup %2162  ;;  %v1316_v10 = vmul.f32 %v1284_v46, %v922_v29  ;;  %v1196_v63 = vadd.f32 1.0, %v2161_v20  ;;  %2188 = vpow2.f32 %v1793_v38  ;;  %v930_v51 = vadd.f32 %v2857_v45, %v2984_v4 }
 0x241   : > { %v2165_v15 = vpop.eup %2164  ;;  %v1339_v33 = vpack.c.bf16 %v1315_v17, %v1313_v18  ;;  %v1286_v21 = vmul.f32 %v2163_v43, %v2993_v13  ;;  %v928_v42 = vadd.f32 %v2855_v44, %v2987_v56  ;;  %v932_v47 = vadd.f32 %v2859_v5, %v2987_v56 }
 0x242   : > { %v2167_v40 = vpop.eup %2166  ;;  %2190 = vrcp.f32 %v1196_v63  ;;  %v1197_v9 = vadd.f32 1.0, %v2165_v15  ;;  %v1340_v6 = vpack.c.bf16 %v1316_v10, %v1314_v28  ;;  %v1317_v32 = vmul.f32 %v1285_v62, %v926_v60  ;;  %v3279_v60 = vld [vmem:[#allocation15_spill] sm:$0xff] }
 0x243   : > { %v2169_v7 = vpop.eup %2168  ;;  %v1198_v26 = vadd.f32 1.0, %v2167_v40  ;;  %v1318_v3 = vmul.f32 %v1286_v21, %v928_v42  ;;  %v940_v17 = vadd.f32 %v2865_v49, %v2984_v4  ;;  %v938_v18 = vadd.f32 %v2863_v48, %v2987_v56 }
 0x244   : > { %v2171_v2 = vpop.eup %2170  ;;  %2192 = vrcp.f32 %v1197_v9  ;;  %v1199_v61 = vadd.f32 1.0, %v2169_v7  ;;  %1540 = vmatprep.mubr.bf16.mxu0 %v1340_v6  ;;  %v950_v48 = vadd.f32 %v2873_v58, %v2984_v4 }
 0x245   : > { %v2173_v22 = vpop.eup %2172  ;;  %v1287_v8 = vmul.f32 %v2171_v2, %v3009_v57  ;;  %2194 = vrcp.f32 %v1198_v26  ;;  %1541 = vmatmul.mubr.bf16.gmra.mxu0 %v1339_v33  ;;  %v946_v26 = vadd.f32 %v2869_v53, %v2984_v4 }
 0x246   : > { %v2175_v25 = vpop.eup %2174  ;;  %2196 = vrcp.f32 %v1199_v61  ;;  %v1200_v52 = vadd.f32 1.0, %v2173_v22  ;;  %v948_v61 = vadd.f32 %v3279_v60, %v2987_v56  ;;  %v3280_v22 = vld [vmem:[#allocation16_spill] sm:$0xff] }
 0x247   : > { %v2177_v37 = vpop.eup %2176  ;;  %v1319_v24 = vmul.f32 %v1287_v8, %v930_v51  ;;  %v1288_v45 = vmul.f32 %v2175_v25, %v3016_v23  ;;  %v936_v23 = vadd.f32 %v2861_v11, %v2984_v4  ;;  %v942_v11 = vadd.f32 %v2867_v50, %v2987_v56 }
 0x248   : > { %v2179_v41 = vpop.eup %2178  ;;  %2198 = vrcp.f32 %v1200_v52  ;;  %v1201_v13 = vadd.f32 1.0, %v2177_v37  ;;  %v952_v51 = vadd.f32 %v3280_v22, %v2987_v56 }
 0x249   : > { %v2181_v57 = vpop.eup %2180  ;;  %v1320_v39 = vmul.f32 %v1288_v45, %v932_v47  ;;  %v1341_v38 = vpack.c.bf16 %v1319_v24, %v1317_v32  ;;  %v1289_v29 = vmul.f32 %v2179_v41, %v3025_v55  ;;  %v3281_v47 = vld [vmem:[#allocation17_spill] sm:$0xff]  ;;  %v3282_v24 = vld [vmem:[#allocation19_spill] sm:$0xff] }
 0x24a   : > { %v2183_v27 = vpop.eup %2182  ;;  %2200 = vrcp.f32 %v1201_v13  ;;  %v1202_v44 = vadd.f32 1.0, %v2181_v57  ;;  %v956_v32 = vadd.f32 %v3281_v47, %v2984_v4  ;;  %v960_v45 = vadd.f32 %v3282_v24, %v2984_v4  ;;  %v3283_v57 = vld [vmem:[#allocation18_spill] sm:$0xff] }
 0x24b   : > { %v2185_v35 = vpop.eup %2184  ;;  %v1342_v46 = vpack.c.bf16 %v1320_v39, %v1318_v3  ;;  %v1290_v28 = vmul.f32 %v2183_v27, %v3032_v16  ;;  %v1321_v63 = vmul.f32 %v1289_v29, %v936_v23  ;;  %v958_v3 = vadd.f32 %v3283_v57, %v2987_v56  ;;  %v3284_v39 = vld [vmem:[#allocation20_spill] sm:$0xff] }
 0x24c   : > { %v2187_v20 = vpop.eup %2186  ;;  %2202 = vrcp.f32 %v1202_v44  ;;  %v1203_v5 = vadd.f32 1.0, %v2185_v35 }
 0x24d   : > { %v2189_v31 = vpop.eup %2188  ;;  %v1291_v43 = vmul.f32 %v2187_v20, %v3036_v36  ;;  %1548 = vmatprep.mubr.bf16.mxu0 %v1342_v46  ;;  %v1322_v6 = vmul.f32 %v1290_v28, %v938_v18  ;;  %v3158_v46 = vld [vmem:[#allocation8] ss:$0 sm:$0xff] }
 0x24e   : > { %2204 = vrcp.f32 %v1203_v5  ;;  %v1204_v10 = vadd.f32 1.0, %v2189_v31  ;;  %1549 = vmatmul.mubr.bf16.gmra.mxu0 %v1341_v38 }
 0x24f   : > { %v2191_v55 = vpop.eup %2190  ;;  %v1323_v15 = vmul.f32 %v1291_v43, %v940_v17 }
 0x250   : > { %v1292_v40 = vmul.f32 %v2191_v55, %v3045_v54  ;;  %2206 = vrcp.f32 %v1204_v10 }
 0x251   : > { %v2193_v49 = vpop.eup %2192  ;;  %v1343_v36 = vpack.c.bf16 %v1323_v15, %v1321_v63 }
 0x252   : > { %v2195_v9 = vpop.eup %2194  ;;  %v1324_v16 = vmul.f32 %v1292_v40, %v942_v11  ;;  %v1293_v7 = vmul.f32 %v2193_v49, %v3053_v1 }
 0x253   : > { %v2197_v62 = vpop.eup %2196  ;;  %v1294_v33 = vmul.f32 %v2195_v9, %v3061_v59 }
 0x254   : > { %v1295_v50 = vmul.f32 %v2197_v62, %v3064_v12  ;;  %v1344_v54 = vpack.c.bf16 %v1324_v16, %v1322_v6  ;;  %v1325_v1 = vmul.f32 %v1293_v7, %v946_v26 }
 0x255   : > { %v2199_v2 = vpop.eup %2198  ;;  %v1326_v58 = vmul.f32 %v1294_v33, %v948_v61 }
 0x256   : > { %v1327_v21 = vmul.f32 %v1295_v50, %v950_v48  ;;  %v1296_v8 = vmul.f32 %v2199_v2, %v3074_v14  ;;  %1556 = vmatprep.mubr.bf16.mxu0 %v1344_v54 }
 0x257   : > { %v2201_v53 = vpop.eup %2200  ;;  %1557 = vmatmul.mubr.bf16.gmra.mxu0 %v1343_v36 }
 0x258   : > { %v1328_v25 = vmul.f32 %v1296_v8, %v952_v51  ;;  %v1345_v59 = vpack.c.bf16 %v1327_v21, %v1325_v1  ;;  %v1297_v12 = vmul.f32 %v2201_v53, %v3081_v19  ;;  %v962_v19 = vadd.f32 %v3284_v39, %v2987_v56 }
 0x259   : > { %v2203_v42 = vpop.eup %2202 }
 0x25a   : > { %v1346_v52 = vpack.c.bf16 %v1328_v25, %v1326_v58  ;;  %v1298_v41 = vmul.f32 %v2203_v42, %v3088_v0  ;;  %v1329_v38 = vmul.f32 %v1297_v12, %v956_v32 }
 0x25b   : > { %v2205_v37 = vpop.eup %2204 }
 0x25c   : > { %v1299_v14 = vmul.f32 %v2205_v37, %v3093_v34  ;;  %1564 = vmatprep.mubr.bf16.mxu0 %v1346_v52  ;;  %v1330_v35 = vmul.f32 %v1298_v41, %v958_v3 }
 0x25d   : > { %v2207_v13 = vpop.eup %2206 }
 0x25e   : > { %v1331_v27 = vmul.f32 %v1299_v14, %v960_v45  ;;  %v1300_v44 = vmul.f32 %v2207_v13, %v3097_v30 }
 0x25f   : > { %1565 = vmatmul.mubr.bf16.gmra.mxu0 %v1345_v59 }
 0x260   : > { %v1332_v4 = vmul.f32 %v1300_v44, %v962_v19  ;;  %v1347_v29 = vpack.c.bf16 %v1331_v27, %v1329_v38 }
 0x262   : > { %v1348_v0 = vpack.c.bf16 %v1332_v4, %v1330_v35 }
 0x264   : > { %1572 = vmatprep.mubr.bf16.mxu0 %v1348_v0 }
 0x267   : > { %1573 = vmatmul.mubr.bf16.gmra.mxu0 %v1347_v29 }
 0x2ed   : > { %v1834_v34 = vpop.f32.mrf.mxu0 }
 0x2ef   : > { %v1835_v20 = vpop.f32.mrf.mxu0 }
 0x2f0   : > { %v1836_v5 = vadd.f32 %v1835_v20, %v1834_v34 }
 0x2f1   : > { %v1837_v31 = vpop.f32.mrf.mxu0 }
 0x2f2   : > { %v1519_v56 = vadd.f32 %v1836_v5, %v3158_v46 }
 0x2f3   : > { %v1838_v23 = vpop.f32.mrf.mxu0 }
 0x2f4   : > { %1581 = vst [vmem:[%s3163_s21] sm:$0xff] %v1519_v56  ;;  %v1839_v30 = vadd.f32 %v1838_v23, %v1837_v31 }
 0x2f5   : > { %v1840_v17 = vpop.f32.mrf.mxu0 }
 0x2f6   : > { %v1522_v43 = vadd.f32 %v1839_v30, %v3158_v46 }
 0x2f7   : > { %v1841_v28 = vpop.f32.mrf.mxu0 }
 0x2f8   : > { %1582 = vst [vmem:[%s3163_s21 + $0x8] sm:$0xff] %v1522_v43  ;;  %v1842_v10 = vadd.f32 %v1841_v28, %v1840_v17 }
 0x2f9   : > { %v1843_v55 = vpop.f32.mrf.mxu0 }
 0x2fa   : > { %v1527_v63 = vadd.f32 %v1842_v10, %v3158_v46 }
 0x2fb   : > { %v1844_v15 = vpop.f32.mrf.mxu0 }
 0x2fc   : > { %1583 = vst [vmem:[%s3163_s21 + $0x10] sm:$0xff] %v1527_v63  ;;  %v1845_v18 = vadd.f32 %v1844_v15, %v1843_v55 }
 0x2fd   : > { %v1846_v11 = vpop.f32.mrf.mxu0 }
 0x2fe   : > { %v1530_v40 = vadd.f32 %v1845_v18, %v3158_v46 }
 0x2ff   : > { %v1847_v49 = vpop.f32.mrf.mxu0 }
 0x300   : > { %1584 = vst [vmem:[%s3163_s21 + $0x18] sm:$0xff] %v1530_v40  ;;  %v1848_v36 = vadd.f32 %v1847_v49, %v1846_v11 }
 0x301   : > { %v1849_v9 = vpop.f32.mrf.mxu0 }
 0x302   : > { %v1535_v6 = vadd.f32 %v1848_v36, %v3158_v46 }
 0x303   : > { %v1850_v16 = vpop.f32.mrf.mxu0 }
 0x304   : > { %1585 = vst [vmem:[%s3163_s21 + $0x20] sm:$0xff] %v1535_v6  ;;  %v1851_v7 = vadd.f32 %v1850_v16, %v1849_v9 }
 0x305   : > { %v1852_v62 = vpop.f32.mrf.mxu0 }
 0x306   : > { %v1538_v26 = vadd.f32 %v1851_v7, %v3158_v46 }
 0x307   : > { %v1853_v48 = vpop.f32.mrf.mxu0 }
 0x308   : > { %1586 = vst [vmem:[%s3163_s21 + $0x28] sm:$0xff] %v1538_v26  ;;  %v1854_v33 = vadd.f32 %v1853_v48, %v1852_v62 }
 0x309   : > { %v1855_v50 = vpop.f32.mrf.mxu0 }
 0x30a   : > { %v1543_v54 = vadd.f32 %v1854_v33, %v3158_v46 }
 0x30b   : > { %v1856_v2 = vpop.f32.mrf.mxu0 }
 0x30c   : > { %1587 = vst [vmem:[%s3163_s21 + $0x30] sm:$0xff] %v1543_v54  ;;  %v1857_v60 = vadd.f32 %v1856_v2, %v1855_v50 }
 0x30e   : > { %v1546_v61 = vadd.f32 %v1857_v60, %v3158_v46  ;;  %v1858_v22 = vpop.f32.mrf.mxu0 }
 0x310   : > { %1588 = vst [vmem:[%s3163_s21 + $0x38] sm:$0xff] %v1546_v61  ;;  %v1859_v51 = vpop.f32.mrf.mxu0 }
 0x311   : > { %v1860_v1 = vadd.f32 %v1859_v51, %v1858_v22 }
 0x312   : > { %v1861_v21 = vpop.f32.mrf.mxu0 }
 0x313   : > { %v1551_v8 = vadd.f32 %v1860_v1, %v3158_v46 }
 0x314   : > { %v1862_v53 = vpop.f32.mrf.mxu0 }
 0x315   : > { %1589 = vst [vmem:[%s3163_s21 + $0x40] sm:$0xff] %v1551_v8  ;;  %v1863_v58 = vadd.f32 %v1862_v53, %v1861_v21 }
 0x317   : > { %v1554_v25 = vadd.f32 %v1863_v58, %v3158_v46  ;;  %v1864_v59 = vpop.f32.mrf.mxu0 }
 0x319   : > { %1590 = vst [vmem:[%s3163_s21 + $0x48] sm:$0xff] %v1554_v25  ;;  %v1865_v42 = vpop.f32.mrf.mxu0 }
 0x31a   : > { %v1866_v12 = vadd.f32 %v1865_v42, %v1864_v59 }
 0x31b   : > { %v1867_v52 = vpop.f32.mrf.mxu0 }
 0x31c   : > { %v1559_v37 = vadd.f32 %v1866_v12, %v3158_v46 }
 0x31d   : > { %v1868_v47 = vpop.f32.mrf.mxu0 }
 0x31e   : > { %1591 = vst [vmem:[%s3163_s21 + $0x50] sm:$0xff] %v1559_v37  ;;  %v1869_v32 = vadd.f32 %v1868_v47, %v1867_v52 }
 0x31f   : > { %v1870_v24 = vpop.f32.mrf.mxu0 }
 0x320   : > { %v1562_v45 = vadd.f32 %v1869_v32, %v3158_v46 }
 0x321   : > { %v1871_v41 = vpop.f32.mrf.mxu0 }
 0x322   : > { %1592 = vst [vmem:[%s3163_s21 + $0x58] sm:$0xff] %v1562_v45  ;;  %v1872_v14 = vadd.f32 %v1871_v41, %v1870_v24 }
 0x323   : > { %v1873_v13 = vpop.f32.mrf.mxu0 }
 0x324   : > { %v1567_v57 = vadd.f32 %v1872_v14, %v3158_v46 }
 0x325   : > { %v1874_v3 = vpop.f32.mrf.mxu0 }
 0x326   : > { %1593 = vst [vmem:[%s3163_s21 + $0x60] sm:$0xff] %v1567_v57  ;;  %v1875_v39 = vadd.f32 %v1874_v3, %v1873_v13 }
 0x327   : > { %v1876_v19 = vpop.f32.mrf.mxu0 }
 0x328   : > { %v1570_v38 = vadd.f32 %v1875_v39, %v3158_v46 }
 0x329   : > { %v1877_v27 = vpop.f32.mrf.mxu0 }
 0x32a   : > { %1594 = vst [vmem:[%s3163_s21 + $0x68] sm:$0xff] %v1570_v38  ;;  %v1878_v44 = vadd.f32 %v1877_v27, %v1876_v19 }
 0x32b   : > { %v1879_v35 = vpop.f32.mrf.mxu0 }
 0x32c   : > { %v1575_v4 = vadd.f32 %v1878_v44, %v3158_v46 }
 0x32d   : > { %v1880_v29 = vpop.f32.mrf.mxu0 }
 0x32e   : > { %1595 = vst [vmem:[%s3163_s21 + $0x70] sm:$0xff] %v1575_v4  ;;  %v1881_v0 = vadd.f32 %v1880_v29, %v1879_v35 }
 0x330   : > { %v1578_v34 = vadd.f32 %v1881_v0, %v3158_v46 }
 0x332   : > { %1596 = vst [vmem:[%s3163_s21 + $0x78] sm:$0xff] %v1578_v34 }
 0x333   : > { %2327 = shalt.err (!%p2324_p9)
}
 0x334   : > { %s2328_s11 = scalar_lea.hbm %s3199_s3, 2048  ;;  %s2332_s17 = scalar_lea.hbm %s3253_s7, 4096 }
 0x335   : > { %p2329_p7 = scmp.ne.s32.totalorder %s3199_s3, %s2328_s11  ;;  %p2333_p6 = scmp.lt.s32.totalorder %s3199_s3, %s3253_s7 }
 0x336   : > { %p2334_p11 = scmp.lt.s32.totalorder %s2332_s17, %s2328_s11 }
 0x337   : > { %p2330_p4 = pnand %p2329_p7, %p3285_p0 }
 0x338   : > { %p2335_p13 = por %p2334_p11, %p2333_p6 }
 0x339   : > { %p2331_p8 = pneg %p2330_p4 }
 0x33b   : > { %p2336_p12 = pnand %p2335_p13, %p2331_p8 }
 0x33d   : > { %2339 = shalt.err (!%p2336_p12)
}
 0x33e   : > { %s2400_s18 = smov 128   ;;  %s2401_s22 = smov 8  }
 0x33f   : > { %1912 = dma.vmem_to_hbm [thread:$0]  (%p3285_p0), %s3201_s19, 2048, %s3199_s3, %s1598_s29, %s2400_s18, %s2400_s18, %s2401_s22  }
 0x340 PF: > { %s1626_s10 = sand.u32 1, %s2374_s24   ;;  %p3286_p5 = scmp.ne.s32.totalorder %s3260_s8, 0 }
 0x341   : > { %p3287_p10 = scmp.ge.s32.totalorder %s2386_s27, 2  ;;  %s1627_s28 = scalar_lea.sflag [#allocation4], %s1626_s10 }
 0x343   : > { %p1929_p1 = pnand %p3287_p10, %p3286_p5 }
 0x345   : > { %p1930_p2 = pneg %p1929_p1 }
 0x347   : > { %2369 = dma.done.wait (%p1930_p2), %s1627_s28, 2048  }
 0x348   : > { %2371 = vsyncadd (%p1930_p2), %s1627_s28, 4294965248  ;;  %p22_p3 = scmp.ge.s32.totalorder %s2514_s13, 4   ;;  %s3288_s24 = smov %s2378_s25 }
 0x349   : > { %s3289_s25 = smov %s2382_s26  ;;  %s3290_s26 = smov %s2532_s12 }
 0x34a   : > { %s3291_s27 = smov %s2514_s13  ;;  %24 = sbr.rel (!%p22_p3) target bundleno = 9 (0x9), region = 105 }
 0x34f   :  { %1632 = vsyncpa [#allocation3], 1 }
 0x350   :  { %1634 = vsyncpa [#allocation3 + $0x1], 1 }
 0x351   :  { %1635 = vsyncpa [#allocation6], 1 }
 0x352   :  { %1636 = vsyncpa [#allocation9], 1 }
 0x353   :  { %1637 = vsyncpa [#allocation4], 1 }
 0x354   :  { %1639 = vsyncpa [#allocation4 + $0x1], 1 }

// kernel: _lambda_.1
= control target key start
LH: loop header
LB: loop body
LE: loop exit
PB: predicated region body
PF: predicated region fallthrough
CT: control target
= control target key end

     0   :  { %s3246_s0 = inlined_call_operand.hbm [shape: f32[256,128], index: 0, kind: input, shape index: {}]   ;;  %s3247_s1 = inlined_call_operand.vmem [shape: f32[1,128], index: 1, kind: input, shape index: {}]   ;;  %s3248_s2 = inlined_call_operand.vmem [shape: f32[1,128], index: 2, kind: input, shape index: {}]   ;;  %s3249_s3 = inlined_call_operand.hbm [shape: bf16[128,512], index: 3, kind: input, shape index: {}]   ;;  %s3250_s4 = inlined_call_operand.vmem [shape: f32[1,512], index: 4, kind: input, shape index: {}]   ;;  %s3251_s5 = inlined_call_operand.hbm [shape: bf16[256,128], index: 5, kind: input, shape index: {}]   ;;  %s3252_s6 = inlined_call_operand.hbm [shape: f32[1,128], index: 6, kind: input, shape index: {}]   ;;  %s3253_s7 = inlined_call_operand.hbm [shape: f32[256,128], index: 7, kind: output, shape index: {}]  }
   0x1   :  { %3258 = sst [smem:[#allocation21_spill]] %s3249_s3 }
   0x2   :  { %12 = vsyncpa [#allocation3], 0 }
   0x3   :  { %14 = vsyncpa [#allocation3 + $0x1], 0 }
   0x4   :  { %15 = vsyncpa [#allocation6], 0 }
   0x5   :  { %16 = vsyncpa [#allocation9], 0 }
   0x6   :  { %17 = vsyncpa [#allocation4], 0 }
   0x7   :  { %19 = vsyncpa [#allocation4 + $0x1], 0  ;;  %s2442_s24 = smov 0   ;;  %s2444_s25 = smov 0  }
   0x8   :  { %s2446_s26 = smov 0   ;;  %s2448_s27 = smov 0  }
   0x9 LB: > { %s2463_s28 = sadd.s32 4294967295, %s2386_s27   ;;  %s1713_s29 = sadd.s32 4294967294, %s2386_s27   ;;  %s2386_s27 = sphi %s2448_s27, %s3291_s27   ;;  %s2382_s26 = sphi %s2446_s26, %s3290_s26   ;;  %s2378_s25 = sphi %s2444_s25, %s3289_s25   ;;  %s2374_s24 = sphi %s2442_s24, %s3288_s24  }
   0xa   : > { %p45_p0 = scmp.ne.s32.totalorder %s2378_s25, %s2374_s24  ;;  %p3254_p1 = scmp.eq.s32.totalorder %s2463_s28, 0 }
   0xb   : > { %p201_p3 = scmp.eq.s32.totalorder %s1713_s29, 1  ;;  %p1714_p5 = scmp.ge.s32.totalorder %s2386_s27, 1 }
   0xc   : > { %p2472_p4 = por %p3254_p1, %p45_p0  ;;  %p208_p7 = scmp.lt.s32.totalorder %s2386_s27, 3 }
   0xd   : > { %p2477_p6 = por %p201_p3, %p45_p0  ;;  %s2388_s10 = smov [#allocation5]  }
   0xe   : > { %s3259_s30 = scalar_select %p2472_p4, 1, 0 }
   0xf   : > { %s3260_s8 = scalar_select %p2477_p6, 1, 0 }
  0x10   : > { %p2482_p8 = pnand %p1714_p5, %p208_p7  ;;  %s226_s11 = sshll.u32 %s2388_s10, 4  ;;  %s227_s11 = int_to_ptr.vmem [resolvable:$true] %s226_s11 }
  0x11   : > { %s2389_s13 = smov [#allocation7]   ;;  %s2219_s15 = scalar_lea.vmem %s227_s11, 4096 }
  0x12   : > { %s3261_s9 = scalar_select %p2482_p8, 1, 0 }
  0x13   : > { %p1914_p9 = pneg %p2482_p8  ;;  %s242_s14 = sshll.u32 %s2389_s13, 4  ;;  %s243_s14 = int_to_ptr.vmem [resolvable:$true] %s242_s14 }
  0x14   : > { %p2220_p13 = scmp.ne.s32.totalorder %s227_s11, %s2219_s15  ;;  %p2227_p5 = scmp.lt.s32.totalorder %s227_s11, %s227_s11 }
  0x15   : > { %p2491_p11 = pnand %p1914_p9, %p3254_p1  ;;  %p2228_p7 = scmp.lt.s32.totalorder %s2219_s15, %s2219_s15 }
  0x17   : > { %p2210_p12 = pneg %p2491_p11  ;;  %p2229_p10 = por %p2228_p7, %p2227_p5 }
  0x19   : > { %p2222_p0 = pnand %p2220_p13, %p2210_p12 }
  0x1b   : > { %p2223_p3 = pneg %p2222_p0 }
  0x1d   : > { %p2230_p9 = pnand %p2229_p10, %p2223_p3 }
  0x1f   : > { %2233 = shalt.err (!%p2230_p9)
}
  0x20   : > { %s2390_s16 = smov 256   ;;  %s2391_s17 = smov 16  }
  0x21   : > { %s3263_s3 = sld [smem:[#allocation21_spill]]  ;;  %s2245_s20 = scalar_lea.vmem %s243_s14, 2048 }
  0x22   : > { %p2246_p1 = scmp.ne.s32.totalorder %s243_s14, %s2245_s20  ;;  %p2253_p2 = scmp.lt.s32.totalorder %s243_s14, %s243_s14 }
  0x23   : > { %p2254_p6 = scmp.lt.s32.totalorder %s2245_s20, %s2245_s20 }
  0x24   : > { %p2248_p13 = pnand %p2246_p1, %p2210_p12 }
  0x25   : > { %p2255_p5 = por %p2254_p6, %p2253_p2 }
  0x26   : > { %p2249_p0 = pneg %p2248_p13 }
  0x27   : > { %1917 = dma.hbm_to_vmem [thread:$0]  (!%p2491_p11), %s3263_s3, 4096, %s227_s11, [#allocation6], %s2390_s16, %s2390_s16, %s2391_s17  }
  0x28   : > { %p2256_p10 = pnand %p2255_p5, %p2249_p0 }
  0x2a   : > { %2259 = shalt.err (!%p2256_p10)
}
  0x2b   : > { %s2392_s21 = smov 64   ;;  %s2393_s22 = smov 4  }
  0x2c   : > { %1920 = dma.hbm_to_vmem [thread:$0]  (!%p2491_p11), %s3251_s5, 2048, %s243_s14, [#allocation6], %s2392_s21, %s2392_s21, %s2393_s22  }
  0x2d   : > { %s2394_s10 = smov [#allocation8]   ;;  %s2514_s13 = sadd.s32 1, %s2386_s27  }
  0x2e   : > { %s256_s11 = sshll.u32 %s2394_s10, 4  ;;  %s257_s11 = int_to_ptr.vmem [resolvable:$true] %s256_s11 }
  0x2f   : > { %s2271_s15 = scalar_lea.vmem %s257_s11, 16  ;;  %s2278_s16 = scalar_lea.vmem %s257_s11, 32 }
  0x30   : > { %p2272_p1 = scmp.ne.s32.totalorder %s257_s11, %s2271_s15  ;;  %p2279_p3 = scmp.lt.s32.totalorder %s257_s11, %s257_s11 }
  0x31   : > { %p2280_p7 = scmp.lt.s32.totalorder %s2278_s16, %s2271_s15 }
  0x32   : > { %p2274_p2 = pnand %p2272_p1, %p2210_p12 }
  0x33   : > { %p2281_p9 = por %p2280_p7, %p2279_p3 }
  0x34   : > { %p2275_p6 = pneg %p2274_p2 }
  0x36   : > { %p2282_p13 = pnand %p2281_p9, %p2275_p6 }
  0x38   : > { %2285 = shalt.err (!%p2282_p13)
}
  0x39   : > { %1923 = dma.hbm_to_vmem [thread:$0]  (!%p2491_p11), %s3252_s6, 16, %s257_s11, [#allocation9]  }
  0x3a   : > { %s29_s18 = ssub.s32 %s2386_s27, %s2514_s13  ;;  %s32_s19 = sadd.s32 1, %s2382_s26 }
  0x3b   : > { %p30_p12 = scmp.eq.s32.totalorder %s29_s18, 0  ;;  %p39_p0 = scmp.ne.s32.totalorder %s2382_s26, %s2378_s25 }
  0x3c   : > { %p40_p5 = scmp.eq.s32.totalorder %s2386_s27, 0  ;;  %p1935_p10 = scmp.lt.s32.totalorder %s2386_s27, 2 }
  0x3d   : > { %s2532_s12 = scalar_select %p30_p12, %s2382_s26, %s32_s19  }
  0x3e   : > { %p41_p1 = por %p40_p5, %p39_p0  ;;  %p3264_p2 = scmp.eq.s32.totalorder %s2463_s28, 1 }
  0x3f   : > { %s267_s21 = sand.u32 1, %s2382_s26   ;;  %s1816_s22 = sshll.u32 %s2386_s27, 11 }
  0x40   : > { %p2536_p6 = por %p3264_p2, %p39_p0  ;;  %s1719_s23 = sshll.u32 %s267_s21, 7 }
  0x41   : > { %s2545_s11 = scalar_lea.hbm %s3246_s0, %s1816_s22  ;;  %s271_s15 = scalar_lea.vmem [#allocation2], %s1719_s23 }
  0x42   : > { %s3265_s20 = scalar_select %p2536_p6, 1, 0 }
  0x43   : > { %s278_s16 = sshll.u32 %s271_s15, 4  ;;  %p2547_p11 = pnand %p1935_p10, %p41_p1  ;;  %s2551_s16 = int_to_ptr.vmem [resolvable:$true] %s278_s16 }
  0x44   : > { %s2553_s17 = scalar_lea.sflag [#allocation3], %s267_s21  ;;  %s2286_s18 = scalar_lea.hbm %s2545_s11, 2048 }
  0x45   : > { %p2287_p3 = scmp.ne.s32.totalorder %s2545_s11, %s2286_s18  ;;  %p2288_p7 = pneg %p2547_p11 }
  0x46   : > { %s2291_s23 = scalar_lea.hbm %s3246_s0, 4096  ;;  %p2292_p12 = scmp.lt.s32.totalorder %s2545_s11, %s3246_s0 }
  0x47   : > { %p2289_p9 = pnand %p2288_p7, %p2287_p3  ;;  %p2293_p0 = scmp.lt.s32.totalorder %s2291_s23, %s2286_s18 }
  0x49   : > { %p2290_p13 = pneg %p2289_p9  ;;  %p2294_p5 = por %p2293_p0, %p2292_p12 }
  0x4b   : > { %p2295_p10 = pnand %p2294_p5, %p2290_p13 }
  0x4d   : > { %2298 = shalt.err (!%p2295_p10)
}
  0x4e   : > { %s2299_s21 = scalar_lea.vmem %s2551_s16, 2048  ;;  %s2395_s15 = smov [#allocation2]  }
  0x4f   : > { %p2300_p1 = scmp.ne.s32.totalorder %s2551_s16, %s2299_s21  ;;  %s2304_s3 = sshll.u32 %s2395_s15, 4  ;;  %s2305_s3 = int_to_ptr.vmem [resolvable:$false] %s2304_s3 }
  0x50   : > { %s2306_s19 = scalar_lea.vmem %s2305_s3, 4096  ;;  %p2307_p9 = scmp.lt.s32.totalorder %s2551_s16, %s2305_s3 }
  0x51   : > { %p2302_p2 = pnand %p2300_p1, %p2288_p7  ;;  %p2308_p6 = scmp.lt.s32.totalorder %s2306_s19, %s2299_s21 }
  0x53   : > { %p2303_p3 = pneg %p2302_p2  ;;  %p2309_p4 = por %p2308_p6, %p2307_p9 }
  0x55   : > { %p2310_p8 = pnand %p2309_p4, %p2303_p3 }
  0x57   : > { %2313 = shalt.err (!%p2310_p8)
}
  0x58   : > { %s2396_s18 = smov 128   ;;  %s2397_s22 = smov 8  }
  0x59   : > { %1927 = dma.hbm_to_vmem [thread:$0]  (!%p2547_p11), %s2545_s11, 2048, %s2551_s16, %s2553_s17, %s2396_s18, %s2396_s18, %s2397_s22  }
  0x5a   : > { %p3267_p7 = scmp.ne.s32.totalorder %s3261_s9, 0 }
  0x5c   : > { %290 = sbr.rel (%p3267_p7) target bundleno = 832 (0x340), region = 48 }
  0x61   : > { %s2577_s23 = sand.u32 1, %s2378_s25   ;;  %p3268_p4 = scmp.ne.s32.totalorder %s3259_s30, 0 }
  0x62   : > { %s1723_s3 = sshll.u32 %s2577_s23, 7  ;;  %s293_s29 = scalar_lea.sflag [#allocation3], %s2577_s23 }
  0x63   : > { %s2583_s10 = scalar_lea.vmem [#allocation2], %s1723_s3 }
  0x64   : > { %2357 = dma.done.wait (%p3268_p4), %s293_s29, 2048  }
  0x65   : > { %2359 = vsyncadd (%p3268_p4), %s293_s29, 4294965248  ;;  %p3269_p8 = scmp.eq.s32.totalorder %s2463_s28, 0 }
  0x67   : > { %2361 = dma.done.wait (%p3269_p8), [#allocation6], 6144   ;;  %p3270_p6 = pmov %p3269_p8 }
  0x69   : > { %2363 = vsyncadd (%p3270_p6), [#allocation6], 4294961152  ;;  %p3271_p11 = pmov %p3270_p6 }
  0x6a   : > { %p3272_p13 = pmov %p3270_p6 }
  0x6b   : > { %2365 = dma.done.wait (%p3271_p11), [#allocation9], 16  }
  0x6c   : > { %2367 = vsyncadd (%p3272_p13), [#allocation9], 4294967280  ;;  %v2598_v0 = vld [vmem:[%s2583_s10 + $0x40] sm:$0xff]  ;;  %v2601_v1 = vld [vmem:[%s2583_s10 + $0x48] sm:$0xff]  ;;  %v2398_v42 = vmov 0   ;;  %s3163_s21 = scalar_lea.vmem [#allocation10], %s1723_s3 }
  0x6d   : > { %374 = vadd.xlane.f32.xlu0 %v2598_v0  ;;  %v415_v2 = vmul.f32 %v2598_v0, %v2598_v0  ;;  %v416_v3 = vmul.f32 %v2601_v1, %v2601_v1  ;;  %v2610_v4 = vld [vmem:[%s2583_s10 + $0x50] sm:$0xff]  ;;  %v2613_v5 = vld [vmem:[%s2583_s10 + $0x58] sm:$0xff]  ;;  %v2622_v8 = vld [vmem:[%s2583_s10 + $0x60] sm:$0xff]  ;;  %923 = vmatprep.mubr.bf16.mxu1 %v2398_v42  ;;  %s1817_s15 = sshll.u32 %s2463_s28, 11  ;;  %s1611_s19 = sshll.u32 %s3163_s21, 4  ;;  %s3201_s19 = int_to_ptr.vmem [resolvable:$true] %s1611_s19 }
  0x6e   : > { %v417_v6 = vmul.f32 %v2610_v4, %v2610_v4  ;;  %v418_v7 = vmul.f32 %v2613_v5, %v2613_v5  ;;  %v1984_v9 = vld [vmem:[#allocation5 + $0xe4] ss:$16 sps:$4 sm:$0xff]   ;;  %v2625_v10 = vld [vmem:[%s2583_s10 + $0x68] sm:$0xff]  ;;  %v1986_v11 = vld [vmem:[#allocation5 + $0xe0] ss:$16 sps:$4 sm:$0xff]   ;;  %v419_v12 = vmul.f32 %v2622_v8, %v2622_v8  ;;  %883 = vmatprep.mubr.bf16.mxu0 %v2398_v42  ;;  %s3199_s3 = scalar_lea.hbm %s3253_s7, %s1817_s15  ;;  %s1598_s29 = scalar_lea.sflag [#allocation4], %s2577_s23 }
  0x6f   : > { %439 = vadd.xlane.f32.xlu1 %v415_v2  ;;  %1882 = vmatprep.subr.bf16.mxu1 %v1984_v9  ;;  %v1987_v13 = vld [vmem:[#allocation5 + $0xc4] ss:$16 sps:$4 sm:$0xff]   ;;  %v1989_v14 = vld [vmem:[#allocation5 + $0xc0] ss:$16 sps:$4 sm:$0xff]   ;;  %v420_v15 = vmul.f32 %v2625_v10, %v2625_v10  ;;  %v2637_v17 = vld [vmem:[%s2583_s10 + $0x78] sm:$0xff]  ;;  %p3285_p0 = scmp.ne.s32.totalorder %s3265_s20, 0 }
  0x70   : > { %1890 = vmatpush1.bf16.msra.mxu1 %v1986_v11  ;;  %851 = vmatprep.subr.bf16.mxu0 %v1984_v9  ;;  %v2634_v16 = vld [vmem:[%s2583_s10 + $0x70] sm:$0xff]  ;;  %v422_v22 = vmul.f32 %v2637_v17, %v2637_v17  ;;  %v2646_v24 = vld [vmem:[%s2583_s10] sm:$0xff]  ;;  %v2649_v27 = vld [vmem:[%s2583_s10 + $0x8] sm:$0xff]  ;;  %s2399_s28 = smov [#allocation10]  }
  0x71   : > { %376 = vadd.xlane.f32.xlu0 %v2601_v1  ;;  %852 = vmatpush1.bf16.msra.mxu0 %v1986_v11  ;;  %v1990_v18 = vld [vmem:[#allocation5 + $0xa4] ss:$16 sps:$4 sm:$0xff]   ;;  %v1992_v19 = vld [vmem:[#allocation5 + $0xa0] ss:$16 sps:$4 sm:$0xff]   ;;  %v421_v20 = vmul.f32 %v2634_v16, %v2634_v16  ;;  %v407_v28 = vmul.f32 %v2646_v24, %v2646_v24  ;;  %v408_v30 = vmul.f32 %v2649_v27, %v2649_v27  ;;  %v2661_v35 = vld [vmem:[%s2583_s10 + $0x18] sm:$0xff]  ;;  %s2318_s30 = sshll.u32 %s2399_s28, 4  ;;  %s2319_s30 = int_to_ptr.vmem [resolvable:$false] %s2318_s30 }
  0x72   : > { %1883 = vmatprep.subr.bf16.mxu1 %v1987_v13  ;;  %853 = vmatprep.subr.bf16.mxu0 %v1987_v13  ;;  %v1993_v21 = vld [vmem:[#allocation5 + $0x84] ss:$16 sps:$4 sm:$0xff]   ;;  %v1995_v23 = vld [vmem:[#allocation5 + $0x80] ss:$16 sps:$4 sm:$0xff]   ;;  %v410_v38 = vmul.f32 %v2661_v35, %v2661_v35  ;;  %v2010_v41 = vld [vmem:[#allocation5 + $0xec] ss:$16 sps:$4 sm:$0xff]   ;;  %p2321_p1 = scmp.lt.s32.totalorder %s3201_s19, %s2319_s30 }
  0x73   : > { %441 = vadd.xlane.f32.xlu1 %v416_v3  ;;  %v1996_v25 = vld [vmem:[#allocation5 + $0x64] ss:$16 sps:$4 sm:$0xff]   ;;  %v1998_v26 = vld [vmem:[#allocation5 + $0x60] ss:$16 sps:$4 sm:$0xff]   ;;  %v2674_v43 = vld [vmem:[%s2583_s10 + $0x28] sm:$0xff]  ;;  %s2320_s9 = scalar_lea.vmem %s2319_s30, 4096 }
  0x74   : > { %1891 = vmatpush1.bf16.msra.mxu1 %v1989_v14  ;;  %v1999_v29 = vld [vmem:[#allocation5 + $0x44] ss:$16 sps:$4 sm:$0xff]   ;;  %v2001_v31 = vld [vmem:[#allocation5 + $0x40] ss:$16 sps:$4 sm:$0xff]   ;;  %v412_v45 = vmul.f32 %v2674_v43, %v2674_v43  ;;  %v2687_v47 = vld [vmem:[%s2583_s10 + $0x38] sm:$0xff] }
  0x75   : > { %378 = vadd.xlane.f32.xlu0 %v2610_v4  ;;  %854 = vmatpush1.bf16.msra.mxu0 %v1989_v14  ;;  %v2658_v32 = vld [vmem:[%s2583_s10 + $0x10] sm:$0xff]  ;;  %v2670_v40 = vld [vmem:[%s2583_s10 + $0x20] sm:$0xff]  ;;  %v414_v49 = vmul.f32 %v2687_v47, %v2687_v47 }
  0x76   : > { %1884 = vmatprep.subr.bf16.mxu1 %v1990_v18  ;;  %855 = vmatprep.subr.bf16.mxu0 %v1990_v18  ;;  %v2002_v33 = vld [vmem:[#allocation5 + $0x24] ss:$16 sps:$4 sm:$0xff]   ;;  %v2004_v34 = vld [vmem:[#allocation5 + $0x20] ss:$16 sps:$4 sm:$0xff]   ;;  %v409_v36 = vmul.f32 %v2658_v32, %v2658_v32  ;;  %v411_v44 = vmul.f32 %v2670_v40, %v2670_v40 }
  0x77   : > { %380 = vadd.xlane.f32.xlu1 %v2613_v5  ;;  %v2005_v37 = vld [vmem:[#allocation5 + $0x4] ss:$16 sps:$4 sm:$0xff]   ;;  %v2007_v39 = vld [vmem:[#allocation5] ss:$16 sps:$4 sm:$0xff]  }
  0x78   : > { %1892 = vmatpush1.bf16.msra.mxu1 %v1992_v19  ;;  %v2684_v46 = vld [vmem:[%s2583_s10 + $0x30] sm:$0xff]  ;;  %s2314_s10 = scalar_lea.vmem %s3201_s19, 2048 }
  0x79   : > { %443 = vadd.xlane.f32.xlu0 %v417_v6  ;;  %856 = vmatpush1.bf16.msra.mxu0 %v1992_v19  ;;  %v413_v48 = vmul.f32 %v2684_v46, %v2684_v46  ;;  %p2315_p12 = scmp.ne.s32.totalorder %s3201_s19, %s2314_s10  ;;  %p2322_p2 = scmp.lt.s32.totalorder %s2320_s9, %s2314_s10 }
  0x7a   : > { %1885 = vmatprep.subr.bf16.mxu1 %v1993_v21  ;;  %857 = vmatprep.subr.bf16.mxu0 %v1993_v21 }
  0x7b   : > { %445 = vadd.xlane.f32.xlu1 %v418_v7  ;;  %p2316_p5 = pnand %p2315_p12, %p3285_p0  ;;  %p2323_p3 = por %p2322_p2, %p2321_p1 }
  0x7c   : > { %1893 = vmatpush1.bf16.msra.mxu1 %v1995_v23 }
  0x7d   : > { %382 = vadd.xlane.f32.xlu0 %v2622_v8  ;;  %858 = vmatpush1.bf16.msra.mxu0 %v1995_v23  ;;  %p2317_p10 = pneg %p2316_p5 }
  0x7e   : > { %1886 = vmatprep.subr.bf16.mxu1 %v1996_v25  ;;  %859 = vmatprep.subr.bf16.mxu0 %v1996_v25 }
  0x7f   : > { %384 = vadd.xlane.f32.xlu1 %v2625_v10  ;;  %p2324_p9 = pnand %p2323_p3, %p2317_p10 }
  0x80   : > { %1894 = vmatpush1.bf16.msra.mxu1 %v1998_v26 }
  0x81   : > { %447 = vadd.xlane.f32.xlu0 %v419_v12  ;;  %860 = vmatpush1.bf16.msra.mxu0 %v1998_v26 }
  0x82   : > { %1887 = vmatprep.subr.bf16.mxu1 %v1999_v29  ;;  %861 = vmatprep.subr.bf16.mxu0 %v1999_v29 }
  0x83   : > { %449 = vadd.xlane.f32.xlu1 %v420_v15 }
  0x84   : > { %1895 = vmatpush1.bf16.msra.mxu1 %v2001_v31 }
  0x85   : > { %386 = vadd.xlane.f32.xlu0 %v2634_v16  ;;  %862 = vmatpush1.bf16.msra.mxu0 %v2001_v31 }
  0x86   : > { %1888 = vmatprep.subr.bf16.mxu1 %v2002_v33  ;;  %863 = vmatprep.subr.bf16.mxu0 %v2002_v33 }
  0x87   : > { %388 = vadd.xlane.f32.xlu1 %v2637_v17 }
  0x88   : > { %1896 = vmatpush1.bf16.msra.mxu1 %v2004_v34 }
  0x89   : > { %451 = vadd.xlane.f32.xlu0 %v421_v20  ;;  %864 = vmatpush1.bf16.msra.mxu0 %v2004_v34 }
  0x8a   : > { %1889 = vmatprep.subr.bf16.mxu1 %v2005_v37  ;;  %865 = vmatprep.subr.bf16.mxu0 %v2005_v37 }
  0x8b   : > { %453 = vadd.xlane.f32.xlu1 %v422_v22 }
  0x8c   : > { %1897 = vmatpush1.bf16.msra.mxu1 %v2007_v39 }
  0x8d   : > { %358 = vadd.xlane.f32.xlu0 %v2646_v24  ;;  %866 = vmatpush1.bf16.msra.mxu0 %v2007_v39 }
  0x8e   : > { %964 = vmatprep.subr.bf16.mxu1 %v2010_v41 }
  0x8f   : > { %360 = vadd.xlane.f32.xlu1 %v2649_v27 }
  0x91   : > { %423 = vadd.xlane.f32.xlu0 %v407_v28 }
  0x93   : > { %425 = vadd.xlane.f32.xlu1 %v408_v30 }
  0x95   : > { %362 = vadd.xlane.f32.xlu0 %v2658_v32 }
  0x97   : > { %364 = vadd.xlane.f32.xlu1 %v2661_v35 }
  0x99   : > { %427 = vadd.xlane.f32.xlu0 %v409_v36 }
  0x9b   : > { %429 = vadd.xlane.f32.xlu1 %v410_v38 }
  0x9d   : > { %366 = vadd.xlane.f32.xlu0 %v2670_v40 }
  0x9f   : > { %368 = vadd.xlane.f32.xlu1 %v2674_v43 }
  0xa1   : > { %431 = vadd.xlane.f32.xlu0 %v411_v44 }
  0xa3   : > { %433 = vadd.xlane.f32.xlu1 %v412_v45 }
  0xa5   : > { %370 = vadd.xlane.f32.xlu0 %v2684_v46 }
  0xa7   : > { %372 = vadd.xlane.f32.xlu1 %v2687_v47 }
  0xa9   : > { %435 = vadd.xlane.f32.xlu0 %v413_v48 }
  0xab   : > { %437 = vadd.xlane.f32.xlu1 %v414_v49 }
  0xf6   : > { %v375_v50 = vpop.xlane.xlu0 %374 }
  0xf7   : > { %v399_v51 = vmul.f32 0.0078125, %v375_v50 }
  0xf8   : > { %v440_v52 = vpop.xlane.xlu1 %439 }
  0xf9   : > { %v479_v53 = vmul.f32 %v399_v51, %v399_v51  ;;  %v463_v54 = vmul.f32 0.0078125, %v440_v52  ;;  %v527_v45 = vsub.f32 %v2598_v0, %v399_v51 }
  0xfa   : > { %v377_v55 = vpop.xlane.xlu0 %376 }
  0xfb   : > { %v495_v56 = vsub.f32 %v463_v54, %v479_v53  ;;  %v400_v57 = vmul.f32 0.0078125, %v377_v55 }
  0xfc   : > { %v442_v58 = vpop.xlane.xlu1 %441 }
  0xfd   : > { %v511_v59 = vmax.f32 %v495_v56, 0.0  ;;  %v480_v60 = vmul.f32 %v400_v57, %v400_v57  ;;  %v464_v61 = vmul.f32 0.0078125, %v442_v58  ;;  %v528_v55 = vsub.f32 %v2601_v1, %v400_v57 }
  0xfe   : > { %v379_v62 = vpop.xlane.xlu0 %378 }
  0xff   : > { %v543_v63 = vadd.f32 1e-05, %v511_v59  ;;  %v496_v2 = vsub.f32 %v464_v61, %v480_v60  ;;  %v2695_v3 = vmul.f32 0.0078125, %v379_v62  ;;  %v2720_v60 = vld [vmem:[%s3247_s1] ss:$0 sm:$0xff] }
 0x100   : > { %v381_v6 = vpop.xlane.xlu1 %380 }
 0x101   : > { %2048 = vrsqrt.f32 %v543_v63  ;;  %v512_v7 = vmax.f32 %v496_v2, 0.0  ;;  %v481_v9 = vmul.f32 %v2695_v3, %v2695_v3  ;;  %v2699_v11 = vmul.f32 0.0078125, %v381_v6 }
 0x102   : > { %v444_v12 = vpop.xlane.xlu0 %443 }
 0x103   : > { %v544_v13 = vadd.f32 1e-05, %v512_v7  ;;  %v465_v14 = vmul.f32 0.0078125, %v444_v12  ;;  %v482_v18 = vmul.f32 %v2699_v11, %v2699_v11 }
 0x104   : > { %v446_v15 = vpop.xlane.xlu1 %445 }
 0x105   : > { %2050 = vrsqrt.f32 %v544_v13  ;;  %v497_v19 = vsub.f32 %v465_v14, %v481_v9  ;;  %v466_v20 = vmul.f32 0.0078125, %v446_v15  ;;  %v2731_v13 = vld [vmem:[%s3248_s2] ss:$0 sm:$0xff] }
 0x106   : > { %v383_v21 = vpop.xlane.xlu0 %382 }
 0x107   : > { %v513_v22 = vmax.f32 %v497_v19, 0.0  ;;  %v498_v23 = vsub.f32 %v466_v20, %v482_v18  ;;  %v2703_v25 = vmul.f32 0.0078125, %v383_v21 }
 0x108   : > { %v385_v26 = vpop.xlane.xlu1 %384 }
 0x109   : > { %v545_v28 = vadd.f32 1e-05, %v513_v22  ;;  %v514_v29 = vmax.f32 %v498_v23, 0.0  ;;  %v483_v30 = vmul.f32 %v2703_v25, %v2703_v25  ;;  %v2707_v31 = vmul.f32 0.0078125, %v385_v26 }
 0x10a   : > { %v448_v33 = vpop.xlane.xlu0 %447  ;;  %v529_v22 = vsub.f32 %v2610_v4, %v2695_v3 }
 0x10b   : > { %2052 = vrsqrt.f32 %v545_v28  ;;  %v546_v34 = vadd.f32 1e-05, %v514_v29  ;;  %v467_v36 = vmul.f32 0.0078125, %v448_v33  ;;  %v484_v38 = vmul.f32 %v2707_v31, %v2707_v31 }
 0x10c   : > { %v450_v37 = vpop.xlane.xlu1 %449  ;;  %v530_v28 = vsub.f32 %v2613_v5, %v2699_v11 }
 0x10d   : > { %2054 = vrsqrt.f32 %v546_v34  ;;  %v499_v39 = vsub.f32 %v467_v36, %v483_v30  ;;  %v468_v41 = vmul.f32 0.0078125, %v450_v37  ;;  %v2008_v34 = vld [vmem:[#allocation5 + $0xe8] ss:$16 sps:$4 sm:$0xff]  }
 0x10e   : > { %v2049_v44 = vpop.eup %2048  ;;  %v387_v48 = vpop.xlane.xlu0 %386 }
 0x10f   : > { %v515_v49 = vmax.f32 %v499_v39, 0.0  ;;  %v500_v50 = vsub.f32 %v468_v41, %v484_v38  ;;  %v2712_v52 = vmul.f32 0.0078125, %v387_v48  ;;  %v575_v54 = vmul.f32 %v2049_v44, %v527_v45  ;;  %v2013_v41 = vld [vmem:[#allocation5 + $0xcc] ss:$16 sps:$4 sm:$0xff]  }
 0x110   : > { %v389_v53 = vpop.xlane.xlu1 %388 }
 0x111   : > { %v547_v56 = vadd.f32 1e-05, %v515_v49  ;;  %v516_v58 = vmax.f32 %v500_v50, 0.0  ;;  %v485_v59 = vmul.f32 %v2712_v52, %v2712_v52  ;;  %v2722_v51 = vmul.f32 0.0078125, %v389_v53  ;;  %v2011_v53 = vld [vmem:[#allocation5 + $0xc8] ss:$16 sps:$4 sm:$0xff]  }
 0x112   : > { %v2051_v0 = vpop.eup %2050  ;;  %v452_v61 = vpop.xlane.xlu0 %451  ;;  %v598_v6 = vmul.f32 %v2720_v60, %v575_v54 }
 0x113   : > { %2056 = vrsqrt.f32 %v547_v56  ;;  %v548_v62 = vadd.f32 1e-05, %v516_v58  ;;  %v469_v63 = vmul.f32 0.0078125, %v452_v61  ;;  %v576_v2 = vmul.f32 %v2051_v0, %v528_v55  ;;  %v2016_v56 = vld [vmem:[#allocation5 + $0xac] ss:$16 sps:$4 sm:$0xff]  }
 0x114   : > { %v486_v1 = vmul.f32 %v2722_v51, %v2722_v51  ;;  %v454_v57 = vpop.xlane.xlu1 %453  ;;  %v621_v26 = vadd.f32 %v2731_v13, %v598_v6 }
 0x115   : > { %2058 = vrsqrt.f32 %v548_v62  ;;  %v501_v7 = vsub.f32 %v469_v63, %v485_v59  ;;  %v470_v9 = vmul.f32 0.0078125, %v454_v57  ;;  %v599_v12 = vmul.f32 %v2720_v60, %v576_v2 }
 0x116   : > { %v359_v14 = vpop.xlane.xlu0 %358  ;;  %v531_v63 = vsub.f32 %v2622_v8, %v2703_v25  ;;  %v532_v57 = vsub.f32 %v2625_v10, %v2707_v31  ;;  %v2019_v8 = vld [vmem:[#allocation5 + $0x8c] ss:$16 sps:$4 sm:$0xff]  }
 0x117   : > { %v517_v15 = vmax.f32 %v501_v7, 0.0  ;;  %v502_v18 = vsub.f32 %v470_v9, %v486_v1  ;;  %v2733_v19 = vmul.f32 0.0078125, %v359_v14  ;;  %v622_v20 = vadd.f32 %v2731_v13, %v599_v12  ;;  %v2014_v12 = vld [vmem:[#allocation5 + $0xa8] ss:$16 sps:$4 sm:$0xff]  }
 0x118   : > { %v2053_v21 = vpop.eup %2052  ;;  %v361_v23 = vpop.xlane.xlu1 %360 }
 0x119   : > { %v549_v29 = vadd.f32 1e-05, %v517_v15  ;;  %v518_v30 = vmax.f32 %v502_v18, 0.0  ;;  %v471_v33 = vmul.f32 %v2733_v19, %v2733_v19  ;;  %v2743_v37 = vmul.f32 0.0078125, %v361_v23 }
 0x11a   : > { %v2055_v36 = vpop.eup %2054  ;;  %v424_v38 = vpop.xlane.xlu0 %423  ;;  %v2745_v39 = vpack.c.bf16 %v622_v20, %v621_v26  ;;  %v577_v4 = vmul.f32 %v2053_v21, %v529_v22 }
 0x11b   : > { %2060 = vrsqrt.f32 %v549_v29  ;;  %v550_v3 = vadd.f32 1e-05, %v518_v30  ;;  %v455_v44 = vmul.f32 0.0078125, %v424_v38  ;;  %v578_v45 = vmul.f32 %v2055_v36, %v530_v28  ;;  %v2017_v30 = vld [vmem:[#allocation5 + $0x88] ss:$16 sps:$4 sm:$0xff]  }
 0x11c   : > { %v472_v5 = vmul.f32 %v2743_v37, %v2743_v37  ;;  %924 = vmatmul.mubr.bf16.vlgmr.msra.gmra.mxu1 %v2745_v39  ;;  %v426_v11 = vpop.xlane.xlu1 %425  ;;  %v600_v48 = vmul.f32 %v2720_v60, %v577_v4  ;;  %v2022_v36 = vld [vmem:[#allocation5 + $0x6c] ss:$16 sps:$4 sm:$0xff]  }
 0x11d   : > { %2062 = vrsqrt.f32 %v550_v3  ;;  %v487_v49 = vsub.f32 %v455_v44, %v471_v33  ;;  %965 = vmatpush1.bf16.msra.mxu1 %v2008_v34  ;;  %v456_v50 = vmul.f32 0.0078125, %v426_v11  ;;  %933 = vmatprep.mubr.bf16.mxu1 %v2398_v42  ;;  %v601_v54 = vmul.f32 %v2720_v60, %v578_v45 }
 0x11e   : > { %966 = vmatprep.subr.bf16.mxu1 %v2013_v41  ;;  %v363_v55 = vpop.xlane.xlu0 %362  ;;  %v623_v1 = vadd.f32 %v2731_v13, %v600_v48  ;;  %v533_v45 = vsub.f32 %v2634_v16, %v2712_v52  ;;  %v534_v48 = vsub.f32 %v2637_v17, %v2722_v51  ;;  %v2025_v16 = vld [vmem:[#allocation5 + $0x4c] ss:$16 sps:$4 sm:$0xff]  }
 0x11f   : > { %v503_v58 = vmax.f32 %v487_v49, 0.0  ;;  %v488_v59 = vsub.f32 %v456_v50, %v472_v5  ;;  %v2753_v0 = vmul.f32 0.0078125, %v363_v55  ;;  %v624_v61 = vadd.f32 %v2731_v13, %v601_v54  ;;  %v2020_v54 = vld [vmem:[#allocation5 + $0x68] ss:$16 sps:$4 sm:$0xff]  }
 0x120   : > { %v2057_v62 = vpop.eup %2056  ;;  %v365_v2 = vpop.xlane.xlu1 %364 }
 0x121   : > { %v535_v6 = vadd.f32 1e-05, %v503_v58  ;;  %v504_v7 = vmax.f32 %v488_v59, 0.0  ;;  %v473_v9 = vmul.f32 %v2753_v0, %v2753_v0  ;;  %967 = vmatpush1.bf16.msra.mxu1 %v2011_v53  ;;  %v2763_v15 = vmul.f32 0.0078125, %v365_v2 }
 0x122   : > { %v2059_v14 = vpop.eup %2058  ;;  %968 = vmatprep.subr.bf16.mxu1 %v2016_v56  ;;  %v428_v18 = vpop.xlane.xlu0 %427  ;;  %v2765_v20 = vpack.c.bf16 %v624_v61, %v623_v1  ;;  %v579_v25 = vmul.f32 %v2057_v62, %v531_v63 }
 0x123   : > { %2064 = vrsqrt.f32 %v535_v6  ;;  %v536_v21 = vadd.f32 1e-05, %v504_v7  ;;  %v457_v22 = vmul.f32 0.0078125, %v428_v18  ;;  %v580_v10 = vmul.f32 %v2059_v14, %v532_v57  ;;  %v2023_v6 = vld [vmem:[#allocation5 + $0x48] ss:$16 sps:$4 sm:$0xff]  }
 0x124   : > { %v474_v31 = vmul.f32 %v2763_v15, %v2763_v15  ;;  %934 = vmatmul.mubr.bf16.gmra.mxu1 %v2765_v20  ;;  %v430_v23 = vpop.xlane.xlu1 %429  ;;  %v602_v26 = vmul.f32 %v2720_v60, %v579_v25 }
 0x125   : > { %2066 = vrsqrt.f32 %v536_v21  ;;  %v489_v28 = vsub.f32 %v457_v22, %v473_v9  ;;  %969 = vmatpush1.bf16.msra.mxu1 %v2014_v12  ;;  %v458_v29 = vmul.f32 0.0078125, %v430_v23  ;;  %943 = vmatprep.mubr.bf16.mxu1 %v2398_v42  ;;  %v603_v33 = vmul.f32 %v2720_v60, %v580_v10  ;;  %v2028_v12 = vld [vmem:[#allocation5 + $0x2c] ss:$16 sps:$4 sm:$0xff]  }
 0x126   : > { %970 = vmatprep.subr.bf16.mxu1 %v2019_v8  ;;  %v367_v34 = vpop.xlane.xlu0 %366  ;;  %v625_v11 = vadd.f32 %v2731_v13, %v602_v26  ;;  %v519_v22 = vsub.f32 %v2646_v24, %v2733_v19  ;;  %v520_v23 = vsub.f32 %v2649_v27, %v2743_v37  ;;  %v2031_v24 = vld [vmem:[#allocation5 + $0xc] ss:$16 sps:$4 sm:$0xff]  }
 0x127   : > { %v505_v38 = vmax.f32 %v489_v28, 0.0  ;;  %v490_v41 = vsub.f32 %v458_v29, %v474_v31  ;;  %v2773_v4 = vmul.f32 0.0078125, %v367_v34  ;;  %v626_v3 = vadd.f32 %v2731_v13, %v603_v33 }
 0x128   : > { %v2061_v44 = vpop.eup %2060  ;;  %v369_v5 = vpop.xlane.xlu1 %368 }
 0x129   : > { %v537_v49 = vadd.f32 1e-05, %v505_v38  ;;  %v506_v50 = vmax.f32 %v490_v41, 0.0  ;;  %v475_v53 = vmul.f32 %v2773_v4, %v2773_v4  ;;  %971 = vmatpush1.bf16.msra.mxu1 %v2017_v30  ;;  %v2783_v56 = vmul.f32 0.0078125, %v369_v5  ;;  %v2026_v30 = vld [vmem:[#allocation5 + $0x28] ss:$16 sps:$4 sm:$0xff]  }
 0x12a   : > { %v2063_v55 = vpop.eup %2062  ;;  %972 = vmatprep.subr.bf16.mxu1 %v2022_v36  ;;  %v432_v58 = vpop.xlane.xlu0 %431  ;;  %v2785_v59 = vpack.c.bf16 %v626_v3, %v625_v11  ;;  %v581_v52 = vmul.f32 %v2061_v44, %v533_v45 }
 0x12b   : > { %2068 = vrsqrt.f32 %v537_v49  ;;  %v538_v61 = vadd.f32 1e-05, %v506_v50  ;;  %v459_v62 = vmul.f32 0.0078125, %v432_v58  ;;  %v582_v17 = vmul.f32 %v2063_v55, %v534_v48  ;;  %v2029_v48 = vld [vmem:[#allocation5 + $0x8] ss:$16 sps:$4 sm:$0xff]  }
 0x12c   : > { %v476_v51 = vmul.f32 %v2783_v56, %v2783_v56  ;;  %944 = vmatmul.mubr.bf16.gmra.mxu1 %v2785_v59  ;;  %v434_v63 = vpop.xlane.xlu1 %433  ;;  %v604_v2 = vmul.f32 %v2720_v60, %v581_v52  ;;  %v521_v50 = vsub.f32 %v2658_v32, %v2753_v0  ;;  %v522_v52 = vsub.f32 %v2661_v35, %v2763_v15 }
 0x12d   : > { %2070 = vrsqrt.f32 %v538_v61  ;;  %v491_v1 = vsub.f32 %v459_v62, %v475_v53  ;;  %973 = vmatpush1.bf16.msra.mxu1 %v2020_v54  ;;  %v460_v57 = vmul.f32 0.0078125, %v434_v63  ;;  %953 = vmatprep.mubr.bf16.mxu1 %v2398_v42  ;;  %v605_v7 = vmul.f32 %v2720_v60, %v582_v17 }
 0x12e   : > { %974 = vmatprep.subr.bf16.mxu1 %v2025_v16  ;;  %v371_v9 = vpop.xlane.xlu0 %370  ;;  %v627_v31 = vadd.f32 %v2731_v13, %v604_v2  ;;  %v523_v15 = vsub.f32 %v2670_v40, %v2773_v4 }
 0x12f   : > { %v507_v14 = vmax.f32 %v491_v1, 0.0  ;;  %v492_v18 = vsub.f32 %v460_v57, %v476_v51  ;;  %v2793_v8 = vmul.f32 0.0078125, %v371_v9  ;;  %v628_v25 = vadd.f32 %v2731_v13, %v605_v7 }
 0x130   : > { %v2065_v21 = vpop.eup %2064  ;;  %v373_v10 = vpop.xlane.xlu1 %372  ;;  %v524_v7 = vsub.f32 %v2674_v43, %v2783_v56 }
 0x131   : > { %v539_v26 = vadd.f32 1e-05, %v507_v14  ;;  %v508_v28 = vmax.f32 %v492_v18, 0.0  ;;  %v477_v29 = vmul.f32 %v2793_v8, %v2793_v8  ;;  %975 = vmatpush1.bf16.msra.mxu1 %v2023_v6  ;;  %v2803_v34 = vmul.f32 0.0078125, %v373_v10 }
 0x132   : > { %v2067_v33 = vpop.eup %2066  ;;  %976 = vmatprep.subr.bf16.mxu1 %v2028_v12  ;;  %v436_v36 = vpop.xlane.xlu0 %435  ;;  %v2805_v38 = vpack.c.bf16 %v628_v25, %v627_v31  ;;  %v567_v19 = vmul.f32 %v2065_v21, %v519_v22  ;;  %v525_v4 = vsub.f32 %v2684_v46, %v2793_v8 }
 0x133   : > { %2072 = vrsqrt.f32 %v539_v26  ;;  %v540_v41 = vadd.f32 1e-05, %v508_v28  ;;  %v461_v3 = vmul.f32 0.0078125, %v436_v36  ;;  %v568_v27 = vmul.f32 %v2067_v33, %v520_v23  ;;  %v2035_v33 = vld [vmem:[#allocation7 + $0x30] sm:$0xff]   ;;  %v2039_v36 = vld [vmem:[#allocation7 + $0x20] sm:$0xff]  }
 0x134   : > { %v478_v37 = vmul.f32 %v2803_v34, %v2803_v34  ;;  %954 = vmatmul.mubr.bf16.gmra.mxu1 %v2805_v38  ;;  %v438_v44 = vpop.xlane.xlu1 %437  ;;  %v590_v45 = vmul.f32 %v2720_v60, %v567_v19  ;;  %v526_v22 = vsub.f32 %v2687_v47, %v2803_v34  ;;  %v2032_v47 = vld [vmem:[#allocation7 + $0x78] sm:$0xff]   ;;  %v2037_v34 = vld [vmem:[#allocation7 + $0x28] sm:$0xff]  }
 0x135   : > { %2074 = vrsqrt.f32 %v540_v41  ;;  %v493_v5 = vsub.f32 %v461_v3, %v477_v29  ;;  %977 = vmatpush1.bf16.msra.mxu1 %v2026_v30  ;;  %v462_v11 = vmul.f32 0.0078125, %v438_v44  ;;  %996 = vmatprep.mubr.bf16.mxu1 %v2398_v42  ;;  %v591_v49 = vmul.f32 %v2720_v60, %v568_v27  ;;  %v2044_v19 = vld [vmem:[#allocation7 + $0x48] sm:$0xff]   ;;  %v2046_v3 = vld [vmem:[#allocation7 + $0x40] sm:$0xff]  }
 0x136   : > { %978 = vmatprep.subr.bf16.mxu1 %v2031_v24  ;;  %v613_v55 = vadd.f32 %v2731_v13, %v590_v45  ;;  %1818 = vmatprep.subr.bf16.mxu0 %v2032_v47  ;;  %v2043_v24 = vld [vmem:[#allocation7 + $0x10] sm:$0xff]   ;;  %v2045_v41 = vld [vmem:[#allocation7 + $0x8] sm:$0xff]   ;;  %v2047_v27 = vld [vmem:[#allocation7] sm:$0xff]  }
 0x137   : > { %v509_v53 = vmax.f32 %v493_v5, 0.0  ;;  %v494_v54 = vsub.f32 %v462_v11, %v478_v37  ;;  %v614_v58 = vadd.f32 %v2731_v13, %v591_v49 }
 0x138   : > { %v2069_v16 = vpop.eup %2068 }
 0x139   : > { %v541_v61 = vadd.f32 1e-05, %v509_v53  ;;  %v510_v62 = vmax.f32 %v494_v54, 0.0  ;;  %979 = vmatpush1.bf16.msra.mxu1 %v2029_v48  ;;  %v629_v17 = vpack.c.bf16 %v614_v58, %v613_v55  ;;  %v569_v51 = vmul.f32 %v2069_v16, %v521_v50 }
 0x13a   : > { %v2071_v63 = vpop.eup %2070  ;;  %v671_v55 = vlaneseq }
 0x13b   : > { %2076 = vrsqrt.f32 %v541_v61  ;;  %v542_v2 = vadd.f32 1e-05, %v510_v62  ;;  %884 = vmatmul.mubr.bf16.vlgmr.msra.gmra.mxu0 %v629_v17  ;;  %v570_v32 = vmul.f32 %v2071_v63, %v522_v52  ;;  %v592_v0 = vmul.f32 %v2720_v60, %v569_v51  ;;  %v2888_v63 = vld [vmem:[%s3250_s4] sm:$0xf] }
 0x13c   : > { %997 = vmatmul.mubr.bf16.vlgmr.msra.gmra.mxu1 %v629_v17  ;;  %893 = vmatprep.mubr.bf16.mxu0 %v2398_v42  ;;  %v2877_v52 = vshrl.u32 %v671_v55, 7 }
 0x13d   : > { %2078 = vrsqrt.f32 %v542_v2  ;;  %1006 = vmatprep.mubr.bf16.mxu1 %v2398_v42  ;;  %v593_v35 = vmul.f32 %v2720_v60, %v570_v32  ;;  %v615_v1 = vadd.f32 %v2731_v13, %v592_v0 }
 0x13e   : > { %v681_v62 = vsub.s32 2, %v2877_v52  ;;  %v685_v51 = vsub.s32 3, %v2877_v52 }
 0x13f   : > { %v616_v57 = vadd.f32 %v2731_v13, %v593_v35 }
 0x140   : > { %v2073_v6 = vpop.eup %2072  ;;  %v2893_v32 = vrot.slane %v2888_v63, %v681_v62  ;;  %v2898_v35 = vrot.slane %v2888_v63, %v685_v51 }
 0x141   : > { %v630_v9 = vpack.c.bf16 %v616_v57, %v615_v1  ;;  %v571_v12 = vmul.f32 %v2073_v6, %v523_v15 }
 0x142   : > { %v2075_v14 = vpop.eup %2074 }
 0x143   : > { %894 = vmatmul.mubr.bf16.gmra.mxu0 %v630_v9  ;;  %v572_v18 = vmul.f32 %v2075_v14, %v524_v7  ;;  %v594_v25 = vmul.f32 %v2720_v60, %v571_v12 }
 0x144   : > { %1007 = vmatmul.mubr.bf16.gmra.mxu1 %v630_v9  ;;  %903 = vmatprep.mubr.bf16.mxu0 %v2398_v42 }
 0x145   : > { %1016 = vmatprep.mubr.bf16.mxu1 %v2398_v42  ;;  %v595_v40 = vmul.f32 %v2720_v60, %v572_v18  ;;  %v617_v21 = vadd.f32 %v2731_v13, %v594_v25 }
 0x147   : > { %v618_v43 = vadd.f32 %v2731_v13, %v595_v40 }
 0x148   : > { %v2077_v56 = vpop.eup %2076 }
 0x149   : > { %v631_v10 = vpack.c.bf16 %v618_v43, %v617_v21  ;;  %v573_v31 = vmul.f32 %v2077_v56, %v525_v4 }
 0x14a   : > { %v2079_v23 = vpop.eup %2078 }
 0x14b   : > { %904 = vmatmul.mubr.bf16.gmra.mxu0 %v631_v10  ;;  %v574_v26 = vmul.f32 %v2079_v23, %v526_v22  ;;  %v596_v28 = vmul.f32 %v2720_v60, %v573_v31 }
 0x14c   : > { %1017 = vmatmul.mubr.bf16.gmra.mxu1 %v631_v10  ;;  %913 = vmatprep.mubr.bf16.mxu0 %v2398_v42 }
 0x14d   : > { %1026 = vmatprep.mubr.bf16.mxu1 %v2398_v42  ;;  %v597_v46 = vmul.f32 %v2720_v60, %v574_v26  ;;  %v619_v8 = vadd.f32 %v2731_v13, %v596_v28  ;;  %v2033_v60 = vld [vmem:[#allocation7 + $0x38] sm:$0xff]  }
 0x14e   : > { %1819 = vmatpush3.bf16.msra.mxu0 %v2033_v60 }
 0x14f   : > { %v620_v29 = vadd.f32 %v2731_v13, %v597_v46  ;;  %v2034_v13 = vld [vmem:[#allocation7 + $0x70] sm:$0xff]  }
 0x150   : > { %1820 = vmatprep.subr.bf16.mxu0 %v2034_v13 }
 0x151   : > { %v632_v30 = vpack.c.bf16 %v620_v29, %v619_v8 }
 0x152   : > { %1821 = vmatpush3.bf16.msra.mxu0 %v2035_v33 }
 0x153   : > { %914 = vmatmul.mubr.bf16.gmra.mxu0 %v632_v30 }
 0x154   : > { %1027 = vmatmul.mubr.bf16.gmra.mxu1 %v632_v30 }
 0x155   : > { %1036 = vmatprep.mubr.bf16.mxu1 %v2398_v42 }
 0x15c   : > { %1037 = vmatmul.mubr.bf16.gmra.mxu1 %v2745_v39  ;;  %v2036_v39 = vld [vmem:[#allocation7 + $0x68] sm:$0xff]  }
 0x15d   : > { %1046 = vmatprep.mubr.bf16.mxu1 %v2398_v42  ;;  %1822 = vmatprep.subr.bf16.mxu0 %v2036_v39 }
 0x15e   : > { %1823 = vmatpush3.bf16.msra.mxu0 %v2037_v34 }
 0x164   : > { %1047 = vmatmul.mubr.bf16.gmra.mxu1 %v2765_v20  ;;  %v2038_v20 = vld [vmem:[#allocation7 + $0x60] sm:$0xff]  }
 0x165   : > { %1056 = vmatprep.mubr.bf16.mxu1 %v2398_v42  ;;  %1824 = vmatprep.subr.bf16.mxu0 %v2038_v20 }
 0x166   : > { %1825 = vmatpush3.bf16.msra.mxu0 %v2039_v36 }
 0x16c   : > { %1057 = vmatmul.mubr.bf16.gmra.mxu1 %v2785_v59  ;;  %v2040_v59 = vld [vmem:[#allocation7 + $0x58] sm:$0xff]  }
 0x16d   : > { %1066 = vmatprep.mubr.bf16.mxu1 %v2398_v42  ;;  %v2041_v42 = vld [vmem:[#allocation7 + $0x18] sm:$0xff]   ;;  %1826 = vmatprep.subr.bf16.mxu0 %v2040_v59 }
 0x16e   : > { %1827 = vmatpush3.bf16.msra.mxu0 %v2041_v42 }
 0x174   : > { %1067 = vmatmul.mubr.bf16.gmra.mxu1 %v2805_v38  ;;  %v2042_v38 = vld [vmem:[#allocation7 + $0x50] sm:$0xff]  }
 0x175   : > { %1828 = vmatprep.subr.bf16.mxu0 %v2042_v38 }
 0x176   : > { %1829 = vmatpush3.bf16.msra.mxu0 %v2043_v24 }
 0x177   : > { %1830 = vmatprep.subr.bf16.mxu0 %v2044_v19 }
 0x17a   : > { %1831 = vmatpush3.bf16.msra.mxu0 %v2045_v41 }
 0x17b   : > { %1832 = vmatprep.subr.bf16.mxu0 %v2046_v3 }
 0x17e   : > { %1833 = vmatpush3.bf16.msra.mxu0 %v2047_v27 }
 0x1dc   : > { %v2853_v37 = vpop.f32.mrf.mxu1 }
 0x1de   : > { %v2855_v44 = vpop.f32.mrf.mxu1 }
 0x1e0   : > { %v2857_v45 = vpop.f32.mrf.mxu1 }
 0x1e2   : > { %v2859_v5 = vpop.f32.mrf.mxu1 }
 0x1e4   : > { %v2861_v11 = vpop.f32.mrf.mxu1 }
 0x1e6   : > { %v2863_v48 = vpop.f32.mrf.mxu1 }
 0x1e8   : > { %v2865_v49 = vpop.f32.mrf.mxu1 }
 0x1ea   : > { %v2867_v50 = vpop.f32.mrf.mxu1 }
 0x1ec   : > { %v2869_v53 = vpop.f32.mrf.mxu1 }
 0x1ee   : > { %v2871_v54 = vpop.f32.mrf.mxu1 }
 0x1ef   : > { %3273 = vst [vmem:[#allocation15_spill] sm:$0xff] %v2871_v54 }
 0x1f0   : > { %v2873_v58 = vpop.f32.mrf.mxu1 }
 0x1f2   : > { %v2875_v16 = vpop.f32.mrf.mxu1 }
 0x1f3   : > { %3274 = vst [vmem:[#allocation16_spill] sm:$0xff] %v2875_v16 }
 0x1f4   : > { %v2879_v61 = vpop.f32.mrf.mxu1 }
 0x1f5   : > { %3275 = vst [vmem:[#allocation17_spill] sm:$0xff] %v2879_v61 }
 0x1f6   : > { %v2882_v17 = vpop.f32.mrf.mxu1 }
 0x1f7   : > { %3276 = vst [vmem:[#allocation18_spill] sm:$0xff] %v2882_v17 }
 0x1f8   : > { %v2890_v2 = vpop.f32.mrf.mxu1 }
 0x1f9   : > { %3277 = vst [vmem:[#allocation19_spill] sm:$0xff] %v2890_v2 }
 0x1fa   : > { %v2895_v0 = vpop.f32.mrf.mxu1 }
 0x1fb   : > { %3278 = vst [vmem:[#allocation20_spill] sm:$0xff] %v2895_v0  ;;  %v2903_v6 = vpop.f32.mrf.mxu0 }
 0x1fc   : > { %v998_v15 = vpop.f32.mrf.mxu1 }
 0x1fd   : > { %v2901_v1 = vadd.f32 %v998_v15, %v2893_v32  ;;  %v2913_v40 = vpop.f32.mrf.mxu0 }
 0x1fe   : > { %v1000_v57 = vpop.f32.mrf.mxu1 }
 0x1ff   : > { %v1762_v7 = vmul.f32 -1.442695, %v2901_v1  ;;  %v2907_v9 = vadd.f32 %v1000_v57, %v2898_v35  ;;  %v2923_v31 = vpop.f32.mrf.mxu0 }
 0x200   : > { %v1002_v12 = vpop.f32.mrf.mxu1 }
 0x201   : > { %2080 = vpow2.f32 %v1762_v7  ;;  %v1763_v14 = vmul.f32 -1.442695, %v2907_v9  ;;  %v2911_v18 = vadd.f32 %v1002_v12, %v2893_v32  ;;  %v2933_v30 = vpop.f32.mrf.mxu0 }
 0x202   : > { %v1004_v25 = vpop.f32.mrf.mxu1 }
 0x203   : > { %2082 = vpow2.f32 %v1763_v14  ;;  %v1764_v4 = vmul.f32 -1.442695, %v2911_v18  ;;  %v2917_v21 = vadd.f32 %v1004_v25, %v2898_v35  ;;  %v2943_v59 = vpop.f32.mrf.mxu0 }
 0x204   : > { %v1008_v43 = vpop.f32.mrf.mxu1 }
 0x205   : > { %2084 = vpow2.f32 %v1764_v4  ;;  %v1765_v56 = vmul.f32 -1.442695, %v2917_v21  ;;  %v2921_v22 = vadd.f32 %v1008_v43, %v2893_v32  ;;  %v2953_v15 = vpop.f32.mrf.mxu0 }
 0x206   : > { %v1010_v10 = vpop.f32.mrf.mxu1 }
 0x207   : > { %2086 = vpow2.f32 %v1765_v56  ;;  %v1766_v23 = vmul.f32 -1.442695, %v2921_v22  ;;  %v2927_v26 = vadd.f32 %v1010_v10, %v2898_v35 }
 0x208   : > { %v1012_v28 = vpop.f32.mrf.mxu1 }
 0x209   : > { %2088 = vpow2.f32 %v1766_v23  ;;  %v1767_v46 = vmul.f32 -1.442695, %v2927_v26  ;;  %v2931_v8 = vadd.f32 %v1012_v28, %v2893_v32  ;;  %v2963_v28 = vpop.f32.mrf.mxu0 }
 0x20a   : > { %v1014_v29 = vpop.f32.mrf.mxu1 }
 0x20b   : > { %2090 = vpow2.f32 %v1767_v46  ;;  %v1768_v47 = vmul.f32 -1.442695, %v2931_v8  ;;  %v2937_v60 = vadd.f32 %v1014_v29, %v2898_v35 }
 0x20c   : > { %v1018_v13 = vpop.f32.mrf.mxu1 }
 0x20d   : > { %2092 = vpow2.f32 %v1768_v47  ;;  %v1769_v33 = vmul.f32 -1.442695, %v2937_v60  ;;  %v2941_v39 = vadd.f32 %v1018_v13, %v2893_v32 }
 0x20e   : > { %v2081_v34 = vpop.eup %2080  ;;  %v1020_v20 = vpop.f32.mrf.mxu1 }
 0x20f   : > { %v1173_v36 = vadd.f32 1.0, %v2081_v34  ;;  %2094 = vpow2.f32 %v1769_v33  ;;  %v1770_v42 = vmul.f32 -1.442695, %v2941_v39  ;;  %v2947_v38 = vadd.f32 %v1020_v20, %v2898_v35 }
 0x210   : > { %v2083_v24 = vpop.eup %2082  ;;  %v1022_v19 = vpop.f32.mrf.mxu1 }
 0x211   : > { %2096 = vrcp.f32 %v1173_v36  ;;  %v1174_v41 = vadd.f32 1.0, %v2083_v24  ;;  %v1771_v3 = vmul.f32 -1.442695, %v2947_v38  ;;  %v2951_v27 = vadd.f32 %v1022_v19, %v2893_v32 }
 0x212   : > { %v2085_v55 = vpop.eup %2084  ;;  %2098 = vpow2.f32 %v1770_v42  ;;  %v1024_v62 = vpop.f32.mrf.mxu1  ;;  %v673_v42 = vsub.s32 0, %v2877_v52  ;;  %v677_v24 = vsub.s32 1, %v2877_v52 }
 0x213   : > { %2100 = vrcp.f32 %v1174_v41  ;;  %v1175_v51 = vadd.f32 1.0, %v2085_v55  ;;  %v1772_v57 = vmul.f32 -1.442695, %v2951_v27  ;;  %v2957_v7 = vadd.f32 %v1024_v62, %v2898_v35 }
 0x214   : > { %v2087_v12 = vpop.eup %2086  ;;  %2102 = vpow2.f32 %v1771_v3  ;;  %v1028_v14 = vpop.f32.mrf.mxu1 }
 0x215   : > { %2104 = vrcp.f32 %v1175_v51  ;;  %v1176_v25 = vadd.f32 1.0, %v2087_v12  ;;  %v1773_v4 = vmul.f32 -1.442695, %v2957_v7  ;;  %v2961_v43 = vadd.f32 %v1028_v14, %v2893_v32  ;;  %v901_v3 = vpop.f32.mrf.mxu0 }
 0x216   : > { %v2089_v56 = vpop.eup %2088  ;;  %2106 = vpow2.f32 %v1772_v57  ;;  %v1030_v10 = vpop.f32.mrf.mxu1 }
 0x217   : > { %2108 = vrcp.f32 %v1176_v25  ;;  %v1177_v23 = vadd.f32 1.0, %v2089_v56  ;;  %v1774_v46 = vmul.f32 -1.442695, %v2961_v43  ;;  %v2967_v29 = vadd.f32 %v1030_v10, %v2898_v35 }
 0x218   : > { %v2091_v47 = vpop.eup %2090  ;;  %2110 = vpow2.f32 %v1773_v4  ;;  %v1032_v13 = vpop.f32.mrf.mxu1  ;;  %v2984_v4 = vrot.slane %v2888_v63, %v673_v42  ;;  %v2987_v56 = vrot.slane %v2888_v63, %v677_v24 }
 0x219   : > { %2112 = vrcp.f32 %v1177_v23  ;;  %v1178_v33 = vadd.f32 1.0, %v2091_v47  ;;  %v1775_v34 = vmul.f32 -1.442695, %v2967_v29  ;;  %v2971_v20 = vadd.f32 %v1032_v13, %v2893_v32 }
 0x21a   : > { %v2093_v36 = vpop.eup %2092  ;;  %2114 = vpow2.f32 %v1774_v46  ;;  %v1034_v19 = vpop.f32.mrf.mxu1 }
 0x21b   : > { %2116 = vrcp.f32 %v1178_v33  ;;  %v1179_v41 = vadd.f32 1.0, %v2093_v36  ;;  %v1776_v55 = vmul.f32 -1.442695, %v2971_v20  ;;  %v2977_v62 = vadd.f32 %v1034_v19, %v2898_v35  ;;  %v2989_v46 = vpop.f32.mrf.mxu0 }
 0x21c   : > { %v2095_v51 = vpop.eup %2094  ;;  %2118 = vpow2.f32 %v1775_v34  ;;  %v1038_v57 = vpop.f32.mrf.mxu1  ;;  %v886_v34 = vadd.f32 %v2903_v6, %v2984_v4  ;;  %v888_v36 = vadd.f32 %v2913_v40, %v2987_v56  ;;  %v890_v19 = vadd.f32 %v2923_v31, %v2984_v4 }
 0x21d   : > { %2120 = vrcp.f32 %v1179_v41  ;;  %v1180_v12 = vadd.f32 1.0, %v2095_v51  ;;  %v1777_v14 = vmul.f32 -1.442695, %v2977_v62  ;;  %v2981_v25 = vadd.f32 %v1038_v57, %v2893_v32 }
 0x21e   : > { %v2097_v52 = vpop.eup %2096  ;;  %2122 = vpow2.f32 %v1776_v55  ;;  %v1040_v10 = vpop.f32.mrf.mxu1  ;;  %v892_v41 = vadd.f32 %v2933_v30, %v2987_v56  ;;  %v3006_v6 = vadd.f32 %v2943_v59, %v2984_v4  ;;  %v898_v59 = vadd.f32 %v2953_v15, %v2987_v56 }
 0x21f   : > { %v2099_v23 = vpop.eup %2098  ;;  %2124 = vrcp.f32 %v1180_v12  ;;  %v1778_v47 = vmul.f32 -1.442695, %v2981_v25  ;;  %v2993_v13 = vadd.f32 %v1040_v10, %v2898_v35  ;;  %v3013_v30 = vpop.f32.mrf.mxu0  ;;  %v902_v15 = vadd.f32 %v901_v3, %v2987_v56 }
 0x220   : > { %v2101_v33 = vpop.eup %2100  ;;  %v1181_v63 = vadd.f32 1.0, %v2099_v23  ;;  %2126 = vpow2.f32 %v1777_v14  ;;  %v1042_v42 = vpop.f32.mrf.mxu1 }
 0x221   : > { %v2103_v24 = vpop.eup %2102  ;;  %2128 = vpow2.f32 %v1778_v47  ;;  %v1779_v55 = vmul.f32 -1.442695, %v2993_v13  ;;  %v3009_v57 = vadd.f32 %v1042_v42, %v2893_v32  ;;  %v1270_v31 = vmul.f32 %v2101_v33, %v2907_v9 }
 0x222   : > { %v2105_v51 = vpop.eup %2104  ;;  %2130 = vrcp.f32 %v1181_v63  ;;  %v1182_v40 = vadd.f32 1.0, %v2103_v24  ;;  %v1044_v12 = vpop.f32.mrf.mxu1  ;;  %v1269_v9 = vmul.f32 %v2097_v52, %v2901_v1 }
 0x223   : > { %v2107_v14 = vpop.eup %2106  ;;  %v1271_v10 = vmul.f32 %v2105_v51, %v2911_v18  ;;  %2132 = vpow2.f32 %v1779_v55  ;;  %v3016_v23 = vadd.f32 %v1044_v12, %v2898_v35  ;;  %v1780_v42 = vmul.f32 -1.442695, %v3009_v57  ;;  %v909_v52 = vpop.f32.mrf.mxu0 }
 0x224   : > { %v2109_v47 = vpop.eup %2108  ;;  %2134 = vrcp.f32 %v1182_v40  ;;  %v1183_v63 = vadd.f32 1.0, %v2107_v14  ;;  %v1048_v24 = vpop.f32.mrf.mxu1  ;;  %v900_v12 = vadd.f32 %v2963_v28, %v2984_v4  ;;  %v1302_v2 = vmul.f32 %v1270_v31, %v888_v36 }
 0x225   : > { %v2111_v0 = vpop.eup %2110  ;;  %v1272_v18 = vmul.f32 %v2109_v47, %v2917_v21  ;;  %v1781_v33 = vmul.f32 -1.442695, %v3016_v23  ;;  %v3025_v55 = vadd.f32 %v1048_v24, %v2893_v32  ;;  %v1303_v61 = vmul.f32 %v1271_v10, %v890_v19 }
 0x226   : > { %v2113_v51 = vpop.eup %2112  ;;  %2136 = vrcp.f32 %v1183_v63  ;;  %v1184_v40 = vadd.f32 1.0, %v2111_v0  ;;  %v1050_v14 = vpop.f32.mrf.mxu1  ;;  %v1301_v3 = vmul.f32 %v1269_v9, %v886_v34 }
 0x227   : > { %v2115_v17 = vpop.eup %2114  ;;  %v1304_v1 = vmul.f32 %v1272_v18, %v892_v41  ;;  %2138 = vpow2.f32 %v1780_v42  ;;  %v1782_v24 = vmul.f32 -1.442695, %v3025_v55  ;;  %v3032_v16 = vadd.f32 %v1050_v14, %v2898_v35 }
 0x228   : > { %v2117_v21 = vpop.eup %2116  ;;  %2140 = vrcp.f32 %v1184_v40  ;;  %v1185_v47 = vadd.f32 1.0, %v2115_v17  ;;  %v1052_v28 = vpop.f32.mrf.mxu1  ;;  %v1333_v42 = vpack.c.bf16 %v1303_v61, %v1301_v3  ;;  %v1273_v9 = vmul.f32 %v2113_v51, %v2921_v22 }
 0x229   : > { %v2119_v54 = vpop.eup %2118  ;;  %v1274_v0 = vmul.f32 %v2117_v21, %v2927_v26  ;;  %2142 = vpow2.f32 %v1781_v33  ;;  %v3036_v36 = vadd.f32 %v1052_v28, %v2893_v32  ;;  %v1783_v31 = vmul.f32 -1.442695, %v3032_v16  ;;  %v3040_v40 = vpop.f32.mrf.mxu0 }
 0x22a   : > { %v2121_v19 = vpop.eup %2120  ;;  %2144 = vrcp.f32 %v1185_v47  ;;  %v1186_v41 = vadd.f32 1.0, %v2119_v54  ;;  %v1054_v17 = vpop.f32.mrf.mxu1  ;;  %v1334_v10 = vpack.c.bf16 %v1304_v1, %v1302_v2 }
 0x22b   : > { %v2123_v63 = vpop.eup %2122  ;;  %v1275_v18 = vmul.f32 %v2121_v19, %v2931_v8  ;;  %2146 = vpow2.f32 %v1782_v24  ;;  %v1784_v26 = vmul.f32 -1.442695, %v3036_v36  ;;  %v3045_v54 = vadd.f32 %v1054_v17, %v2898_v35 }
 0x22c   : > { %v2125_v34 = vpop.eup %2124  ;;  %2148 = vrcp.f32 %v1186_v41  ;;  %v1187_v33 = vadd.f32 1.0, %v2123_v63  ;;  %1516 = vmatprep.mubr.bf16.mxu0 %v1334_v10  ;;  %v1058_v14 = vpop.f32.mrf.mxu1  ;;  %v3050_v8 = vadd.f32 %v2989_v46, %v2984_v4  ;;  %v1306_v51 = vmul.f32 %v1274_v0, %v898_v59 }
 0x22d   : > { %v2127_v2 = vpop.eup %2126  ;;  %v1276_v61 = vmul.f32 %v2125_v34, %v2937_v60  ;;  %2150 = vpow2.f32 %v1783_v31  ;;  %v3053_v1 = vadd.f32 %v1058_v14, %v2893_v32  ;;  %1517 = vmatmul.mubr.bf16.vlgmr.msra.gmra.mxu0 %v1333_v42  ;;  %v1785_v47 = vmul.f32 -1.442695, %v3045_v54  ;;  %v3056_v60 = vpop.f32.mrf.mxu0 }
 0x22e   : > { %v2129_v22 = vpop.eup %2128  ;;  %2152 = vrcp.f32 %v1187_v33  ;;  %v1188_v21 = vadd.f32 1.0, %v2127_v2  ;;  %v1060_v24 = vpop.f32.mrf.mxu1  ;;  %v1307_v3 = vmul.f32 %v1275_v18, %v900_v12  ;;  %v1305_v31 = vmul.f32 %v1273_v9, %v3006_v6 }
 0x22f   : > { %v2131_v28 = vpop.eup %2130  ;;  %v1308_v19 = vmul.f32 %v1276_v61, %v902_v15  ;;  %v1189_v41 = vadd.f32 1.0, %v2129_v22  ;;  %2154 = vpow2.f32 %v1784_v26  ;;  %v1786_v17 = vmul.f32 -1.442695, %v3053_v1  ;;  %v3070_v9 = vpop.f32.mrf.mxu0 }
 0x230   : > { %v2133_v46 = vpop.eup %2132  ;;  %2156 = vrcp.f32 %v1188_v21  ;;  %v3061_v59 = vadd.f32 %v1060_v24, %v2898_v35  ;;  %v1062_v0 = vpop.f32.mrf.mxu1  ;;  %v908_v42 = vadd.f32 %v3013_v30, %v2987_v56  ;;  %v910_v18 = vadd.f32 %v909_v52, %v2984_v4 }
 0x231   : > { %v2135_v10 = vpop.eup %2134  ;;  %2158 = vrcp.f32 %v1189_v41  ;;  %v1190_v63 = vadd.f32 1.0, %v2133_v46  ;;  %v3064_v12 = vadd.f32 %v1062_v0, %v2893_v32  ;;  %v1336_v15 = vpack.c.bf16 %v1308_v19, %v1306_v51  ;;  %v919_v46 = vpop.f32.mrf.mxu0 }
 0x232   : > { %2160 = vpow2.f32 %v1785_v47  ;;  %v1787_v6 = vmul.f32 -1.442695, %v3061_v59  ;;  %v1064_v26 = vpop.f32.mrf.mxu1  ;;  %v1335_v2 = vpack.c.bf16 %v1307_v3, %v1305_v31  ;;  %v1277_v30 = vmul.f32 %v2131_v28, %v2941_v39 }
 0x233   : > { %v2137_v34 = vpop.eup %2136  ;;  %2162 = vrcp.f32 %v1190_v63  ;;  %v1788_v33 = vmul.f32 -1.442695, %v3064_v12  ;;  %v3074_v14 = vadd.f32 %v1064_v26, %v2898_v35  ;;  %1524 = vmatprep.mubr.bf16.mxu0 %v1336_v15  ;;  %v1278_v52 = vmul.f32 %v2135_v10, %v2947_v38 }
 0x234   : > { %v2139_v61 = vpop.eup %2138  ;;  %v1279_v22 = vmul.f32 %v2137_v34, %v2951_v27  ;;  %2164 = vpow2.f32 %v1786_v17  ;;  %v1068_v51 = vpop.f32.mrf.mxu1  ;;  %v912_v39 = vadd.f32 %v3040_v40, %v2987_v56  ;;  %v1309_v63 = vmul.f32 %v1277_v30, %v3050_v8 }
 0x235   : > { %v2141_v21 = vpop.eup %2140  ;;  %v1191_v47 = vadd.f32 1.0, %v2139_v61  ;;  %2166 = vpow2.f32 %v1787_v6  ;;  %v1789_v24 = vmul.f32 -1.442695, %v3074_v14  ;;  %v3081_v19 = vadd.f32 %v1068_v51, %v2893_v32  ;;  %1525 = vmatmul.mubr.bf16.gmra.mxu0 %v1335_v2 }
 0x236   : > { %v2143_v41 = vpop.eup %2142  ;;  %v1311_v3 = vmul.f32 %v1279_v22, %v910_v18  ;;  %v1280_v38 = vmul.f32 %v2141_v21, %v2957_v7  ;;  %2168 = vpow2.f32 %v1788_v33  ;;  %v1070_v27 = vpop.f32.mrf.mxu1  ;;  %v1310_v15 = vmul.f32 %v1278_v52, %v908_v42 }
 0x237   : > { %v2145_v28 = vpop.eup %2144  ;;  %2170 = vrcp.f32 %v1191_v47  ;;  %v1192_v31 = vadd.f32 1.0, %v2143_v41  ;;  %v1790_v17 = vmul.f32 -1.442695, %v3081_v19  ;;  %v3088_v0 = vadd.f32 %v1070_v27, %v2898_v35  ;;  %v921_v21 = vpop.f32.mrf.mxu0 }
 0x238   : > { %v2147_v10 = vpop.eup %2146  ;;  %v1312_v18 = vmul.f32 %v1280_v38, %v912_v39  ;;  %2172 = vpow2.f32 %v1789_v24  ;;  %v1072_v40 = vpop.f32.mrf.mxu1  ;;  %v1337_v22 = vpack.c.bf16 %v1311_v3, %v1309_v63  ;;  %v1281_v3 = vmul.f32 %v2145_v28, %v2961_v43 }
 0x239   : > { %v2149_v6 = vpop.eup %2148  ;;  %2174 = vrcp.f32 %v1192_v31  ;;  %v1193_v7 = vadd.f32 1.0, %v2147_v10  ;;  %v1791_v26 = vmul.f32 -1.442695, %v3088_v0  ;;  %v3093_v34 = vadd.f32 %v1072_v40, %v2893_v32 }
 0x23a   : > { %v2151_v33 = vpop.eup %2150  ;;  %2176 = vpow2.f32 %v1790_v17  ;;  %v1074_v2 = vpop.f32.mrf.mxu1  ;;  %v1338_v61 = vpack.c.bf16 %v1312_v18, %v1310_v15  ;;  %v1282_v47 = vmul.f32 %v2149_v6, %v2967_v29  ;;  %v920_v32 = vadd.f32 %v919_v46, %v2984_v4 }
 0x23b   : > { %v2153_v51 = vpop.eup %2152  ;;  %2178 = vrcp.f32 %v1193_v7  ;;  %v1194_v8 = vadd.f32 1.0, %v2151_v33  ;;  %v1792_v42 = vmul.f32 -1.442695, %v3093_v34  ;;  %v3097_v30 = vadd.f32 %v1074_v2, %v2898_v35 }
 0x23c   : > { %v2155_v52 = vpop.eup %2154  ;;  %v1283_v24 = vmul.f32 %v2153_v51, %v2971_v20  ;;  %2180 = vpow2.f32 %v1791_v26  ;;  %1532 = vmatprep.mubr.bf16.mxu0 %v1338_v61  ;;  %v918_v35 = vadd.f32 %v3070_v9, %v2987_v56  ;;  %v922_v29 = vadd.f32 %v921_v21, %v2987_v56 }
 0x23d   : > { %v2157_v41 = vpop.eup %2156  ;;  %2182 = vrcp.f32 %v1194_v8  ;;  %v1195_v39 = vadd.f32 1.0, %v2155_v52  ;;  %v1793_v38 = vmul.f32 -1.442695, %v3097_v30  ;;  %1533 = vmatmul.mubr.bf16.gmra.mxu0 %v1337_v22  ;;  %v916_v31 = vadd.f32 %v3056_v60, %v2984_v4 }
 0x23e   : > { %v2159_v27 = vpop.eup %2158  ;;  %v1284_v46 = vmul.f32 %v2157_v41, %v2977_v62  ;;  %2184 = vpow2.f32 %v1792_v42  ;;  %v1315_v17 = vmul.f32 %v1283_v24, %v920_v32  ;;  %v1314_v28 = vmul.f32 %v1282_v47, %v918_v35 }
 0x23f   : > { %v2161_v20 = vpop.eup %2160  ;;  %2186 = vrcp.f32 %v1195_v39  ;;  %v1313_v18 = vmul.f32 %v1281_v3, %v916_v31  ;;  %v1285_v62 = vmul.f32 %v2159_v27, %v2981_v25  ;;  %v926_v60 = vadd.f32 %v2853_v37, %v2984_v4 }
 0x240   : > { %v2163_v43 = vpop.eup %2162  ;;  %v1316_v10 = vmul.f32 %v1284_v46, %v922_v29  ;;  %v1196_v63 = vadd.f32 1.0, %v2161_v20  ;;  %2188 = vpow2.f32 %v1793_v38  ;;  %v930_v51 = vadd.f32 %v2857_v45, %v2984_v4 }
 0x241   : > { %v2165_v15 = vpop.eup %2164  ;;  %v1339_v33 = vpack.c.bf16 %v1315_v17, %v1313_v18  ;;  %v1286_v21 = vmul.f32 %v2163_v43, %v2993_v13  ;;  %v928_v42 = vadd.f32 %v2855_v44, %v2987_v56  ;;  %v932_v47 = vadd.f32 %v2859_v5, %v2987_v56 }
 0x242   : > { %v2167_v40 = vpop.eup %2166  ;;  %2190 = vrcp.f32 %v1196_v63  ;;  %v1197_v9 = vadd.f32 1.0, %v2165_v15  ;;  %v1340_v6 = vpack.c.bf16 %v1316_v10, %v1314_v28  ;;  %v1317_v32 = vmul.f32 %v1285_v62, %v926_v60  ;;  %v3279_v60 = vld [vmem:[#allocation15_spill] sm:$0xff] }
 0x243   : > { %v2169_v7 = vpop.eup %2168  ;;  %v1198_v26 = vadd.f32 1.0, %v2167_v40  ;;  %v1318_v3 = vmul.f32 %v1286_v21, %v928_v42  ;;  %v940_v17 = vadd.f32 %v2865_v49, %v2984_v4  ;;  %v938_v18 = vadd.f32 %v2863_v48, %v2987_v56 }
 0x244   : > { %v2171_v2 = vpop.eup %2170  ;;  %2192 = vrcp.f32 %v1197_v9  ;;  %v1199_v61 = vadd.f32 1.0, %v2169_v7  ;;  %1540 = vmatprep.mubr.bf16.mxu0 %v1340_v6  ;;  %v950_v48 = vadd.f32 %v2873_v58, %v2984_v4 }
 0x245   : > { %v2173_v22 = vpop.eup %2172  ;;  %v1287_v8 = vmul.f32 %v2171_v2, %v3009_v57  ;;  %2194 = vrcp.f32 %v1198_v26  ;;  %1541 = vmatmul.mubr.bf16.gmra.mxu0 %v1339_v33  ;;  %v946_v26 = vadd.f32 %v2869_v53, %v2984_v4 }
 0x246   : > { %v2175_v25 = vpop.eup %2174  ;;  %2196 = vrcp.f32 %v1199_v61  ;;  %v1200_v52 = vadd.f32 1.0, %v2173_v22  ;;  %v948_v61 = vadd.f32 %v3279_v60, %v2987_v56  ;;  %v3280_v22 = vld [vmem:[#allocation16_spill] sm:$0xff] }
 0x247   : > { %v2177_v37 = vpop.eup %2176  ;;  %v1319_v24 = vmul.f32 %v1287_v8, %v930_v51  ;;  %v1288_v45 = vmul.f32 %v2175_v25, %v3016_v23  ;;  %v936_v23 = vadd.f32 %v2861_v11, %v2984_v4  ;;  %v942_v11 = vadd.f32 %v2867_v50, %v2987_v56 }
 0x248   : > { %v2179_v41 = vpop.eup %2178  ;;  %2198 = vrcp.f32 %v1200_v52  ;;  %v1201_v13 = vadd.f32 1.0, %v2177_v37  ;;  %v952_v51 = vadd.f32 %v3280_v22, %v2987_v56 }
 0x249   : > { %v2181_v57 = vpop.eup %2180  ;;  %v1320_v39 = vmul.f32 %v1288_v45, %v932_v47  ;;  %v1341_v38 = vpack.c.bf16 %v1319_v24, %v1317_v32  ;;  %v1289_v29 = vmul.f32 %v2179_v41, %v3025_v55  ;;  %v3281_v47 = vld [vmem:[#allocation17_spill] sm:$0xff]  ;;  %v3282_v24 = vld [vmem:[#allocation19_spill] sm:$0xff] }
 0x24a   : > { %v2183_v27 = vpop.eup %2182  ;;  %2200 = vrcp.f32 %v1201_v13  ;;  %v1202_v44 = vadd.f32 1.0, %v2181_v57  ;;  %v956_v32 = vadd.f32 %v3281_v47, %v2984_v4  ;;  %v960_v45 = vadd.f32 %v3282_v24, %v2984_v4  ;;  %v3283_v57 = vld [vmem:[#allocation18_spill] sm:$0xff] }
 0x24b   : > { %v2185_v35 = vpop.eup %2184  ;;  %v1342_v46 = vpack.c.bf16 %v1320_v39, %v1318_v3  ;;  %v1290_v28 = vmul.f32 %v2183_v27, %v3032_v16  ;;  %v1321_v63 = vmul.f32 %v1289_v29, %v936_v23  ;;  %v958_v3 = vadd.f32 %v3283_v57, %v2987_v56  ;;  %v3284_v39 = vld [vmem:[#allocation20_spill] sm:$0xff] }
 0x24c   : > { %v2187_v20 = vpop.eup %2186  ;;  %2202 = vrcp.f32 %v1202_v44  ;;  %v1203_v5 = vadd.f32 1.0, %v2185_v35 }
 0x24d   : > { %v2189_v31 = vpop.eup %2188  ;;  %v1291_v43 = vmul.f32 %v2187_v20, %v3036_v36  ;;  %1548 = vmatprep.mubr.bf16.mxu0 %v1342_v46  ;;  %v1322_v6 = vmul.f32 %v1290_v28, %v938_v18  ;;  %v3158_v46 = vld [vmem:[#allocation8] ss:$0 sm:$0xff] }
 0x24e   : > { %2204 = vrcp.f32 %v1203_v5  ;;  %v1204_v10 = vadd.f32 1.0, %v2189_v31  ;;  %1549 = vmatmul.mubr.bf16.gmra.mxu0 %v1341_v38 }
 0x24f   : > { %v2191_v55 = vpop.eup %2190  ;;  %v1323_v15 = vmul.f32 %v1291_v43, %v940_v17 }
 0x250   : > { %v1292_v40 = vmul.f32 %v2191_v55, %v3045_v54  ;;  %2206 = vrcp.f32 %v1204_v10 }
 0x251   : > { %v2193_v49 = vpop.eup %2192  ;;  %v1343_v36 = vpack.c.bf16 %v1323_v15, %v1321_v63 }
 0x252   : > { %v2195_v9 = vpop.eup %2194  ;;  %v1324_v16 = vmul.f32 %v1292_v40, %v942_v11  ;;  %v1293_v7 = vmul.f32 %v2193_v49, %v3053_v1 }
 0x253   : > { %v2197_v62 = vpop.eup %2196  ;;  %v1294_v33 = vmul.f32 %v2195_v9, %v3061_v59 }
 0x254   : > { %v1295_v50 = vmul.f32 %v2197_v62, %v3064_v12  ;;  %v1344_v54 = vpack.c.bf16 %v1324_v16, %v1322_v6  ;;  %v1325_v1 = vmul.f32 %v1293_v7, %v946_v26 }
 0x255   : > { %v2199_v2 = vpop.eup %2198  ;;  %v1326_v58 = vmul.f32 %v1294_v33, %v948_v61 }
 0x256   : > { %v1327_v21 = vmul.f32 %v1295_v50, %v950_v48  ;;  %v1296_v8 = vmul.f32 %v2199_v2, %v3074_v14  ;;  %1556 = vmatprep.mubr.bf16.mxu0 %v1344_v54 }
 0x257   : > { %v2201_v53 = vpop.eup %2200  ;;  %1557 = vmatmul.mubr.bf16.gmra.mxu0 %v1343_v36 }
 0x258   : > { %v1328_v25 = vmul.f32 %v1296_v8, %v952_v51  ;;  %v1345_v59 = vpack.c.bf16 %v1327_v21, %v1325_v1  ;;  %v1297_v12 = vmul.f32 %v2201_v53, %v3081_v19  ;;  %v962_v19 = vadd.f32 %v3284_v39, %v2987_v56 }
 0x259   : > { %v2203_v42 = vpop.eup %2202 }
 0x25a   : > { %v1346_v52 = vpack.c.bf16 %v1328_v25, %v1326_v58  ;;  %v1298_v41 = vmul.f32 %v2203_v42, %v3088_v0  ;;  %v1329_v38 = vmul.f32 %v1297_v12, %v956_v32 }
 0x25b   : > { %v2205_v37 = vpop.eup %2204 }
 0x25c   : > { %v1299_v14 = vmul.f32 %v2205_v37, %v3093_v34  ;;  %1564 = vmatprep.mubr.bf16.mxu0 %v1346_v52  ;;  %v1330_v35 = vmul.f32 %v1298_v41, %v958_v3 }
 0x25d   : > { %v2207_v13 = vpop.eup %2206 }
 0x25e   : > { %v1331_v27 = vmul.f32 %v1299_v14, %v960_v45  ;;  %v1300_v44 = vmul.f32 %v2207_v13, %v3097_v30 }
 0x25f   : > { %1565 = vmatmul.mubr.bf16.gmra.mxu0 %v1345_v59 }
 0x260   : > { %v1332_v4 = vmul.f32 %v1300_v44, %v962_v19  ;;  %v1347_v29 = vpack.c.bf16 %v1331_v27, %v1329_v38 }
 0x262   : > { %v1348_v0 = vpack.c.bf16 %v1332_v4, %v1330_v35 }
 0x264   : > { %1572 = vmatprep.mubr.bf16.mxu0 %v1348_v0 }
 0x267   : > { %1573 = vmatmul.mubr.bf16.gmra.mxu0 %v1347_v29 }
 0x2ed   : > { %v1834_v34 = vpop.f32.mrf.mxu0 }
 0x2ef   : > { %v1835_v20 = vpop.f32.mrf.mxu0 }
 0x2f0   : > { %v1836_v5 = vadd.f32 %v1835_v20, %v1834_v34 }
 0x2f1   : > { %v1837_v31 = vpop.f32.mrf.mxu0 }
 0x2f2   : > { %v1519_v56 = vadd.f32 %v1836_v5, %v3158_v46 }
 0x2f3   : > { %v1838_v23 = vpop.f32.mrf.mxu0 }
 0x2f4   : > { %1581 = vst [vmem:[%s3163_s21] sm:$0xff] %v1519_v56  ;;  %v1839_v30 = vadd.f32 %v1838_v23, %v1837_v31 }
 0x2f5   : > { %v1840_v17 = vpop.f32.mrf.mxu0 }
 0x2f6   : > { %v1522_v43 = vadd.f32 %v1839_v30, %v3158_v46 }
 0x2f7   : > { %v1841_v28 = vpop.f32.mrf.mxu0 }
 0x2f8   : > { %1582 = vst [vmem:[%s3163_s21 + $0x8] sm:$0xff] %v1522_v43  ;;  %v1842_v10 = vadd.f32 %v1841_v28, %v1840_v17 }
 0x2f9   : > { %v1843_v55 = vpop.f32.mrf.mxu0 }
 0x2fa   : > { %v1527_v63 = vadd.f32 %v1842_v10, %v3158_v46 }
 0x2fb   : > { %v1844_v15 = vpop.f32.mrf.mxu0 }
 0x2fc   : > { %1583 = vst [vmem:[%s3163_s21 + $0x10] sm:$0xff] %v1527_v63  ;;  %v1845_v18 = vadd.f32 %v1844_v15, %v1843_v55 }
 0x2fd   : > { %v1846_v11 = vpop.f32.mrf.mxu0 }
 0x2fe   : > { %v1530_v40 = vadd.f32 %v1845_v18, %v3158_v46 }
 0x2ff   : > { %v1847_v49 = vpop.f32.mrf.mxu0 }
 0x300   : > { %1584 = vst [vmem:[%s3163_s21 + $0x18] sm:$0xff] %v1530_v40  ;;  %v1848_v36 = vadd.f32 %v1847_v49, %v1846_v11 }
 0x301   : > { %v1849_v9 = vpop.f32.mrf.mxu0 }
 0x302   : > { %v1535_v6 = vadd.f32 %v1848_v36, %v3158_v46 }
 0x303   : > { %v1850_v16 = vpop.f32.mrf.mxu0 }
 0x304   : > { %1585 = vst [vmem:[%s3163_s21 + $0x20] sm:$0xff] %v1535_v6  ;;  %v1851_v7 = vadd.f32 %v1850_v16, %v1849_v9 }
 0x305   : > { %v1852_v62 = vpop.f32.mrf.mxu0 }
 0x306   : > { %v1538_v26 = vadd.f32 %v1851_v7, %v3158_v46 }
 0x307   : > { %v1853_v48 = vpop.f32.mrf.mxu0 }
 0x308   : > { %1586 = vst [vmem:[%s3163_s21 + $0x28] sm:$0xff] %v1538_v26  ;;  %v1854_v33 = vadd.f32 %v1853_v48, %v1852_v62 }
 0x309   : > { %v1855_v50 = vpop.f32.mrf.mxu0 }
 0x30a   : > { %v1543_v54 = vadd.f32 %v1854_v33, %v3158_v46 }
 0x30b   : > { %v1856_v2 = vpop.f32.mrf.mxu0 }
 0x30c   : > { %1587 = vst [vmem:[%s3163_s21 + $0x30] sm:$0xff] %v1543_v54  ;;  %v1857_v60 = vadd.f32 %v1856_v2, %v1855_v50 }
 0x30e   : > { %v1546_v61 = vadd.f32 %v1857_v60, %v3158_v46  ;;  %v1858_v22 = vpop.f32.mrf.mxu0 }
 0x310   : > { %1588 = vst [vmem:[%s3163_s21 + $0x38] sm:$0xff] %v1546_v61  ;;  %v1859_v51 = vpop.f32.mrf.mxu0 }
 0x311   : > { %v1860_v1 = vadd.f32 %v1859_v51, %v1858_v22 }
 0x312   : > { %v1861_v21 = vpop.f32.mrf.mxu0 }
 0x313   : > { %v1551_v8 = vadd.f32 %v1860_v1, %v3158_v46 }
 0x314   : > { %v1862_v53 = vpop.f32.mrf.mxu0 }
 0x315   : > { %1589 = vst [vmem:[%s3163_s21 + $0x40] sm:$0xff] %v1551_v8  ;;  %v1863_v58 = vadd.f32 %v1862_v53, %v1861_v21 }
 0x317   : > { %v1554_v25 = vadd.f32 %v1863_v58, %v3158_v46  ;;  %v1864_v59 = vpop.f32.mrf.mxu0 }
 0x319   : > { %1590 = vst [vmem:[%s3163_s21 + $0x48] sm:$0xff] %v1554_v25  ;;  %v1865_v42 = vpop.f32.mrf.mxu0 }
 0x31a   : > { %v1866_v12 = vadd.f32 %v1865_v42, %v1864_v59 }
 0x31b   : > { %v1867_v52 = vpop.f32.mrf.mxu0 }
 0x31c   : > { %v1559_v37 = vadd.f32 %v1866_v12, %v3158_v46 }
 0x31d   : > { %v1868_v47 = vpop.f32.mrf.mxu0 }
 0x31e   : > { %1591 = vst [vmem:[%s3163_s21 + $0x50] sm:$0xff] %v1559_v37  ;;  %v1869_v32 = vadd.f32 %v1868_v47, %v1867_v52 }
 0x31f   : > { %v1870_v24 = vpop.f32.mrf.mxu0 }
 0x320   : > { %v1562_v45 = vadd.f32 %v1869_v32, %v3158_v46 }
 0x321   : > { %v1871_v41 = vpop.f32.mrf.mxu0 }
 0x322   : > { %1592 = vst [vmem:[%s3163_s21 + $0x58] sm:$0xff] %v1562_v45  ;;  %v1872_v14 = vadd.f32 %v1871_v41, %v1870_v24 }
 0x323   : > { %v1873_v13 = vpop.f32.mrf.mxu0 }
 0x324   : > { %v1567_v57 = vadd.f32 %v1872_v14, %v3158_v46 }
 0x325   : > { %v1874_v3 = vpop.f32.mrf.mxu0 }
 0x326   : > { %1593 = vst [vmem:[%s3163_s21 + $0x60] sm:$0xff] %v1567_v57  ;;  %v1875_v39 = vadd.f32 %v1874_v3, %v1873_v13 }
 0x327   : > { %v1876_v19 = vpop.f32.mrf.mxu0 }
 0x328   : > { %v1570_v38 = vadd.f32 %v1875_v39, %v3158_v46 }
 0x329   : > { %v1877_v27 = vpop.f32.mrf.mxu0 }
 0x32a   : > { %1594 = vst [vmem:[%s3163_s21 + $0x68] sm:$0xff] %v1570_v38  ;;  %v1878_v44 = vadd.f32 %v1877_v27, %v1876_v19 }
 0x32b   : > { %v1879_v35 = vpop.f32.mrf.mxu0 }
 0x32c   : > { %v1575_v4 = vadd.f32 %v1878_v44, %v3158_v46 }
 0x32d   : > { %v1880_v29 = vpop.f32.mrf.mxu0 }
 0x32e   : > { %1595 = vst [vmem:[%s3163_s21 + $0x70] sm:$0xff] %v1575_v4  ;;  %v1881_v0 = vadd.f32 %v1880_v29, %v1879_v35 }
 0x330   : > { %v1578_v34 = vadd.f32 %v1881_v0, %v3158_v46 }
 0x332   : > { %1596 = vst [vmem:[%s3163_s21 + $0x78] sm:$0xff] %v1578_v34 }
 0x333   : > { %2327 = shalt.err (!%p2324_p9)
}
 0x334   : > { %s2328_s11 = scalar_lea.hbm %s3199_s3, 2048  ;;  %s2332_s17 = scalar_lea.hbm %s3253_s7, 4096 }
 0x335   : > { %p2329_p7 = scmp.ne.s32.totalorder %s3199_s3, %s2328_s11  ;;  %p2333_p6 = scmp.lt.s32.totalorder %s3199_s3, %s3253_s7 }
 0x336   : > { %p2334_p11 = scmp.lt.s32.totalorder %s2332_s17, %s2328_s11 }
 0x337   : > { %p2330_p4 = pnand %p2329_p7, %p3285_p0 }
 0x338   : > { %p2335_p13 = por %p2334_p11, %p2333_p6 }
 0x339   : > { %p2331_p8 = pneg %p2330_p4 }
 0x33b   : > { %p2336_p12 = pnand %p2335_p13, %p2331_p8 }
 0x33d   : > { %2339 = shalt.err (!%p2336_p12)
}
 0x33e   : > { %s2400_s18 = smov 128   ;;  %s2401_s22 = smov 8  }
 0x33f   : > { %1912 = dma.vmem_to_hbm [thread:$0]  (%p3285_p0), %s3201_s19, 2048, %s3199_s3, %s1598_s29, %s2400_s18, %s2400_s18, %s2401_s22  }
 0x340 PF: > { %s1626_s10 = sand.u32 1, %s2374_s24   ;;  %p3286_p5 = scmp.ne.s32.totalorder %s3260_s8, 0 }
 0x341   : > { %p3287_p10 = scmp.ge.s32.totalorder %s2386_s27, 2  ;;  %s1627_s28 = scalar_lea.sflag [#allocation4], %s1626_s10 }
 0x343   : > { %p1929_p1 = pnand %p3287_p10, %p3286_p5 }
 0x345   : > { %p1930_p2 = pneg %p1929_p1 }
 0x347   : > { %2369 = dma.done.wait (%p1930_p2), %s1627_s28, 2048  }
 0x348   : > { %2371 = vsyncadd (%p1930_p2), %s1627_s28, 4294965248  ;;  %p22_p3 = scmp.ge.s32.totalorder %s2514_s13, 4   ;;  %s3288_s24 = smov %s2378_s25 }
 0x349   : > { %s3289_s25 = smov %s2382_s26  ;;  %s3290_s26 = smov %s2532_s12 }
 0x34a   : > { %s3291_s27 = smov %s2514_s13  ;;  %24 = sbr.rel (!%p22_p3) target bundleno = 9 (0x9), region = 105 }
 0x34f   :  { %1632 = vsyncpa [#allocation3], 1 }
 0x350   :  { %1634 = vsyncpa [#allocation3 + $0x1], 1 }
 0x351   :  { %1635 = vsyncpa [#allocation6], 1 }
 0x352   :  { %1636 = vsyncpa [#allocation9], 1 }
 0x353   :  { %1637 = vsyncpa [#allocation4], 1 }
 0x354   :  { %1639 = vsyncpa [#allocation4 + $0x1], 1 }

</bundles_post_ra>
